<compile_context>
chip_gen: v7x
topology: tpu7x:2x2x1
jax: 0.10.0
libtpu: 0.0.40
codegen_flags: <defaults>
</compile_context>

<pallas_src>
import functools

import jax
import jax.numpy as jnp
from jax.experimental import pallas as pl
from jax.experimental.pallas import tpu as pltpu


# ----------------------------------------------------------------------------
# Helpers
# ----------------------------------------------------------------------------
def _round_up(x, m):
    return (x + m - 1) // m * m


def _pick_tile(dim, candidates):
    for t in candidates:
        if dim % t == 0:
            return t
    return dim


def _im2col(x_nhwc, kh, kw, stride, pad):
    """x: (N, H, W, C) -> (N, OH*OW, KH*KW*C), column order = (kh, kw, c)."""
    x = jnp.pad(x_nhwc, ((0, 0), (pad, pad), (pad, pad), (0, 0)))
    n, h, w, c = x.shape
    oh = (h - kh) // stride + 1
    ow = (w - kw) // stride + 1
    taps = []
    for i in range(kh):
        for j in range(kw):
            taps.append(
                x[:, i:i + stride * (oh - 1) + 1:stride,
                  j:j + stride * (ow - 1) + 1:stride, :]
            )
    patches = jnp.stack(taps, axis=3)  # (N, OH, OW, KH*KW, C)
    return patches.reshape(n, oh * ow, kh * kw * c), oh, ow


def _weight_matrix(w_oihw):
    """PyTorch (Cout, Cin, KH, KW) -> (KH*KW*Cin, Cout) matching _im2col order."""
    cout = w_oihw.shape[0]
    return jnp.transpose(w_oihw, (2, 3, 1, 0)).reshape(-1, cout)


# ----------------------------------------------------------------------------
# Pallas kernel: tiled conv-as-matmul with fused bias / InstanceNorm / LeakyReLU
# ----------------------------------------------------------------------------
def _conv_block_kernel(*refs, slope, eps, has_bias, apply_norm, apply_act):
    if has_bias:
        x_ref, w_ref, b_ref, o_ref, acc_ref = refs
    else:
        x_ref, w_ref, o_ref, acc_ref = refs
        b_ref = None

    k = pl.program_id(2)

    @pl.when(k == 0)
    def _init():
        acc_ref[...] = jnp.zeros_like(acc_ref)

    # (hw, tk) bf16 @ (tk, tn) bf16 -> f32 accumulate on MXU.
    acc_ref[...] += jnp.dot(
        x_ref[...], w_ref[...], preferred_element_type=jnp.float32
    )

    @pl.when(k == pl.num_programs(2) - 1)
    def _finalize():
        acc = acc_ref[...]                       # (hw, tn) float32
        if has_bias:
            acc = acc + b_ref[...]               # (1, tn) broadcast
        if apply_norm:
            # InstanceNorm2d(affine=False): per (sample, channel) stats over
            # H*W, biased variance, eps inside rsqrt. The full per-sample H*W
            # extent lives in this tile, so the reduction is local.
            mean = jnp.mean(acc, axis=0, keepdims=True)
            cen = acc - mean
            var = jnp.mean(cen * cen, axis=0, keepdims=True)
            acc = cen * jax.lax.rsqrt(var + eps)
        if apply_act:
            acc = jnp.where(acc >= 0, acc, slope * acc)
        o_ref[...] = acc.astype(o_ref.dtype)


# ----------------------------------------------------------------------------
# Layer wrapper
# ----------------------------------------------------------------------------
def _conv_block(x_nhwc, w_oihw, b, *, stride, pad, apply_norm, apply_act,
                out_dtype=jnp.bfloat16, slope=0.2, eps=1e-5):
    n = x_nhwc.shape[0]
    cols, oh, ow = _im2col(x_nhwc.astype(jnp.bfloat16), 4, 4, stride, pad)
    hw = oh * ow

    k = cols.shape[-1]
    kp = _round_up(k, 128)                       # lane-align K (96 -> 128 etc.)
    if kp != k:
        cols = jnp.pad(cols, ((0, 0), (0, 0), (0, kp - k)))

    cout = w_oihw.shape[0]
    coutp = _round_up(cout, 128)                 # lane-dense output stores
    wm = _weight_matrix(w_oihw).astype(jnp.bfloat16)
    wm = jnp.pad(wm, ((0, kp - k), (0, coutp - cout)))

    tk = _pick_tile(kp, (512, 256, 128))
    tn = _pick_tile(coutp, (256, 128))

    has_bias = b is not None
    kernel = functools.partial(
        _conv_block_kernel, slope=slope, eps=eps, has_bias=has_bias,
        apply_norm=apply_norm, apply_act=apply_act)

    in_specs = [
        pl.BlockSpec((None, hw, tk), lambda bi, j, ki: (bi, 0, ki)),
        pl.BlockSpec((tk, tn), lambda bi, j, ki: (ki, j)),
    ]
    inputs = [cols, wm]
    if has_bias:
        bias = jnp.pad(b.astype(jnp.float32).reshape(1, cout),
                       ((0, 0), (0, coutp - cout)))
        in_specs.append(pl.BlockSpec((1, tn), lambda bi, j, ki: (0, j)))
        inputs.append(bias)

    grid = (n, coutp // tn, kp // tk)

    out_bytes = n * hw * coutp * jnp.dtype(out_dtype).itemsize
    cost = pl.CostEstimate(
        flops=2 * n * hw * kp * coutp,
        transcendentals=0,
        bytes_accessed=int(cols.size * 2 + wm.size * 2 * n + out_bytes),
    )

    out = pl.pallas_call(
        kernel,
        out_shape=jax.ShapeDtypeStruct((n, hw, coutp), out_dtype),
        grid=grid,
        in_specs=in_specs,
        out_specs=pl.BlockSpec((None, hw, tn), lambda bi, j, ki: (bi, 0, j)),
        scratch_shapes=[pltpu.VMEM((hw, tn), jnp.float32)],
        compiler_params=pltpu.CompilerParams(
            dimension_semantics=("parallel", "parallel", "arbitrary"),
            vmem_limit_bytes=32 * 1024 * 1024,
        ),
        cost_estimate=cost,
    )(*inputs)

    out = out.reshape(n, oh, ow, coutp)
    if coutp != cout:
        out = out[..., :cout]
    return out


# ----------------------------------------------------------------------------
# Discriminator forward
# ----------------------------------------------------------------------------
def init_params(key, in_channels=3):
    ks = jax.random.split(key, 9)

    def w(k_, cout, cin):
        return jax.random.normal(k_, (cout, cin, 4, 4), jnp.float32) * 0.02

    def b(k_, cout):
        return jax.random.normal(k_, (cout,), jnp.float32) * 0.02

    return {
        "w1": w(ks[0], 64, in_channels * 2), "b1": b(ks[1], 64),
        "w2": w(ks[2], 128, 64),             "b2": b(ks[3], 128),
        "w3": w(ks[4], 256, 128),            "b3": b(ks[5], 256),
        "w4": w(ks[6], 512, 256),            "b4": b(ks[7], 512),
        "w5": w(ks[8], 1, 512),              # final conv: bias=False
    }


def discriminator_forward(params, img_A, img_B):
    # inputs / outputs: NCHW (PyTorch convention)
    x = jnp.concatenate([img_A, img_B], axis=1)           # (N, 2C, H, W)
    x = jnp.transpose(x, (0, 2, 3, 1)).astype(jnp.bfloat16)  # -> NHWC bf16

    # block 1: conv(s=2,p=1) + bias + LeakyReLU(0.2)  (no normalization)
    x = _conv_block(x, params["w1"], params["b1"], stride=2, pad=1,
                    apply_norm=False, apply_act=True)
    # blocks 2-4: conv(s=2,p=1) + InstanceNorm2d + LeakyReLU(0.2), fused.
    # Conv bias is omitted: InstanceNorm's per-channel mean subtraction
    # cancels it exactly (numerically equivalent to the PyTorch module).
    x = _conv_block(x, params["w2"], None, stride=2, pad=1,
                    apply_norm=True, apply_act=True)
    x = _conv_block(x, params["w3"], None, stride=2, pad=1,
                    apply_norm=True, apply_act=True)
    x = _conv_block(x, params["w4"], None, stride=2, pad=1,
                    apply_norm=True, apply_act=True)

    # ZeroPad2d((left=1, right=0, top=1, bottom=0))
    x = jnp.pad(x, ((0, 0), (1, 0), (1, 0), (0, 0)))
    # final conv: Conv2d(512, 1, 4, stride=1, padding=1, bias=False)
    x = _conv_block(x, params["w5"], None, stride=1, pad=1,
                    apply_norm=False, apply_act=False,
                    out_dtype=jnp.float32)

    return jnp.transpose(x, (0, 3, 1, 2)).astype(jnp.float32)  # -> NCHW


if __name__ == "__main__":
    key = jax.random.PRNGKey(0)
    k_params, k_a, k_b = jax.random.split(key, 3)

    params = init_params(k_params, in_channels=3)
    # small PatchGAN-consistent shapes: batch=2, channels=3, spatial=32
    img_A = jax.random.normal(k_a, (2, 3, 32, 32), jnp.float32)
    img_B = jax.random.normal(k_b, (2, 3, 32, 32), jnp.float32)

    out = jax.jit(discriminator_forward)(params, img_A, img_B)
    out = jax.block_until_ready(out)
    assert out.shape == (2, 1, 2, 2), out.shape
    print("KERNEL_OK")
</pallas_src>

<mosaic_0001>
module attributes {stable_mosaic.version = 11 : i64} {
  func.func @_conv_block_kernel(%arg0: i32, %arg1: i32, %arg2: i32, %arg3: memref<1x256x128xbf16, #tpu.memory_space<vmem>>, %arg4: memref<128x128xbf16, #tpu.memory_space<vmem>>, %arg5: memref<1x128xf32, #tpu.memory_space<vmem>>, %arg6: memref<1x256x128xbf16, #tpu.memory_space<vmem>>, %arg7: memref<256x128xf32, #tpu.memory_space<vmem>>) attributes {dimension_semantics = [#tpu.dimension_semantics<parallel>, #tpu.dimension_semantics<parallel>, #tpu.dimension_semantics<arbitrary>], iteration_bounds = array<i64: 2, 1, 1>, scalar_prefetch = 0 : i64, scratch_operands = 1 : i64, tpu.core_type = #tpu.core_type<tc>, window_params = [{transform_indices = @transform_0, window_bounds = array<i64: 1, 256, 128>}, {transform_indices = @transform_1, window_bounds = array<i64: 128, 128>}, {transform_indices = @transform_2, window_bounds = array<i64: 1, 128>}, {transform_indices = @transform_3, window_bounds = array<i64: 1, 256, 128>}]} {
    %c0_i32 = arith.constant 0 : i32
    %0 = arith.cmpi eq, %arg2, %c0_i32 : i32
    %1 = arith.extui %0 : i1 to i32
    %c0_i32_0 = arith.constant 0 : i32
    %2 = arith.cmpi ne, %1, %c0_i32_0 : i32
    scf.if %2 {
      %cst_11 = arith.constant 0.000000e+00 : f32
      %13 = vector.broadcast %cst_11 : f32 to vector<256x128xf32>
      %c0_12 = arith.constant 0 : index
      %c0_13 = arith.constant 0 : index
      %14 = vector.load %arg7[%c0_12, %c0_13] : memref<256x128xf32, #tpu.memory_space<vmem>>, vector<256x128xf32>
      tpu.vector_store %arg7[%c0_12, %c0_13], %13 {strides = array<i32>} : memref<256x128xf32, #tpu.memory_space<vmem>>, vector<256x128xf32>,
    } else {
    }
    %c0 = arith.constant 0 : index
    %c0_1 = arith.constant 0 : index
    %3 = vector.load %arg7[%c0, %c0_1] : memref<256x128xf32, #tpu.memory_space<vmem>>, vector<256x128xf32>
    %c0_2 = arith.constant 0 : index
    %c0_3 = arith.constant 0 : index
    %c0_4 = arith.constant 0 : index
    %4 = vector.load %arg3[%c0_2, %c0_3, %c0_4] : memref<1x256x128xbf16, #tpu.memory_space<vmem>>, vector<1x256x128xbf16>
    %5 = vector.shape_cast %4 : vector<1x256x128xbf16> to vector<256x128xbf16>
    %c0_5 = arith.constant 0 : index
    %c0_6 = arith.constant 0 : index
    %6 = vector.load %arg4[%c0_5, %c0_6] : memref<128x128xbf16, #tpu.memory_space<vmem>>, vector<128x128xbf16>
    %cst = arith.constant dense<0.000000e+00> : vector<256x128xf32>
    %7 = tpu.matmul %5, %6, %cst {dimension_numbers = #tpu.dot_dimension_numbers<[1], [0], [0], [1], [0, 0, 1, 1], [], []>} : vector<256x128xbf16>, vector<128x128xbf16>, vector<256x128xf32> -> vector<256x128xf32>
    %8 = arith.addf %3, %7 : vector<256x128xf32>
    %c0_7 = arith.constant 0 : index
    %c0_8 = arith.constant 0 : index
    %9 = vector.load %arg7[%c0_7, %c0_8] : memref<256x128xf32, #tpu.memory_space<vmem>>, vector<256x128xf32>
    tpu.vector_store %arg7[%c0_7, %c0_8], %8 {strides = array<i32>} : memref<256x128xf32, #tpu.memory_space<vmem>>, vector<256x128xf32>,
    %c0_i32_9 = arith.constant 0 : i32
    %10 = arith.cmpi eq, %arg2, %c0_i32_9 : i32
    %11 = arith.extui %10 : i1 to i32
    %c0_i32_10 = arith.constant 0 : i32
    %12 = arith.cmpi ne, %11, %c0_i32_10 : i32
    scf.if %12 {
      %c0_11 = arith.constant 0 : index
      %c0_12 = arith.constant 0 : index
      %13 = vector.load %arg7[%c0_11, %c0_12] : memref<256x128xf32, #tpu.memory_space<vmem>>, vector<256x128xf32>
      %c0_13 = arith.constant 0 : index
      %c0_14 = arith.constant 0 : index
      %14 = vector.load %arg5[%c0_13, %c0_14] : memref<1x128xf32, #tpu.memory_space<vmem>>, vector<1x128xf32>
      %15 = vector.broadcast %14 : vector<1x128xf32> to vector<256x128xf32>
      %16 = arith.addf %13, %15 : vector<256x128xf32>
      %cst_15 = arith.constant 0.000000e+00 : f32
      %17 = vector.broadcast %cst_15 : f32 to vector<256x128xf32>
      %18 = arith.cmpf oge, %16, %17 : vector<256x128xf32>
      %cst_16 = arith.constant 2.000000e-01 : f32
      %19 = vector.broadcast %cst_16 : f32 to vector<256x128xf32>
      %20 = arith.mulf %19, %16 : vector<256x128xf32>
      %21 = arith.select %18, %16, %20 : vector<256x128xi1>, vector<256x128xf32>
      %22 = arith.truncf %21 : vector<256x128xf32> to vector<256x128xbf16>
      %c0_17 = arith.constant 0 : index
      %c0_18 = arith.constant 0 : index
      %c0_19 = arith.constant 0 : index
      %23 = vector.load %arg6[%c0_17, %c0_18, %c0_19] : memref<1x256x128xbf16, #tpu.memory_space<vmem>>, vector<1x256x128xbf16>
      %24 = vector.shape_cast %23 : vector<1x256x128xbf16> to vector<256x128xbf16>
      %25 = vector.shape_cast %22 : vector<256x128xbf16> to vector<1x256x128xbf16>
      tpu.vector_store %arg6[%c0_17, %c0_18, %c0_19], %25 {strides = array<i32>} : memref<1x256x128xbf16, #tpu.memory_space<vmem>>, vector<1x256x128xbf16>,
    } else {
    }
    return
  }
  func.func @transform_0(%arg0: i32, %arg1: i32, %arg2: i32) -> (i32, i32, i32) {
    %c0_i32 = arith.constant 0 : i32
    %c0_i32_0 = arith.constant 0 : i32
    return %arg0, %c0_i32, %arg2 : i32, i32, i32
  }
  func.func @transform_1(%arg0: i32, %arg1: i32, %arg2: i32) -> (i32, i32) {
    %c0_i32 = arith.constant 0 : i32
    return %arg2, %arg1 : i32, i32
  }
  func.func @transform_2(%arg0: i32, %arg1: i32, %arg2: i32) -> (i32, i32) {
    %c0_i32 = arith.constant 0 : i32
    %c0_i32_0 = arith.constant 0 : i32
    return %c0_i32, %arg1 : i32, i32
  }
  func.func @transform_3(%arg0: i32, %arg1: i32, %arg2: i32) -> (i32, i32, i32) {
    %c0_i32 = arith.constant 0 : i32
    %c0_i32_0 = arith.constant 0 : i32
    return %arg0, %c0_i32, %arg1 : i32, i32, i32
  }
}

module attributes {stable_mosaic.version = 11 : i64} {
  func.func @_conv_block_kernel(%arg0: i32, %arg1: i32, %arg2: i32, %arg3: memref<1x64x512xbf16, #tpu.memory_space<vmem>>, %arg4: memref<512x128xbf16, #tpu.memory_space<vmem>>, %arg5: memref<1x64x128xbf16, #tpu.memory_space<vmem>>, %arg6: memref<64x128xf32, #tpu.memory_space<vmem>>) attributes {dimension_semantics = [#tpu.dimension_semantics<parallel>, #tpu.dimension_semantics<parallel>, #tpu.dimension_semantics<arbitrary>], iteration_bounds = array<i64: 2, 1, 2>, scalar_prefetch = 0 : i64, scratch_operands = 1 : i64, tpu.core_type = #tpu.core_type<tc>, window_params = [{transform_indices = @transform_0, window_bounds = array<i64: 1, 64, 512>}, {transform_indices = @transform_1, window_bounds = array<i64: 512, 128>}, {transform_indices = @transform_2, window_bounds = array<i64: 1, 64, 128>}]} {
    %c0_i32 = arith.constant 0 : i32
    %0 = arith.cmpi eq, %arg2, %c0_i32 : i32
    %1 = arith.extui %0 : i1 to i32
    %c0_i32_0 = arith.constant 0 : i32
    %2 = arith.cmpi ne, %1, %c0_i32_0 : i32
    scf.if %2 {
      %cst_10 = arith.constant 0.000000e+00 : f32
      %13 = vector.broadcast %cst_10 : f32 to vector<64x128xf32>
      %c0_11 = arith.constant 0 : index
      %c0_12 = arith.constant 0 : index
      %14 = vector.load %arg6[%c0_11, %c0_12] : memref<64x128xf32, #tpu.memory_space<vmem>>, vector<64x128xf32>
      tpu.vector_store %arg6[%c0_11, %c0_12], %13 {strides = array<i32>} : memref<64x128xf32, #tpu.memory_space<vmem>>, vector<64x128xf32>,
    } else {
    }
    %c0 = arith.constant 0 : index
    %c0_1 = arith.constant 0 : index
    %3 = vector.load %arg6[%c0, %c0_1] : memref<64x128xf32, #tpu.memory_space<vmem>>, vector<64x128xf32>
    %c0_2 = arith.constant 0 : index
    %c0_3 = arith.constant 0 : index
    %c0_4 = arith.constant 0 : index
    %4 = vector.load %arg3[%c0_2, %c0_3, %c0_4] : memref<1x64x512xbf16, #tpu.memory_space<vmem>>, vector<1x64x512xbf16>
    %5 = vector.shape_cast %4 : vector<1x64x512xbf16> to vector<64x512xbf16>
    %c0_5 = arith.constant 0 : index
    %c0_6 = arith.constant 0 : index
    %6 = vector.load %arg4[%c0_5, %c0_6] : memref<512x128xbf16, #tpu.memory_space<vmem>>, vector<512x128xbf16>
    %cst = arith.constant dense<0.000000e+00> : vector<64x128xf32>
    %7 = tpu.matmul %5, %6, %cst {dimension_numbers = #tpu.dot_dimension_numbers<[1], [0], [0], [1], [0, 0, 1, 1], [], []>} : vector<64x512xbf16>, vector<512x128xbf16>, vector<64x128xf32> -> vector<64x128xf32>
    %8 = arith.addf %3, %7 : vector<64x128xf32>
    %c0_7 = arith.constant 0 : index
    %c0_8 = arith.constant 0 : index
    %9 = vector.load %arg6[%c0_7, %c0_8] : memref<64x128xf32, #tpu.memory_space<vmem>>, vector<64x128xf32>
    tpu.vector_store %arg6[%c0_7, %c0_8], %8 {strides = array<i32>} : memref<64x128xf32, #tpu.memory_space<vmem>>, vector<64x128xf32>,
    %c1_i32 = arith.constant 1 : i32
    %10 = arith.cmpi eq, %arg2, %c1_i32 : i32
    %11 = arith.extui %10 : i1 to i32
    %c0_i32_9 = arith.constant 0 : i32
    %12 = arith.cmpi ne, %11, %c0_i32_9 : i32
    scf.if %12 {
      %c0_10 = arith.constant 0 : index
      %c0_11 = arith.constant 0 : index
      %13 = vector.load %arg6[%c0_10, %c0_11] : memref<64x128xf32, #tpu.memory_space<vmem>>, vector<64x128xf32>
      %cst_12 = arith.constant dense<0.000000e+00> : vector<128xf32>
      %14 = vector.multi_reduction <add>, %13, %cst_12 [0] : vector<64x128xf32> to vector<128xf32>
      %15 = vector.shape_cast %14 : vector<128xf32> to vector<1x128xf32>
      %cst_13 = arith.constant 6.400000e+01 : f32
      %16 = vector.broadcast %cst_13 : f32 to vector<1x128xf32>
      %17 = arith.divf %15, %16 : vector<1x128xf32>
      %18 = vector.broadcast %17 : vector<1x128xf32> to vector<64x128xf32>
      %19 = arith.subf %13, %18 : vector<64x128xf32>
      %20 = arith.mulf %19, %19 : vector<64x128xf32>
      %cst_14 = arith.constant dense<0.000000e+00> : vector<128xf32>
      %21 = vector.multi_reduction <add>, %20, %cst_14 [0] : vector<64x128xf32> to vector<128xf32>
      %22 = vector.shape_cast %21 : vector<128xf32> to vector<1x128xf32>
      %cst_15 = arith.constant 6.400000e+01 : f32
      %23 = vector.broadcast %cst_15 : f32 to vector<1x128xf32>
      %24 = arith.divf %22, %23 : vector<1x128xf32>
      %cst_16 = arith.constant 9.99999974E-6 : f32
      %25 = vector.broadcast %cst_16 : f32 to vector<1x128xf32>
      %26 = arith.addf %24, %25 : vector<1x128xf32>
      %27 = math.rsqrt %26 : vector<1x128xf32>
      %28 = vector.broadcast %27 : vector<1x128xf32> to vector<64x128xf32>
      %29 = arith.mulf %19, %28 : vector<64x128xf32>
      %cst_17 = arith.constant 0.000000e+00 : f32
      %30 = vector.broadcast %cst_17 : f32 to vector<64x128xf32>
      %31 = arith.cmpf oge, %29, %30 : vector<64x128xf32>
      %cst_18 = arith.constant 2.000000e-01 : f32
      %32 = vector.broadcast %cst_18 : f32 to vector<64x128xf32>
      %33 = arith.mulf %32, %29 : vector<64x128xf32>
      %34 = arith.select %31, %29, %33 : vector<64x128xi1>, vector<64x128xf32>
      %35 = arith.truncf %34 : vector<64x128xf32> to vector<64x128xbf16>
      %c0_19 = arith.constant 0 : index
      %c0_20 = arith.constant 0 : index
      %c0_21 = arith.constant 0 : index
      %36 = vector.load %arg5[%c0_19, %c0_20, %c0_21] : memref<1x64x128xbf16, #tpu.memory_space<vmem>>, vector<1x64x128xbf16>
      %37 = vector.shape_cast %36 : vector<1x64x128xbf16> to vector<64x128xbf16>
      %38 = vector.shape_cast %35 : vector<64x128xbf16> to vector<1x64x128xbf16>
      tpu.vector_store %arg5[%c0_19, %c0_20, %c0_21], %38 {strides = array<i32>} : memref<1x64x128xbf16, #tpu.memory_space<vmem>>, vector<1x64x128xbf16>,
    } else {
    }
    return
  }
  func.func @transform_0(%arg0: i32, %arg1: i32, %arg2: i32) -> (i32, i32, i32) {
    %c0_i32 = arith.constant 0 : i32
    %c0_i32_0 = arith.constant 0 : i32
    return %arg0, %c0_i32, %arg2 : i32, i32, i32
  }
  func.func @transform_1(%arg0: i32, %arg1: i32, %arg2: i32) -> (i32, i32) {
    %c0_i32 = arith.constant 0 : i32
    return %arg2, %arg1 : i32, i32
  }
  func.func @transform_2(%arg0: i32, %arg1: i32, %arg2: i32) -> (i32, i32, i32) {
    %c0_i32 = arith.constant 0 : i32
    %c0_i32_0 = arith.constant 0 : i32
    return %arg0, %c0_i32, %arg1 : i32, i32, i32
  }
}

module attributes {stable_mosaic.version = 11 : i64} {
  func.func @_conv_block_kernel(%arg0: i32, %arg1: i32, %arg2: i32, %arg3: memref<1x16x512xbf16, #tpu.memory_space<vmem>>, %arg4: memref<512x256xbf16, #tpu.memory_space<vmem>>, %arg5: memref<1x16x256xbf16, #tpu.memory_space<vmem>>, %arg6: memref<16x256xf32, #tpu.memory_space<vmem>>) attributes {dimension_semantics = [#tpu.dimension_semantics<parallel>, #tpu.dimension_semantics<parallel>, #tpu.dimension_semantics<arbitrary>], iteration_bounds = array<i64: 2, 1, 4>, scalar_prefetch = 0 : i64, scratch_operands = 1 : i64, tpu.core_type = #tpu.core_type<tc>, window_params = [{transform_indices = @transform_0, window_bounds = array<i64: 1, 16, 512>}, {transform_indices = @transform_1, window_bounds = array<i64: 512, 256>}, {transform_indices = @transform_2, window_bounds = array<i64: 1, 16, 256>}]} {
    %c0_i32 = arith.constant 0 : i32
    %0 = arith.cmpi eq, %arg2, %c0_i32 : i32
    %1 = arith.extui %0 : i1 to i32
    %c0_i32_0 = arith.constant 0 : i32
    %2 = arith.cmpi ne, %1, %c0_i32_0 : i32
    scf.if %2 {
      %cst_10 = arith.constant 0.000000e+00 : f32
      %13 = vector.broadcast %cst_10 : f32 to vector<16x256xf32>
      %c0_11 = arith.constant 0 : index
      %c0_12 = arith.constant 0 : index
      %14 = vector.load %arg6[%c0_11, %c0_12] : memref<16x256xf32, #tpu.memory_space<vmem>>, vector<16x256xf32>
      tpu.vector_store %arg6[%c0_11, %c0_12], %13 {strides = array<i32>} : memref<16x256xf32, #tpu.memory_space<vmem>>, vector<16x256xf32>,
    } else {
    }
    %c0 = arith.constant 0 : index
    %c0_1 = arith.constant 0 : index
    %3 = vector.load %arg6[%c0, %c0_1] : memref<16x256xf32, #tpu.memory_space<vmem>>, vector<16x256xf32>
    %c0_2 = arith.constant 0 : index
    %c0_3 = arith.constant 0 : index
    %c0_4 = arith.constant 0 : index
    %4 = vector.load %arg3[%c0_2, %c0_3, %c0_4] : memref<1x16x512xbf16, #tpu.memory_space<vmem>>, vector<1x16x512xbf16>
    %5 = vector.shape_cast %4 : vector<1x16x512xbf16> to vector<16x512xbf16>
    %c0_5 = arith.constant 0 : index
    %c0_6 = arith.constant 0 : index
    %6 = vector.load %arg4[%c0_5, %c0_6] : memref<512x256xbf16, #tpu.memory_space<vmem>>, vector<512x256xbf16>
    %cst = arith.constant dense<0.000000e+00> : vector<16x256xf32>
    %7 = tpu.matmul %5, %6, %cst {dimension_numbers = #tpu.dot_dimension_numbers<[1], [0], [0], [1], [0, 0, 1, 1], [], []>} : vector<16x512xbf16>, vector<512x256xbf16>, vector<16x256xf32> -> vector<16x256xf32>
    %8 = arith.addf %3, %7 : vector<16x256xf32>
    %c0_7 = arith.constant 0 : index
    %c0_8 = arith.constant 0 : index
    %9 = vector.load %arg6[%c0_7, %c0_8] : memref<16x256xf32, #tpu.memory_space<vmem>>, vector<16x256xf32>
    tpu.vector_store %arg6[%c0_7, %c0_8], %8 {strides = array<i32>} : memref<16x256xf32, #tpu.memory_space<vmem>>, vector<16x256xf32>,
    %c3_i32 = arith.constant 3 : i32
    %10 = arith.cmpi eq, %arg2, %c3_i32 : i32
    %11 = arith.extui %10 : i1 to i32
    %c0_i32_9 = arith.constant 0 : i32
    %12 = arith.cmpi ne, %11, %c0_i32_9 : i32
    scf.if %12 {
      %c0_10 = arith.constant 0 : index
      %c0_11 = arith.constant 0 : index
      %13 = vector.load %arg6[%c0_10, %c0_11] : memref<16x256xf32, #tpu.memory_space<vmem>>, vector<16x256xf32>
      %cst_12 = arith.constant dense<0.000000e+00> : vector<256xf32>
      %14 = vector.multi_reduction <add>, %13, %cst_12 [0] : vector<16x256xf32> to vector<256xf32>
      %15 = vector.shape_cast %14 : vector<256xf32> to vector<1x256xf32>
      %cst_13 = arith.constant 1.600000e+01 : f32
      %16 = vector.broadcast %cst_13 : f32 to vector<1x256xf32>
      %17 = arith.divf %15, %16 : vector<1x256xf32>
      %18 = vector.broadcast %17 : vector<1x256xf32> to vector<16x256xf32>
      %19 = arith.subf %13, %18 : vector<16x256xf32>
      %20 = arith.mulf %19, %19 : vector<16x256xf32>
      %cst_14 = arith.constant dense<0.000000e+00> : vector<256xf32>
      %21 = vector.multi_reduction <add>, %20, %cst_14 [0] : vector<16x256xf32> to vector<256xf32>
      %22 = vector.shape_cast %21 : vector<256xf32> to vector<1x256xf32>
      %cst_15 = arith.constant 1.600000e+01 : f32
      %23 = vector.broadcast %cst_15 : f32 to vector<1x256xf32>
      %24 = arith.divf %22, %23 : vector<1x256xf32>
      %cst_16 = arith.constant 9.99999974E-6 : f32
      %25 = vector.broadcast %cst_16 : f32 to vector<1x256xf32>
      %26 = arith.addf %24, %25 : vector<1x256xf32>
      %27 = math.rsqrt %26 : vector<1x256xf32>
      %28 = vector.broadcast %27 : vector<1x256xf32> to vector<16x256xf32>
      %29 = arith.mulf %19, %28 : vector<16x256xf32>
      %cst_17 = arith.constant 0.000000e+00 : f32
      %30 = vector.broadcast %cst_17 : f32 to vector<16x256xf32>
      %31 = arith.cmpf oge, %29, %30 : vector<16x256xf32>
      %cst_18 = arith.constant 2.000000e-01 : f32
      %32 = vector.broadcast %cst_18 : f32 to vector<16x256xf32>
      %33 = arith.mulf %32, %29 : vector<16x256xf32>
      %34 = arith.select %31, %29, %33 : vector<16x256xi1>, vector<16x256xf32>
      %35 = arith.truncf %34 : vector<16x256xf32> to vector<16x256xbf16>
      %c0_19 = arith.constant 0 : index
      %c0_20 = arith.constant 0 : index
      %c0_21 = arith.constant 0 : index
      %36 = vector.load %arg5[%c0_19, %c0_20, %c0_21] : memref<1x16x256xbf16, #tpu.memory_space<vmem>>, vector<1x16x256xbf16>
      %37 = vector.shape_cast %36 : vector<1x16x256xbf16> to vector<16x256xbf16>
      %38 = vector.shape_cast %35 : vector<16x256xbf16> to vector<1x16x256xbf16>
      tpu.vector_store %arg5[%c0_19, %c0_20, %c0_21], %38 {strides = array<i32>} : memref<1x16x256xbf16, #tpu.memory_space<vmem>>, vector<1x16x256xbf16>,
    } else {
    }
    return
  }
  func.func @transform_0(%arg0: i32, %arg1: i32, %arg2: i32) -> (i32, i32, i32) {
    %c0_i32 = arith.constant 0 : i32
    %c0_i32_0 = arith.constant 0 : i32
    return %arg0, %c0_i32, %arg2 : i32, i32, i32
  }
  func.func @transform_1(%arg0: i32, %arg1: i32, %arg2: i32) -> (i32, i32) {
    %c0_i32 = arith.constant 0 : i32
    return %arg2, %arg1 : i32, i32
  }
  func.func @transform_2(%arg0: i32, %arg1: i32, %arg2: i32) -> (i32, i32, i32) {
    %c0_i32 = arith.constant 0 : i32
    %c0_i32_0 = arith.constant 0 : i32
    return %arg0, %c0_i32, %arg1 : i32, i32, i32
  }
}

module attributes {stable_mosaic.version = 11 : i64} {
  func.func @_conv_block_kernel(%arg0: i32, %arg1: i32, %arg2: i32, %arg3: memref<1x4x512xbf16, #tpu.memory_space<vmem>>, %arg4: memref<512x256xbf16, #tpu.memory_space<vmem>>, %arg5: memref<1x4x256xbf16, #tpu.memory_space<vmem>>, %arg6: memref<4x256xf32, #tpu.memory_space<vmem>>) attributes {dimension_semantics = [#tpu.dimension_semantics<parallel>, #tpu.dimension_semantics<parallel>, #tpu.dimension_semantics<arbitrary>], iteration_bounds = array<i64: 2, 2, 8>, scalar_prefetch = 0 : i64, scratch_operands = 1 : i64, tpu.core_type = #tpu.core_type<tc>, window_params = [{transform_indices = @transform_0, window_bounds = array<i64: 1, 4, 512>}, {transform_indices = @transform_1, window_bounds = array<i64: 512, 256>}, {transform_indices = @transform_2, window_bounds = array<i64: 1, 4, 256>}]} {
    %c0_i32 = arith.constant 0 : i32
    %0 = arith.cmpi eq, %arg2, %c0_i32 : i32
    %1 = arith.extui %0 : i1 to i32
    %c0_i32_0 = arith.constant 0 : i32
    %2 = arith.cmpi ne, %1, %c0_i32_0 : i32
    scf.if %2 {
      %cst_10 = arith.constant 0.000000e+00 : f32
      %13 = vector.broadcast %cst_10 : f32 to vector<4x256xf32>
      %c0_11 = arith.constant 0 : index
      %c0_12 = arith.constant 0 : index
      %14 = vector.load %arg6[%c0_11, %c0_12] : memref<4x256xf32, #tpu.memory_space<vmem>>, vector<4x256xf32>
      tpu.vector_store %arg6[%c0_11, %c0_12], %13 {strides = array<i32>} : memref<4x256xf32, #tpu.memory_space<vmem>>, vector<4x256xf32>,
    } else {
    }
    %c0 = arith.constant 0 : index
    %c0_1 = arith.constant 0 : index
    %3 = vector.load %arg6[%c0, %c0_1] : memref<4x256xf32, #tpu.memory_space<vmem>>, vector<4x256xf32>
    %c0_2 = arith.constant 0 : index
    %c0_3 = arith.constant 0 : index
    %c0_4 = arith.constant 0 : index
    %4 = vector.load %arg3[%c0_2, %c0_3, %c0_4] : memref<1x4x512xbf16, #tpu.memory_space<vmem>>, vector<1x4x512xbf16>
    %5 = vector.shape_cast %4 : vector<1x4x512xbf16> to vector<4x512xbf16>
    %c0_5 = arith.constant 0 : index
    %c0_6 = arith.constant 0 : index
    %6 = vector.load %arg4[%c0_5, %c0_6] : memref<512x256xbf16, #tpu.memory_space<vmem>>, vector<512x256xbf16>
    %cst = arith.constant dense<0.000000e+00> : vector<4x256xf32>
    %7 = tpu.matmul %5, %6, %cst {dimension_numbers = #tpu.dot_dimension_numbers<[1], [0], [0], [1], [0, 0, 1, 1], [], []>} : vector<4x512xbf16>, vector<512x256xbf16>, vector<4x256xf32> -> vector<4x256xf32>
    %8 = arith.addf %3, %7 : vector<4x256xf32>
    %c0_7 = arith.constant 0 : index
    %c0_8 = arith.constant 0 : index
    %9 = vector.load %arg6[%c0_7, %c0_8] : memref<4x256xf32, #tpu.memory_space<vmem>>, vector<4x256xf32>
    tpu.vector_store %arg6[%c0_7, %c0_8], %8 {strides = array<i32>} : memref<4x256xf32, #tpu.memory_space<vmem>>, vector<4x256xf32>,
    %c7_i32 = arith.constant 7 : i32
    %10 = arith.cmpi eq, %arg2, %c7_i32 : i32
    %11 = arith.extui %10 : i1 to i32
    %c0_i32_9 = arith.constant 0 : i32
    %12 = arith.cmpi ne, %11, %c0_i32_9 : i32
    scf.if %12 {
      %c0_10 = arith.constant 0 : index
      %c0_11 = arith.constant 0 : index
      %13 = vector.load %arg6[%c0_10, %c0_11] : memref<4x256xf32, #tpu.memory_space<vmem>>, vector<4x256xf32>
      %cst_12 = arith.constant dense<0.000000e+00> : vector<256xf32>
      %14 = vector.multi_reduction <add>, %13, %cst_12 [0] : vector<4x256xf32> to vector<256xf32>
      %15 = vector.shape_cast %14 : vector<256xf32> to vector<1x256xf32>
      %cst_13 = arith.constant 4.000000e+00 : f32
      %16 = vector.broadcast %cst_13 : f32 to vector<1x256xf32>
      %17 = arith.divf %15, %16 : vector<1x256xf32>
      %18 = vector.broadcast %17 : vector<1x256xf32> to vector<4x256xf32>
      %19 = arith.subf %13, %18 : vector<4x256xf32>
      %20 = arith.mulf %19, %19 : vector<4x256xf32>
      %cst_14 = arith.constant dense<0.000000e+00> : vector<256xf32>
      %21 = vector.multi_reduction <add>, %20, %cst_14 [0] : vector<4x256xf32> to vector<256xf32>
      %22 = vector.shape_cast %21 : vector<256xf32> to vector<1x256xf32>
      %cst_15 = arith.constant 4.000000e+00 : f32
      %23 = vector.broadcast %cst_15 : f32 to vector<1x256xf32>
      %24 = arith.divf %22, %23 : vector<1x256xf32>
      %cst_16 = arith.constant 9.99999974E-6 : f32
      %25 = vector.broadcast %cst_16 : f32 to vector<1x256xf32>
      %26 = arith.addf %24, %25 : vector<1x256xf32>
      %27 = math.rsqrt %26 : vector<1x256xf32>
      %28 = vector.broadcast %27 : vector<1x256xf32> to vector<4x256xf32>
      %29 = arith.mulf %19, %28 : vector<4x256xf32>
      %cst_17 = arith.constant 0.000000e+00 : f32
      %30 = vector.broadcast %cst_17 : f32 to vector<4x256xf32>
      %31 = arith.cmpf oge, %29, %30 : vector<4x256xf32>
      %cst_18 = arith.constant 2.000000e-01 : f32
      %32 = vector.broadcast %cst_18 : f32 to vector<4x256xf32>
      %33 = arith.mulf %32, %29 : vector<4x256xf32>
      %34 = arith.select %31, %29, %33 : vector<4x256xi1>, vector<4x256xf32>
      %35 = arith.truncf %34 : vector<4x256xf32> to vector<4x256xbf16>
      %c0_19 = arith.constant 0 : index
      %c0_20 = arith.constant 0 : index
      %c0_21 = arith.constant 0 : index
      %36 = vector.load %arg5[%c0_19, %c0_20, %c0_21] : memref<1x4x256xbf16, #tpu.memory_space<vmem>>, vector<1x4x256xbf16>
      %37 = vector.shape_cast %36 : vector<1x4x256xbf16> to vector<4x256xbf16>
      %38 = vector.shape_cast %35 : vector<4x256xbf16> to vector<1x4x256xbf16>
      tpu.vector_store %arg5[%c0_19, %c0_20, %c0_21], %38 {strides = array<i32>} : memref<1x4x256xbf16, #tpu.memory_space<vmem>>, vector<1x4x256xbf16>,
    } else {
    }
    return
  }
  func.func @transform_0(%arg0: i32, %arg1: i32, %arg2: i32) -> (i32, i32, i32) {
    %c0_i32 = arith.constant 0 : i32
    %c0_i32_0 = arith.constant 0 : i32
    return %arg0, %c0_i32, %arg2 : i32, i32, i32
  }
  func.func @transform_1(%arg0: i32, %arg1: i32, %arg2: i32) -> (i32, i32) {
    %c0_i32 = arith.constant 0 : i32
    return %arg2, %arg1 : i32, i32
  }
  func.func @transform_2(%arg0: i32, %arg1: i32, %arg2: i32) -> (i32, i32, i32) {
    %c0_i32 = arith.constant 0 : i32
    %c0_i32_0 = arith.constant 0 : i32
    return %arg0, %c0_i32, %arg1 : i32, i32, i32
  }
}

module attributes {stable_mosaic.version = 11 : i64} {
  func.func @_conv_block_kernel(%arg0: i32, %arg1: i32, %arg2: i32, %arg3: memref<1x4x512xbf16, #tpu.memory_space<vmem>>, %arg4: memref<512x128xbf16, #tpu.memory_space<vmem>>, %arg5: memref<1x4x128xf32, #tpu.memory_space<vmem>>, %arg6: memref<4x128xf32, #tpu.memory_space<vmem>>) attributes {dimension_semantics = [#tpu.dimension_semantics<parallel>, #tpu.dimension_semantics<parallel>, #tpu.dimension_semantics<arbitrary>], iteration_bounds = array<i64: 2, 1, 16>, scalar_prefetch = 0 : i64, scratch_operands = 1 : i64, tpu.core_type = #tpu.core_type<tc>, window_params = [{transform_indices = @transform_0, window_bounds = array<i64: 1, 4, 512>}, {transform_indices = @transform_1, window_bounds = array<i64: 512, 128>}, {transform_indices = @transform_2, window_bounds = array<i64: 1, 4, 128>}]} {
    %c0_i32 = arith.constant 0 : i32
    %0 = arith.cmpi eq, %arg2, %c0_i32 : i32
    %1 = arith.extui %0 : i1 to i32
    %c0_i32_0 = arith.constant 0 : i32
    %2 = arith.cmpi ne, %1, %c0_i32_0 : i32
    scf.if %2 {
      %cst_10 = arith.constant 0.000000e+00 : f32
      %13 = vector.broadcast %cst_10 : f32 to vector<4x128xf32>
      %c0_11 = arith.constant 0 : index
      %c0_12 = arith.constant 0 : index
      %14 = vector.load %arg6[%c0_11, %c0_12] : memref<4x128xf32, #tpu.memory_space<vmem>>, vector<4x128xf32>
      tpu.vector_store %arg6[%c0_11, %c0_12], %13 {strides = array<i32>} : memref<4x128xf32, #tpu.memory_space<vmem>>, vector<4x128xf32>,
    } else {
    }
    %c0 = arith.constant 0 : index
    %c0_1 = arith.constant 0 : index
    %3 = vector.load %arg6[%c0, %c0_1] : memref<4x128xf32, #tpu.memory_space<vmem>>, vector<4x128xf32>
    %c0_2 = arith.constant 0 : index
    %c0_3 = arith.constant 0 : index
    %c0_4 = arith.constant 0 : index
    %4 = vector.load %arg3[%c0_2, %c0_3, %c0_4] : memref<1x4x512xbf16, #tpu.memory_space<vmem>>, vector<1x4x512xbf16>
    %5 = vector.shape_cast %4 : vector<1x4x512xbf16> to vector<4x512xbf16>
    %c0_5 = arith.constant 0 : index
    %c0_6 = arith.constant 0 : index
    %6 = vector.load %arg4[%c0_5, %c0_6] : memref<512x128xbf16, #tpu.memory_space<vmem>>, vector<512x128xbf16>
    %cst = arith.constant dense<0.000000e+00> : vector<4x128xf32>
    %7 = tpu.matmul %5, %6, %cst {dimension_numbers = #tpu.dot_dimension_numbers<[1], [0], [0], [1], [0, 0, 1, 1], [], []>} : vector<4x512xbf16>, vector<512x128xbf16>, vector<4x128xf32> -> vector<4x128xf32>
    %8 = arith.addf %3, %7 : vector<4x128xf32>
    %c0_7 = arith.constant 0 : index
    %c0_8 = arith.constant 0 : index
    %9 = vector.load %arg6[%c0_7, %c0_8] : memref<4x128xf32, #tpu.memory_space<vmem>>, vector<4x128xf32>
    tpu.vector_store %arg6[%c0_7, %c0_8], %8 {strides = array<i32>} : memref<4x128xf32, #tpu.memory_space<vmem>>, vector<4x128xf32>,
    %c15_i32 = arith.constant 15 : i32
    %10 = arith.cmpi eq, %arg2, %c15_i32 : i32
    %11 = arith.extui %10 : i1 to i32
    %c0_i32_9 = arith.constant 0 : i32
    %12 = arith.cmpi ne, %11, %c0_i32_9 : i32
    scf.if %12 {
      %c0_10 = arith.constant 0 : index
      %c0_11 = arith.constant 0 : index
      %13 = vector.load %arg6[%c0_10, %c0_11] : memref<4x128xf32, #tpu.memory_space<vmem>>, vector<4x128xf32>
      %c0_12 = arith.constant 0 : index
      %c0_13 = arith.constant 0 : index
      %c0_14 = arith.constant 0 : index
      %14 = vector.load %arg5[%c0_12, %c0_13, %c0_14] : memref<1x4x128xf32, #tpu.memory_space<vmem>>, vector<1x4x128xf32>
      %15 = vector.shape_cast %14 : vector<1x4x128xf32> to vector<4x128xf32>
      %16 = vector.shape_cast %13 : vector<4x128xf32> to vector<1x4x128xf32>
      tpu.vector_store %arg5[%c0_12, %c0_13, %c0_14], %16 {strides = array<i32>} : memref<1x4x128xf32, #tpu.memory_space<vmem>>, vector<1x4x128xf32>,
    } else {
    }
    return
  }
  func.func @transform_0(%arg0: i32, %arg1: i32, %arg2: i32) -> (i32, i32, i32) {
    %c0_i32 = arith.constant 0 : i32
    %c0_i32_0 = arith.constant 0 : i32
    return %arg0, %c0_i32, %arg2 : i32, i32, i32
  }
  func.func @transform_1(%arg0: i32, %arg1: i32, %arg2: i32) -> (i32, i32) {
    %c0_i32 = arith.constant 0 : i32
    return %arg2, %arg1 : i32, i32
  }
  func.func @transform_2(%arg0: i32, %arg1: i32, %arg2: i32) -> (i32, i32, i32) {
    %c0_i32 = arith.constant 0 : i32
    %c0_i32_0 = arith.constant 0 : i32
    return %arg0, %c0_i32, %arg1 : i32, i32, i32
  }
}

</mosaic_0001>

<bundles_post_ra>
// kernel: discriminator_forward.5
= control target key start
LH: loop header
LB: loop body
LE: loop exit
PB: predicated region body
PF: predicated region fallthrough
CT: control target
= control target key end

     0   :  { %s1568_s12 = smov 0   ;;  %s1570_s13 = smov 0   ;;  %s1711_s0 = inlined_call_operand.vmem [shape: bf16[2,256,128], index: 0, kind: input, shape index: {}]   ;;  %s1712_s1 = inlined_call_operand.vmem [shape: bf16[128,128], index: 1, kind: input, shape index: {}]   ;;  %s1713_s2 = inlined_call_operand.vmem [shape: f32[1,128], index: 2, kind: input, shape index: {}]   ;;  %s1714_s3 = inlined_call_operand.vmem [shape: bf16[2,256,128], index: 3, kind: output, shape index: {}]  }
   0x1   :  { %s1572_s14 = smov 0  }
   0x2 LB: > { %s32_s15 = sadd.s32 1, %s1542_s13  ;;  %p1195_p0 = scmp.ge.s32.totalorder %s1546_s14, 1  ;;  %s1546_s14 = sphi %s1572_s14, %s13_s14   ;;  %s1542_s13 = sphi %s1570_s13, %s1716_s13   ;;  %s1538_s12 = sphi %s1568_s12, %s1715_s12  }
   0x3   : > { %p34_p1 = scmp.ge.s32.totalorder %s32_s15, 2  ;;  %p187_p2 = scmp.lt.s32.totalorder %s1546_s14, 3 }
   0x5   : > { %s1718_s15 = smov (%p34_p1, %s32_s15), 0  ;;  %p188_p3 = pnand %p1195_p0, %p187_p2 }
   0x6   : > { %v1500_v0 = vld [vmem:[%s1712_s1] sm:$0xff] (!%p188_p3)   ;;  %p228_p4 = scmp.lt.s32.totalorder (!%p188_p3), %s1538_s12, 1  ;;  %v1501_v1 = vld [vmem:[%s1712_s1 + $0x8] sm:$0xff] (!%p188_p3)   ;;  %v1502_v2 = vld [vmem:[%s1712_s1 + $0x10] sm:$0xff] (!%p188_p3)  }
   0x7   : > { %191 = sbr.rel (%p188_p3) target bundleno = 294 (0x126), region = 32  ;;  %1412 = vmatprep.subr.bf16.mxu0 (!%p188_p3), %v1500_v0  ;;  %1460 = vmatprep.subr.bf16.mxu1 (!%p188_p3), %v1500_v0  ;;  %v1503_v3 = vld [vmem:[%s1712_s1 + $0x18] sm:$0xff] (!%p188_p3)   ;;  %v1504_v6 = vld [vmem:[%s1712_s1 + $0x20] sm:$0xff] (!%p188_p3)   ;;  %v1505_v7 = vld [vmem:[%s1712_s1 + $0x28] sm:$0xff] (!%p188_p3)  }
   0x8   : > { %1413 = vmatpush3.bf16.msra.mxu0 (!%p188_p3), %v1500_v0  ;;  %1468 = vmatpush3.bf16.msra.mxu1 (!%p188_p3), %v1500_v0  ;;  %v1506_v8 = vld [vmem:[%s1712_s1 + $0x30] sm:$0xff] (!%p188_p3)   ;;  %v1507_v9 = vld [vmem:[%s1712_s1 + $0x38] sm:$0xff] (!%p188_p3)   ;;  %v1639_v24 = vld [vmem:[%s1713_s2] ss:$0 sm:$0xff] (!%p188_p3) }
   0x9   : > { %1414 = vmatprep.subr.bf16.mxu0 (!%p188_p3), %v1501_v1  ;;  %1461 = vmatprep.subr.bf16.mxu1 (!%p188_p3), %v1501_v1 }
   0xc   : > { %1415 = vmatpush3.bf16.msra.mxu0 (!%p188_p3), %v1501_v1  ;;  %1469 = vmatpush3.bf16.msra.mxu1 (!%p188_p3), %v1501_v1 }
   0xd   : > { %1416 = vmatprep.subr.bf16.mxu0 (!%p188_p3), %v1502_v2  ;;  %1462 = vmatprep.subr.bf16.mxu1 (!%p188_p3), %v1502_v2 }
   0xe   : > { %s1720_s12 = smov (!%p228_p4, %s1538_s12), 1 }
   0xf   : > { %s1259_s22 = sshll.u32 %s1720_s12, 7 }
  0x10   : > { %s1603_s25 = scalar_lea.vmem %s1711_s0, %s1259_s22  ;;  %1417 = vmatpush3.bf16.msra.mxu0 %v1502_v2  ;;  %1470 = vmatpush3.bf16.msra.mxu1 %v1502_v2  ;;  %s1656_s17 = scalar_lea.vmem %s1714_s3, %s1259_s22 }
  0x11   : > { %v1508_v4 = vld [vmem:[%s1603_s25] sm:$0xff]   ;;  %1418 = vmatprep.subr.bf16.mxu0 %v1503_v3  ;;  %1463 = vmatprep.subr.bf16.mxu1 %v1503_v3  ;;  %v1510_v10 = vld [vmem:[%s1603_s25 + $0x8] sm:$0xff]   ;;  %v1512_v12 = vld [vmem:[%s1603_s25 + $0x10] sm:$0xff]  }
  0x12   : > { %v1509_v5 = vld [vmem:[%s1603_s25 + $0x40] sm:$0xff]   ;;  %1428 = vmatprep.mubr.bf16.mxu0 %v1508_v4  ;;  %v1511_v11 = vld [vmem:[%s1603_s25 + $0x48] sm:$0xff]   ;;  %v1513_v13 = vld [vmem:[%s1603_s25 + $0x50] sm:$0xff]  }
  0x13   : > { %1444 = vmatprep.mubr.bf16.mxu1 %v1509_v5  ;;  %v1514_v14 = vld [vmem:[%s1603_s25 + $0x18] sm:$0xff]   ;;  %v1516_v16 = vld [vmem:[%s1603_s25 + $0x20] sm:$0xff]   ;;  %v1518_v18 = vld [vmem:[%s1603_s25 + $0x28] sm:$0xff]  }
  0x14   : > { %1419 = vmatpush3.bf16.msra.mxu0 %v1503_v3  ;;  %1471 = vmatpush3.bf16.msra.mxu1 %v1503_v3  ;;  %v1515_v15 = vld [vmem:[%s1603_s25 + $0x58] sm:$0xff]   ;;  %v1517_v17 = vld [vmem:[%s1603_s25 + $0x60] sm:$0xff]   ;;  %v1519_v19 = vld [vmem:[%s1603_s25 + $0x68] sm:$0xff]  }
  0x15   : > { %1420 = vmatprep.subr.bf16.mxu0 %v1504_v6  ;;  %1464 = vmatprep.subr.bf16.mxu1 %v1504_v6  ;;  %v1520_v20 = vld [vmem:[%s1603_s25 + $0x30] sm:$0xff]   ;;  %v1522_v22 = vld [vmem:[%s1603_s25 + $0x38] sm:$0xff]  }
  0x16   : > { %v1521_v21 = vld [vmem:[%s1603_s25 + $0x70] sm:$0xff]   ;;  %v1523_v23 = vld [vmem:[%s1603_s25 + $0x78] sm:$0xff]  }
  0x18   : > { %1421 = vmatpush3.bf16.msra.mxu0 %v1504_v6  ;;  %1472 = vmatpush3.bf16.msra.mxu1 %v1504_v6 }
  0x19   : > { %1422 = vmatprep.subr.bf16.mxu0 %v1505_v7  ;;  %1465 = vmatprep.subr.bf16.mxu1 %v1505_v7 }
  0x1c   : > { %1423 = vmatpush3.bf16.msra.mxu0 %v1505_v7  ;;  %1473 = vmatpush3.bf16.msra.mxu1 %v1505_v7 }
  0x1d   : > { %1424 = vmatprep.subr.bf16.mxu0 %v1506_v8  ;;  %1466 = vmatprep.subr.bf16.mxu1 %v1506_v8 }
  0x20   : > { %1425 = vmatpush3.bf16.msra.mxu0 %v1506_v8  ;;  %1474 = vmatpush3.bf16.msra.mxu1 %v1506_v8 }
  0x21   : > { %1426 = vmatprep.subr.bf16.mxu0 %v1507_v9  ;;  %1467 = vmatprep.subr.bf16.mxu1 %v1507_v9 }
  0x24   : > { %1427 = vmatpush3.bf16.msra.mxu0 %v1507_v9  ;;  %1475 = vmatpush3.bf16.msra.mxu1 %v1507_v9 }
  0x27   : > { %1429 = vmatmul.mubr.bf16.vlgmr.msra.gmra.mrb[0].mxu0 %v1510_v10  ;;  %1445 = vmatmul.mubr.bf16.vlgmr.msra.gmra.mrb[0].mxu1 %v1511_v11 }
  0x28   : > { %1432 = vmatprep.mubr.bf16.mxu0 %v1512_v12  ;;  %1448 = vmatprep.mubr.bf16.mxu1 %v1513_v13 }
  0x2f   : > { %1433 = vmatmul.mubr.bf16.gmra.mrb[4].mxu0 %v1514_v14  ;;  %1449 = vmatmul.mubr.bf16.gmra.mrb[4].mxu1 %v1515_v15 }
  0x30   : > { %1436 = vmatprep.mubr.bf16.mxu0 %v1516_v16  ;;  %1452 = vmatprep.mubr.bf16.mxu1 %v1517_v17 }
  0x37   : > { %1437 = vmatmul.mubr.bf16.gmra.mrb[8].mxu0 %v1518_v18  ;;  %1453 = vmatmul.mubr.bf16.gmra.mrb[8].mxu1 %v1519_v19 }
  0x38   : > { %1440 = vmatprep.mubr.bf16.mxu0 %v1520_v20  ;;  %1456 = vmatprep.mubr.bf16.mxu1 %v1521_v21 }
  0x3f   : > { %1441 = vmatmul.mubr.bf16.gmra.mrb[12].mxu0 %v1522_v22  ;;  %1457 = vmatmul.mubr.bf16.gmra.mrb[12].mxu1 %v1523_v23 }
  0xfa   : > { %v1430_v25 = vpop.f32.mrb[0].mxu0  ;;  %v1446_v26 = vpop.f32.mrb[0].mxu1 }
  0xfb   : > { %v786_v27 = vadd.f32 %v1430_v25, %v1639_v24  ;;  %v802_v28 = vadd.f32 %v1446_v26, %v1639_v24  ;;  %v551_v29 = vpop.f32.mrb[1].mxu0  ;;  %v615_v30 = vpop.f32.mrb[1].mxu1 }
  0xfc   : > { %v784_v31 = vadd.f32 %v1639_v24, %v551_v29  ;;  %v800_v32 = vadd.f32 %v1639_v24, %v615_v30  ;;  %v1431_v33 = vpop.f32.mrb[2].mxu0  ;;  %v1447_v34 = vpop.f32.mrb[2].mxu1 }
  0xfd   : > { %vm818_vm0 = vcmp.ge.f32.partialorder %v786_v27, 0.0  ;;  %v850_v35 = vmul.f32 0.2, %v786_v27  ;;  %vm834_vm1 = vcmp.ge.f32.partialorder %v802_v28, 0.0  ;;  %v866_v36 = vmul.f32 0.2, %v802_v28 }
  0xfe   : > { %vm816_vm2 = vcmp.ge.f32.partialorder %v784_v31, 0.0  ;;  %v848_v37 = vmul.f32 0.2, %v784_v31  ;;  %vm832_vm3 = vcmp.ge.f32.partialorder %v800_v32, 0.0  ;;  %v864_v38 = vmul.f32 0.2, %v800_v32 }
  0xff   : > { %v787_v39 = vadd.f32 %v1431_v33, %v1639_v24  ;;  %v803_v40 = vadd.f32 %v1447_v34, %v1639_v24  ;;  %v554_v41 = vpop.f32.mrb[3].mxu0  ;;  %v618_v42 = vpop.f32.mrb[3].mxu1  ;;  %v882_v43 = vsel %vm818_vm0, %v786_v27, %v850_v35  ;;  %v898_v44 = vsel %vm834_vm1, %v802_v28, %v866_v36 }
 0x100   : > { %v785_v45 = vadd.f32 %v1639_v24, %v554_v41  ;;  %v801_v46 = vadd.f32 %v1639_v24, %v618_v42  ;;  %v880_v51 = vsel %vm816_vm2, %v784_v31, %v848_v37  ;;  %v896_v52 = vsel %vm832_vm3, %v800_v32, %v864_v38 }
 0x101   : > { %vm819_vm4 = vcmp.ge.f32.partialorder %v787_v39, 0.0  ;;  %v851_v47 = vmul.f32 0.2, %v787_v39  ;;  %vm835_vm5 = vcmp.ge.f32.partialorder %v803_v40, 0.0  ;;  %v867_v48 = vmul.f32 0.2, %v803_v40 }
 0x102   : > { %vm817_vm6 = vcmp.ge.f32.partialorder %v785_v45, 0.0  ;;  %v849_v49 = vmul.f32 0.2, %v785_v45  ;;  %vm833_vm7 = vcmp.ge.f32.partialorder %v801_v46, 0.0  ;;  %v865_v50 = vmul.f32 0.2, %v801_v46 }
 0x103   : > { %v883_v53 = vsel %vm819_vm4, %v787_v39, %v851_v47  ;;  %v899_v54 = vsel %vm835_vm5, %v803_v40, %v867_v48  ;;  %v1434_v55 = vpop.f32.mrb[4].mxu0  ;;  %v1450_v56 = vpop.f32.mrb[4].mxu1 }
 0x104   : > { %v1301_v57 = vpack.c.bf16 %v883_v53, %v882_v43  ;;  %v1341_v58 = vpack.c.bf16 %v899_v54, %v898_v44  ;;  %v881_v59 = vsel %vm817_vm6, %v785_v45, %v849_v49  ;;  %v897_v60 = vsel %vm833_vm7, %v801_v46, %v865_v50  ;;  %v567_v61 = vpop.f32.mrb[5].mxu0  ;;  %v631_v62 = vpop.f32.mrb[5].mxu1 }
 0x105   : > { %v1296_v63 = vpack.c.bf16 %v881_v59, %v880_v51  ;;  %v1336_v0 = vpack.c.bf16 %v897_v60, %v896_v52  ;;  %v790_v1 = vadd.f32 %v1434_v55, %v1639_v24  ;;  %v806_v2 = vadd.f32 %v1450_v56, %v1639_v24  ;;  %v1435_v3 = vpop.f32.mrb[6].mxu0  ;;  %v1451_v4 = vpop.f32.mrb[6].mxu1 }
 0x106   : > { %1373 = vst [vmem:[%s1656_s17 + $0x8] sm:$0xff] %v1301_v57   ;;  %1381 = vst [vmem:[%s1656_s17 + $0x48] sm:$0xff] %v1341_v58   ;;  %v788_v5 = vadd.f32 %v1639_v24, %v567_v61  ;;  %v804_v6 = vadd.f32 %v1639_v24, %v631_v62  ;;  %v791_v7 = vadd.f32 %v1435_v3, %v1639_v24  ;;  %v570_v9 = vpop.f32.mrb[7].mxu0  ;;  %v634_v10 = vpop.f32.mrb[7].mxu1 }
 0x107   : > { %v807_v8 = vadd.f32 %v1451_v4, %v1639_v24  ;;  %1297 = vst [vmem:[%s1656_s17] sm:$0xff] %v1296_v63   ;;  %1380 = vst [vmem:[%s1656_s17 + $0x40] sm:$0xff] %v1336_v0   ;;  %vm822_vm8 = vcmp.ge.f32.partialorder %v790_v1, 0.0  ;;  %v854_v11 = vmul.f32 0.2, %v790_v1  ;;  %vm838_vm9 = vcmp.ge.f32.partialorder %v806_v2, 0.0 }
 0x108   : > { %v870_v12 = vmul.f32 0.2, %v806_v2  ;;  %vm820_vm10 = vcmp.ge.f32.partialorder %v788_v5, 0.0  ;;  %v852_v13 = vmul.f32 0.2, %v788_v5  ;;  %vm836_vm11 = vcmp.ge.f32.partialorder %v804_v6, 0.0 }
 0x109   : > { %v886_v14 = vsel %vm822_vm8, %v790_v1, %v854_v11  ;;  %v868_v15 = vmul.f32 0.2, %v804_v6  ;;  %vm823_vm12 = vcmp.ge.f32.partialorder %v791_v7, 0.0  ;;  %v855_v16 = vmul.f32 0.2, %v791_v7 }
 0x10a   : > { %v902_v17 = vsel %vm838_vm9, %v806_v2, %v870_v12  ;;  %v884_v18 = vsel %vm820_vm10, %v788_v5, %v852_v13  ;;  %vm839_vm13 = vcmp.ge.f32.partialorder %v807_v8, 0.0  ;;  %v871_v19 = vmul.f32 0.2, %v807_v8  ;;  %v1438_v20 = vpop.f32.mrb[8].mxu0  ;;  %v1454_v21 = vpop.f32.mrb[8].mxu1 }
 0x10b   : > { %v887_v22 = vsel %vm823_vm12, %v791_v7, %v855_v16  ;;  %v789_v23 = vadd.f32 %v1639_v24, %v570_v9  ;;  %v805_v25 = vadd.f32 %v1639_v24, %v634_v10  ;;  %v794_v26 = vadd.f32 %v1438_v20, %v1639_v24  ;;  %v583_v27 = vpop.f32.mrb[9].mxu0  ;;  %v647_v28 = vpop.f32.mrb[9].mxu1 }
 0x10c   : > { %v1311_v29 = vpack.c.bf16 %v887_v22, %v886_v14  ;;  %v903_v30 = vsel %vm839_vm13, %v807_v8, %v871_v19  ;;  %v810_v31 = vadd.f32 %v1454_v21, %v1639_v24  ;;  %v792_v32 = vadd.f32 %v1639_v24, %v583_v27  ;;  %v1439_v33 = vpop.f32.mrb[10].mxu0  ;;  %v1455_v34 = vpop.f32.mrb[10].mxu1 }
 0x10d   : > { %v1351_v35 = vpack.c.bf16 %v903_v30, %v902_v17  ;;  %vm821_vm14 = vcmp.ge.f32.partialorder %v789_v23, 0.0  ;;  %v853_v36 = vmul.f32 0.2, %v789_v23  ;;  %vm837_vm15 = vcmp.ge.f32.partialorder %v805_v25, 0.0  ;;  %v586_v37 = vpop.f32.mrb[11].mxu0  ;;  %v650_v38 = vpop.f32.mrb[11].mxu1 }
 0x10e   : > { %1375 = vst [vmem:[%s1656_s17 + $0x18] sm:$0xff] %v1311_v29   ;;  %v869_v39 = vmul.f32 0.2, %v805_v25  ;;  %vm826_vm0 = vcmp.ge.f32.partialorder %v794_v26, 0.0  ;;  %v858_v40 = vmul.f32 0.2, %v794_v26  ;;  %v900_v41 = vsel %vm836_vm11, %v804_v6, %v868_v15 }
 0x10f   : > { %vm842_vm1 = vcmp.ge.f32.partialorder %v810_v31, 0.0  ;;  %1383 = vst [vmem:[%s1656_s17 + $0x58] sm:$0xff] %v1351_v35   ;;  %v885_v42 = vsel %vm821_vm14, %v789_v23, %v853_v36  ;;  %v874_v43 = vmul.f32 0.2, %v810_v31  ;;  %vm824_vm2 = vcmp.ge.f32.partialorder %v792_v32, 0.0 }
 0x110   : > { %v1306_v44 = vpack.c.bf16 %v885_v42, %v884_v18  ;;  %v901_v45 = vsel %vm837_vm15, %v805_v25, %v869_v39  ;;  %v856_v46 = vmul.f32 0.2, %v792_v32  ;;  %v808_v47 = vadd.f32 %v1639_v24, %v647_v28 }
 0x111   : > { %v1346_v48 = vpack.c.bf16 %v901_v45, %v900_v41  ;;  %v890_v49 = vsel %vm826_vm0, %v794_v26, %v858_v40  ;;  %v906_v50 = vsel %vm842_vm1, %v810_v31, %v874_v43  ;;  %v795_v51 = vadd.f32 %v1439_v33, %v1639_v24 }
 0x112   : > { %1374 = vst [vmem:[%s1656_s17 + $0x10] sm:$0xff] %v1306_v44   ;;  %vm840_vm3 = vcmp.ge.f32.partialorder %v808_v47, 0.0  ;;  %v872_v52 = vmul.f32 0.2, %v808_v47  ;;  %v811_v53 = vadd.f32 %v1455_v34, %v1639_v24  ;;  %v793_v54 = vadd.f32 %v1639_v24, %v586_v37  ;;  %v1442_v55 = vpop.f32.mrb[12].mxu0  ;;  %v1458_v56 = vpop.f32.mrb[12].mxu1 }
 0x113   : > { %1382 = vst [vmem:[%s1656_s17 + $0x50] sm:$0xff] %v1346_v48   ;;  %vm827_vm4 = vcmp.ge.f32.partialorder %v795_v51, 0.0  ;;  %v859_v57 = vmul.f32 0.2, %v795_v51  ;;  %v809_v58 = vadd.f32 %v1639_v24, %v650_v38  ;;  %v798_v59 = vadd.f32 %v1442_v55, %v1639_v24  ;;  %v599_v60 = vpop.f32.mrb[13].mxu0  ;;  %v663_v61 = vpop.f32.mrb[13].mxu1 }
 0x114   : > { %v888_v62 = vsel %vm824_vm2, %v792_v32, %v856_v46  ;;  %vm843_vm5 = vcmp.ge.f32.partialorder %v811_v53, 0.0  ;;  %v875_v63 = vmul.f32 0.2, %v811_v53  ;;  %vm825_vm6 = vcmp.ge.f32.partialorder %v793_v54, 0.0  ;;  %v1443_v0 = vpop.f32.mrb[14].mxu0  ;;  %v1459_v1 = vpop.f32.mrb[14].mxu1 }
 0x115   : > { %v891_v2 = vsel %vm827_vm4, %v795_v51, %v859_v57  ;;  %v857_v3 = vmul.f32 0.2, %v793_v54  ;;  %vm841_vm7 = vcmp.ge.f32.partialorder %v809_v58, 0.0  ;;  %v873_v4 = vmul.f32 0.2, %v809_v58  ;;  %v602_v5 = vpop.f32.mrb[15].mxu0 }
 0x116   : > { %v904_v6 = vsel %vm840_vm3, %v808_v47, %v872_v52  ;;  %v1321_v7 = vpack.c.bf16 %v891_v2, %v890_v49  ;;  %v907_v8 = vsel %vm843_vm5, %v811_v53, %v875_v63  ;;  %v862_v9 = vmul.f32 0.2, %v798_v59  ;;  %v666_v10 = vpop.f32.mrb[15].mxu1 }
 0x117   : > { %v1361_v11 = vpack.c.bf16 %v907_v8, %v906_v50  ;;  %v889_v12 = vsel %vm825_vm6, %v793_v54, %v857_v3  ;;  %v905_v13 = vsel %vm841_vm7, %v809_v58, %v873_v4  ;;  %v814_v14 = vadd.f32 %v1458_v56, %v1639_v24 }
 0x118   : > { %1377 = vst [vmem:[%s1656_s17 + $0x28] sm:$0xff] %v1321_v7   ;;  %v1316_v15 = vpack.c.bf16 %v889_v12, %v888_v62  ;;  %v1356_v16 = vpack.c.bf16 %v905_v13, %v904_v6  ;;  %vm830_vm8 = vcmp.ge.f32.partialorder %v798_v59, 0.0  ;;  %v796_v17 = vadd.f32 %v1639_v24, %v599_v60 }
 0x119   : > { %1385 = vst [vmem:[%s1656_s17 + $0x68] sm:$0xff] %v1361_v11   ;;  %vm846_vm9 = vcmp.ge.f32.partialorder %v814_v14, 0.0  ;;  %v878_v18 = vmul.f32 0.2, %v814_v14  ;;  %v812_v19 = vadd.f32 %v1639_v24, %v663_v61  ;;  %v799_v20 = vadd.f32 %v1443_v0, %v1639_v24 }
 0x11a   : > { %1376 = vst [vmem:[%s1656_s17 + $0x20] sm:$0xff] %v1316_v15   ;;  %1384 = vst [vmem:[%s1656_s17 + $0x60] sm:$0xff] %v1356_v16   ;;  %v860_v21 = vmul.f32 0.2, %v796_v17  ;;  %v815_v22 = vadd.f32 %v1459_v1, %v1639_v24  ;;  %v797_v23 = vadd.f32 %v1639_v24, %v602_v5  ;;  %v894_v25 = vsel %vm830_vm8, %v798_v59, %v862_v9 }
 0x11b   : > { %vm828_vm10 = vcmp.ge.f32.partialorder %v796_v17, 0.0  ;;  %vm831_vm11 = vcmp.ge.f32.partialorder %v799_v20, 0.0  ;;  %v910_v26 = vsel %vm846_vm9, %v814_v14, %v878_v18  ;;  %v863_v27 = vmul.f32 0.2, %v799_v20 }
 0x11c   : > { %vm847_vm12 = vcmp.ge.f32.partialorder %v815_v22, 0.0  ;;  %v879_v28 = vmul.f32 0.2, %v815_v22  ;;  %vm844_vm13 = vcmp.ge.f32.partialorder %v812_v19, 0.0  ;;  %vm829_vm14 = vcmp.ge.f32.partialorder %v797_v23, 0.0 }
 0x11d   : > { %v861_v29 = vmul.f32 0.2, %v797_v23  ;;  %v813_v30 = vadd.f32 %v1639_v24, %v666_v10  ;;  %v892_v31 = vsel %vm828_vm10, %v796_v17, %v860_v21  ;;  %v876_v32 = vmul.f32 0.2, %v812_v19 }
 0x11e   : > { %v895_v33 = vsel %vm831_vm11, %v799_v20, %v863_v27  ;;  %v911_v34 = vsel %vm847_vm12, %v815_v22, %v879_v28 }
 0x11f   : > { %v1331_v35 = vpack.c.bf16 %v895_v33, %v894_v25  ;;  %v1371_v36 = vpack.c.bf16 %v911_v34, %v910_v26  ;;  %v893_v37 = vsel %vm829_vm14, %v797_v23, %v861_v29  ;;  %vm845_vm15 = vcmp.ge.f32.partialorder %v813_v30, 0.0 }
 0x120   : > { %v1326_v38 = vpack.c.bf16 %v893_v37, %v892_v31  ;;  %v877_v39 = vmul.f32 0.2, %v813_v30  ;;  %v908_v40 = vsel %vm844_vm13, %v812_v19, %v876_v32 }
 0x121   : > { %1379 = vst [vmem:[%s1656_s17 + $0x38] sm:$0xff] %v1331_v35   ;;  %1387 = vst [vmem:[%s1656_s17 + $0x78] sm:$0xff] %v1371_v36  }
 0x122   : > { %1378 = vst [vmem:[%s1656_s17 + $0x30] sm:$0xff] %v1326_v38   ;;  %v909_v41 = vsel %vm845_vm15, %v813_v30, %v877_v39 }
 0x123   : > { %v1366_v42 = vpack.c.bf16 %v909_v41, %v908_v40 }
 0x125   : > { %1386 = vst [vmem:[%s1656_s17 + $0x70] sm:$0xff] %v1366_v42  }
 0x126 PF: > { %s13_s14 = sadd.s32 1, %s1546_s14   ;;  %s1715_s12 = smov %s1542_s13 }
 0x127   : > { %p10_p5 = scmp.ge.s32.totalorder %s13_s14, 4   ;;  %s1716_s13 = smov %s1718_s15 }
 0x129   :  { %12 = sbr.rel (!%p10_p5) target bundleno = 2 (0x2), region = 76 }

// kernel: discriminator_forward.6
= control target key start
LH: loop header
LB: loop body
LE: loop exit
PB: predicated region body
PF: predicated region fallthrough
CT: control target
= control target key end

     0   :  { %s1389_s9 = smov 0   ;;  %s1391_s10 = smov 0   ;;  %s1560_s0 = inlined_call_operand.vmem [shape: bf16[2,64,1024], index: 0, kind: input, shape index: {}]   ;;  %s1561_s1 = inlined_call_operand.vmem [shape: bf16[1024,128], index: 1, kind: input, shape index: {}]   ;;  %s1562_s2 = inlined_call_operand.vmem [shape: bf16[2,64,128], index: 2, kind: output, shape index: {}]  }
   0x1   :  { %s1393_s11 = smov 0   ;;  %s1395_s12 = smov 0  }
   0x2   :  { %s1397_s13 = smov 0   ;;  %s1399_s14 = smov 0  }
   0x3   :  { %s1401_s15 = smov 0  }
   0x4 LB: > { %s24_s16 = sadd.s32 1, %s1363_s13  ;;  %s31_s17 = sadd.s32 1, %s1367_s14  ;;  %s1371_s15 = sphi %s1401_s15, %s12_s15   ;;  %s1367_s14 = sphi %s1399_s14, %s1568_s14   ;;  %s1363_s13 = sphi %s1397_s13, %s1567_s13   ;;  %s1359_s12 = sphi %s1395_s12, %s1566_s12   ;;  %s1355_s11 = sphi %s1393_s11, %s1565_s11   ;;  %s1351_s10 = sphi %s1391_s10, %s1564_s10   ;;  %s1347_s9 = sphi %s1389_s9, %s1563_s9  }
   0x5   : > { %p25_p0 = scmp.ge.s32.totalorder %s24_s16, 2  ;;  %p47_p1 = scmp.ne.s32.totalorder %s1351_s10, %s1347_s9 }
   0x6   : > { %p48_p2 = scmp.eq.s32.totalorder %s1371_s15, 0  ;;  %s40_s21 = sadd.s32 1, %s1351_s10 }
   0x7   : > { %s1570_s16 = smov (%p25_p0, %s24_s16), 0  ;;  %s1572_s17 = smov (!%p25_p0, %s31_s17), %s1367_s14 }
   0x8   : > { %p49_p3 = por %p48_p2, %p47_p1  ;;  %p33_p4 = scmp.ge.s32.totalorder %s1572_s17, 2 }
   0x9   : > { %s36_s18 = ssub.s32 %s1363_s13, %s1570_s16  ;;  %p1019_p6 = scmp.ge.s32.totalorder %s1371_s15, 4 }
   0xa   : > { %s1574_s17 = smov (%p33_p4, %s1572_s17), 0 }
   0xb   : > { %s35_s19 = ssub.s32 %s1367_s14, %s1574_s17  ;;  %129 = sbr.rel (%p1019_p6) target bundleno = 33 (0x21), region = 16 }
   0xc   : > { %s37_s20 = sor.u32 %s36_s18, %s35_s19 }
   0xd   : > { %p38_p5 = scmp.eq.s32.totalorder %s37_s20, 0 }
   0xf   : > { %s1440_s22 = scalar_select %p38_p5, %s1351_s10, %s40_s21  }
  0x12   : > { %132 = sbr.rel (!%p49_p3) target bundleno = 33 (0x21), region = 20  ;;  %s134_s23 = sand.u32 (%p49_p3), 1, %s1351_s10  }
  0x13   : > { %s1021_s24 = sshll.u32 (%p49_p3), %s1363_s13, 2  ;;  %s1020_s25 = sshll.u32 (%p49_p3), %s134_s23, 7 }
  0x14   : > { %s1022_s26 = sshll.u32 (%p49_p3), %s1367_s14, 6  ;;  %s136_s4 = scalar_lea.vmem (%p49_p3), [#allocation3], %s1020_s25 }
  0x15   : > { %s139_s27 = sadd.s32 (%p49_p3), %s1022_s26, %s1021_s24 }
  0x16   : > { %s1023_s28 = sshll.u32 (%p49_p3), %s139_s27, 2 }
  0x17   : > { %s1449_s3 = scalar_lea.vmem (%p49_p3), %s1560_s0, %s1023_s28 }
  0x18   : > { %v154_v0 = vld [vmem:[%s1449_s3] sm:$0xff] (%p49_p3)  ;;  %v156_v1 = vld [vmem:[%s1449_s3 + $0x8] sm:$0xff] (%p49_p3) }
  0x19   : > { %v158_v2 = vld [vmem:[%s1449_s3 + $0x20] sm:$0xff]  ;;  %155 = vst [vmem:[%s136_s4] sm:$0xff] %v154_v0  ;;  %157 = vst [vmem:[%s136_s4 + $0x8] sm:$0xff] %v156_v1  ;;  %v160_v3 = vld [vmem:[%s1449_s3 + $0x28] sm:$0xff] }
  0x1a   : > { %159 = vst [vmem:[%s136_s4 + $0x10] sm:$0xff] %v158_v2  ;;  %v162_v4 = vld [vmem:[%s1449_s3 + $0x40] sm:$0xff]  ;;  %v164_v5 = vld [vmem:[%s1449_s3 + $0x48] sm:$0xff]  ;;  %161 = vst [vmem:[%s136_s4 + $0x18] sm:$0xff] %v160_v3 }
  0x1b   : > { %163 = vst [vmem:[%s136_s4 + $0x20] sm:$0xff] %v162_v4  ;;  %165 = vst [vmem:[%s136_s4 + $0x28] sm:$0xff] %v164_v5  ;;  %v166_v6 = vld [vmem:[%s1449_s3 + $0x60] sm:$0xff]  ;;  %v168_v7 = vld [vmem:[%s1449_s3 + $0x68] sm:$0xff] }
  0x1c   : > { %v170_v8 = vld [vmem:[%s1449_s3 + $0x80] sm:$0xff]  ;;  %167 = vst [vmem:[%s136_s4 + $0x30] sm:$0xff] %v166_v6  ;;  %169 = vst [vmem:[%s136_s4 + $0x38] sm:$0xff] %v168_v7  ;;  %v172_v9 = vld [vmem:[%s1449_s3 + $0x88] sm:$0xff] }
  0x1d   : > { %171 = vst [vmem:[%s136_s4 + $0x40] sm:$0xff] %v170_v8  ;;  %v174_v10 = vld [vmem:[%s1449_s3 + $0xa0] sm:$0xff]  ;;  %v176_v11 = vld [vmem:[%s1449_s3 + $0xa8] sm:$0xff]  ;;  %173 = vst [vmem:[%s136_s4 + $0x48] sm:$0xff] %v172_v9 }
  0x1e   : > { %175 = vst [vmem:[%s136_s4 + $0x50] sm:$0xff] %v174_v10  ;;  %177 = vst [vmem:[%s136_s4 + $0x58] sm:$0xff] %v176_v11  ;;  %v178_v12 = vld [vmem:[%s1449_s3 + $0xc0] sm:$0xff]  ;;  %v180_v13 = vld [vmem:[%s1449_s3 + $0xc8] sm:$0xff] }
  0x1f   : > { %v182_v14 = vld [vmem:[%s1449_s3 + $0xe0] sm:$0xff]  ;;  %179 = vst [vmem:[%s136_s4 + $0x60] sm:$0xff] %v178_v12  ;;  %181 = vst [vmem:[%s136_s4 + $0x68] sm:$0xff] %v180_v13  ;;  %v184_v15 = vld [vmem:[%s1449_s3 + $0xe8] sm:$0xff] }
  0x20   : > { %183 = vst [vmem:[%s136_s4 + $0x70] sm:$0xff] %v182_v14  ;;  %185 = vst [vmem:[%s136_s4 + $0x78] sm:$0xff] %v184_v15 }
  0x21 PF: > { %p1024_p7 = scmp.ge.s32.totalorder %s1371_s15, 1  ;;  %p202_p8 = scmp.lt.s32.totalorder %s1371_s15, 5 }
  0x23   : > { %p203_p9 = pnand %p1024_p7, %p202_p8 }
  0x24   : > { %s209_s5 = sand.u32 (!%p203_p9), 1, %s1347_s9   ;;  %s1026_s6 = sshll.u32 (!%p203_p9), %s1355_s11, 6 }
  0x25   : > { %206 = sbr.rel (%p203_p9) target bundleno = 416 (0x1a0), region = 47  ;;  %s1025_s7 = sshll.u32 (!%p203_p9), %s209_s5, 7 }
  0x26   : > { %p243_p10 = scmp.lt.s32.totalorder (!%p203_p9), %s1026_s6, 127  ;;  %p251_p11 = scmp.lt.s32.totalorder (!%p203_p9), %s1359_s12, 1 }
  0x27   : > { %s1483_s26 = scalar_lea.vmem (!%p203_p9), [#allocation3], %s1025_s7  ;;  %p1030_p12 = scmp.ne.s32.totalorder (!%p203_p9), %s1355_s11, 0 }
  0x2c   : > { %s1576_s6 = smov (!%p243_p10, %s1026_s6), 127  ;;  %s1578_s12 = smov (!%p251_p11, %s1359_s12), 1 }
  0x2d   : > { %s1027_s8 = sshll.u32 %s1576_s6, 2  ;;  %s1090_s21 = sshll.u32 %s1578_s12, 5  ;;  %v1373_v16 = vmov (!%p1030_p12), 0.0  }
  0x2e   : > { %s1476_s20 = scalar_lea.vmem %s1561_s1, %s1027_s8  ;;  %s1481_s25 = scalar_lea.vmem %s1562_s2, %s1090_s21  ;;  %264 = vst [vmem:[#allocation2] sm:$0xff] (!%p1030_p12), %v1373_v16  ;;  %265 = vst [vmem:[#allocation2 + $0x8] sm:$0xff] (!%p1030_p12), %v1373_v16 }
  0x2f   : > { %263 = sbr.rel (%p1030_p12) target bundleno = 54 (0x36), region = 55  ;;  %266 = vst [vmem:[#allocation2 + $0x10] sm:$0xff] (!%p1030_p12), %v1373_v16  ;;  %267 = vst [vmem:[#allocation2 + $0x18] sm:$0xff] (!%p1030_p12), %v1373_v16 }
  0x30   : > { %268 = vst [vmem:[#allocation2 + $0x20] sm:$0xff] (!%p1030_p12), %v1373_v16  ;;  %269 = vst [vmem:[#allocation2 + $0x28] sm:$0xff] (!%p1030_p12), %v1373_v16 }
  0x31   : > { %270 = vst [vmem:[#allocation2 + $0x30] sm:$0xff] (!%p1030_p12), %v1373_v16  ;;  %271 = vst [vmem:[#allocation2 + $0x38] sm:$0xff] (!%p1030_p12), %v1373_v16 }
  0x36 PF: > { %v1259_v17 = vld [vmem:[%s1476_s20 + $0x40] sm:$0xff]   ;;  %v1263_v21 = vld [vmem:[%s1476_s20 + $0x48] sm:$0xff]   ;;  %v1267_v25 = vld [vmem:[%s1476_s20 + $0x50] sm:$0xff]   ;;  %p1079_p13 = scmp.ne.s32.totalorder %s1355_s11, 1 }
  0x37   : > { %v1260_v18 = vld [vmem:[%s1476_s20 + $0xc0] sm:$0xff]   ;;  %1122 = vmatprep.subr.bf16.mxu0 %v1259_v17  ;;  %v1264_v22 = vld [vmem:[%s1476_s20 + $0xc8] sm:$0xff]   ;;  %v1268_v26 = vld [vmem:[%s1476_s20 + $0xd0] sm:$0xff]  }
  0x38   : > { %v1261_v19 = vld [vmem:[%s1476_s20] sm:$0xff]   ;;  %1162 = vmatprep.subr.bf16.mxu1 %v1260_v18  ;;  %v1265_v23 = vld [vmem:[%s1476_s20 + $0x8] sm:$0xff]   ;;  %v1269_v27 = vld [vmem:[%s1476_s20 + $0x10] sm:$0xff]  }
  0x39   : > { %v1262_v20 = vld [vmem:[%s1476_s20 + $0x80] sm:$0xff]   ;;  %1123 = vmatpush3.bf16.msra.mxu0 %v1261_v19  ;;  %v1266_v24 = vld [vmem:[%s1476_s20 + $0x88] sm:$0xff]   ;;  %v1270_v28 = vld [vmem:[%s1476_s20 + $0x90] sm:$0xff]  }
  0x3a   : > { %1163 = vmatpush3.bf16.msra.mxu1 %v1262_v20  ;;  %1124 = vmatprep.subr.bf16.mxu0 %v1263_v21  ;;  %v1271_v29 = vld [vmem:[%s1476_s20 + $0x58] sm:$0xff]   ;;  %v1275_v33 = vld [vmem:[%s1476_s20 + $0x60] sm:$0xff]   ;;  %v1279_v37 = vld [vmem:[%s1476_s20 + $0x68] sm:$0xff]  }
  0x3b   : > { %1164 = vmatprep.subr.bf16.mxu1 %v1264_v22  ;;  %v1272_v30 = vld [vmem:[%s1476_s20 + $0xd8] sm:$0xff]   ;;  %v1276_v34 = vld [vmem:[%s1476_s20 + $0xe0] sm:$0xff]   ;;  %v1280_v38 = vld [vmem:[%s1476_s20 + $0xe8] sm:$0xff]  }
  0x3c   : > { %v1273_v31 = vld [vmem:[%s1476_s20 + $0x18] sm:$0xff]   ;;  %v1277_v35 = vld [vmem:[%s1476_s20 + $0x20] sm:$0xff]   ;;  %v1281_v39 = vld [vmem:[%s1476_s20 + $0x28] sm:$0xff]  }
  0x3d   : > { %1125 = vmatpush3.bf16.msra.mxu0 %v1265_v23  ;;  %v1274_v32 = vld [vmem:[%s1476_s20 + $0x98] sm:$0xff]   ;;  %v1278_v36 = vld [vmem:[%s1476_s20 + $0xa0] sm:$0xff]   ;;  %v1282_v40 = vld [vmem:[%s1476_s20 + $0xa8] sm:$0xff]  }
  0x3e   : > { %1165 = vmatpush3.bf16.msra.mxu1 %v1266_v24  ;;  %1126 = vmatprep.subr.bf16.mxu0 %v1267_v25  ;;  %v1283_v41 = vld [vmem:[%s1476_s20 + $0x70] sm:$0xff]   ;;  %v1287_v45 = vld [vmem:[%s1476_s20 + $0x78] sm:$0xff]   ;;  %v272_v10 = vld [vmem:[#allocation2] sm:$0xff] }
  0x3f   : > { %1166 = vmatprep.subr.bf16.mxu1 %v1268_v26  ;;  %v1284_v42 = vld [vmem:[%s1476_s20 + $0xf0] sm:$0xff]   ;;  %v1288_v46 = vld [vmem:[%s1476_s20 + $0xf8] sm:$0xff]   ;;  %v273_v15 = vld [vmem:[#allocation2 + $0x8] sm:$0xff] }
  0x40   : > { %v1285_v43 = vld [vmem:[%s1476_s20 + $0x30] sm:$0xff]   ;;  %v1289_v47 = vld [vmem:[%s1476_s20 + $0x38] sm:$0xff]  }
  0x41   : > { %1127 = vmatpush3.bf16.msra.mxu0 %v1269_v27  ;;  %v1286_v44 = vld [vmem:[%s1476_s20 + $0xb0] sm:$0xff]   ;;  %v1290_v48 = vld [vmem:[%s1476_s20 + $0xb8] sm:$0xff]  }
  0x42   : > { %1167 = vmatpush3.bf16.msra.mxu1 %v1270_v28  ;;  %1128 = vmatprep.subr.bf16.mxu0 %v1271_v29  ;;  %v1291_v49 = vld [vmem:[%s1483_s26] ss:$16 sps:$4 sm:$0xff]   ;;  %v1293_v50 = vld [vmem:[%s1483_s26 + $0x4] ss:$16 sps:$4 sm:$0xff]   ;;  %v1294_v51 = vld [vmem:[%s1483_s26 + $0x8] ss:$16 sps:$4 sm:$0xff]  }
  0x43   : > { %1168 = vmatprep.subr.bf16.mxu1 %v1272_v30  ;;  %v1296_v52 = vld [vmem:[%s1483_s26 + $0xc] ss:$16 sps:$4 sm:$0xff]   ;;  %664 = vmatprep.mubr.bf16.mxu0 %v1293_v50  ;;  %v1297_v53 = vld [vmem:[%s1483_s26 + $0x24] ss:$16 sps:$4 sm:$0xff]   ;;  %v1301_v55 = vld [vmem:[%s1483_s26 + $0x20] ss:$16 sps:$4 sm:$0xff]  }
  0x44   : > { %729 = vmatprep.mubr.bf16.mxu1 %v1296_v52  ;;  %v1299_v54 = vld [vmem:[%s1483_s26 + $0x2c] ss:$16 sps:$4 sm:$0xff]   ;;  %v1302_v56 = vld [vmem:[%s1483_s26 + $0x28] ss:$16 sps:$4 sm:$0xff]   ;;  %v1303_v57 = vld [vmem:[%s1483_s26 + $0x44] ss:$16 sps:$4 sm:$0xff]  }
  0x45   : > { %1129 = vmatpush3.bf16.msra.mxu0 %v1273_v31  ;;  %v1305_v58 = vld [vmem:[%s1483_s26 + $0x4c] ss:$16 sps:$4 sm:$0xff]   ;;  %v1307_v59 = vld [vmem:[%s1483_s26 + $0x40] ss:$16 sps:$4 sm:$0xff]   ;;  %v1308_v60 = vld [vmem:[%s1483_s26 + $0x48] ss:$16 sps:$4 sm:$0xff]  }
  0x46   : > { %1169 = vmatpush3.bf16.msra.mxu1 %v1274_v32  ;;  %1130 = vmatprep.subr.bf16.mxu0 %v1275_v33  ;;  %v1309_v61 = vld [vmem:[%s1483_s26 + $0x64] ss:$16 sps:$4 sm:$0xff]   ;;  %v1311_v62 = vld [vmem:[%s1483_s26 + $0x6c] ss:$16 sps:$4 sm:$0xff]   ;;  %v1313_v63 = vld [vmem:[%s1483_s26 + $0x60] ss:$16 sps:$4 sm:$0xff]  }
  0x47   : > { %1170 = vmatprep.subr.bf16.mxu1 %v1276_v34  ;;  %v1314_v0 = vld [vmem:[%s1483_s26 + $0x68] ss:$16 sps:$4 sm:$0xff]   ;;  %v274_v28 = vld [vmem:[#allocation2 + $0x10] sm:$0xff] }
  0x48   : > { %v275_v33 = vld [vmem:[#allocation2 + $0x18] sm:$0xff] }
  0x49   : > { %1131 = vmatpush3.bf16.msra.mxu0 %v1277_v35 }
  0x4a   : > { %1171 = vmatpush3.bf16.msra.mxu1 %v1278_v36  ;;  %1132 = vmatprep.subr.bf16.mxu0 %v1279_v37 }
  0x4b   : > { %1172 = vmatprep.subr.bf16.mxu1 %v1280_v38 }
  0x4d   : > { %1133 = vmatpush3.bf16.msra.mxu0 %v1281_v39 }
  0x4e   : > { %1173 = vmatpush3.bf16.msra.mxu1 %v1282_v40  ;;  %1134 = vmatprep.subr.bf16.mxu0 %v1283_v41 }
  0x4f   : > { %1174 = vmatprep.subr.bf16.mxu1 %v1284_v42 }
  0x51   : > { %1135 = vmatpush3.bf16.msra.mxu0 %v1285_v43 }
  0x52   : > { %1175 = vmatpush3.bf16.msra.mxu1 %v1286_v44  ;;  %1136 = vmatprep.subr.bf16.mxu0 %v1287_v45 }
  0x53   : > { %1176 = vmatprep.subr.bf16.mxu1 %v1288_v46  ;;  %v276_v46 = vld [vmem:[#allocation2 + $0x20] sm:$0xff] }
  0x55   : > { %1137 = vmatpush3.bf16.msra.mxu0 %v1289_v47 }
  0x56   : > { %1177 = vmatpush3.bf16.msra.mxu1 %v1290_v48 }
  0x58   : > { %665 = vmatmul.mubr.bf16.vlgmr.msra.gmra.mrb[0].mxu0 %v1291_v49 }
  0x59   : > { %730 = vmatmul.mubr.bf16.vlgmr.msra.gmra.mrb[0].mxu1 %v1294_v51  ;;  %672 = vmatprep.mubr.bf16.mxu0 %v1297_v53  ;;  %v277_v51 = vld [vmem:[#allocation2 + $0x28] sm:$0xff] }
  0x5a   : > { %737 = vmatprep.mubr.bf16.mxu1 %v1299_v54 }
  0x60   : > { %673 = vmatmul.mubr.bf16.gmra.mrb[4].mxu0 %v1301_v55 }
  0x61   : > { %738 = vmatmul.mubr.bf16.gmra.mrb[4].mxu1 %v1302_v56  ;;  %680 = vmatprep.mubr.bf16.mxu0 %v1303_v57 }
  0x62   : > { %745 = vmatprep.mubr.bf16.mxu1 %v1305_v58 }
  0x68   : > { %681 = vmatmul.mubr.bf16.gmra.mrb[8].mxu0 %v1307_v59 }
  0x69   : > { %746 = vmatmul.mubr.bf16.gmra.mrb[8].mxu1 %v1308_v60  ;;  %688 = vmatprep.mubr.bf16.mxu0 %v1309_v61 }
  0x6a   : > { %753 = vmatprep.mubr.bf16.mxu1 %v1311_v62 }
  0x70   : > { %689 = vmatmul.mubr.bf16.gmra.mrb[12].mxu0 %v1313_v63 }
  0x71   : > { %754 = vmatmul.mubr.bf16.gmra.mrb[12].mxu1 %v1314_v0  ;;  %v278_v0 = vld [vmem:[#allocation2 + $0x30] sm:$0xff] }
 0x12b   : > { %v1138_v1 = vpop.f32.mrb[0].mxu0 }
 0x12c   : > { %v1178_v2 = vpop.f32.mrb[0].mxu1  ;;  %v1139_v3 = vpop.f32.mrb[1].mxu0 }
 0x12d   : > { %v1140_v4 = vadd.f32 %v1139_v3, %v1138_v1  ;;  %v1179_v5 = vpop.f32.mrb[1].mxu1  ;;  %v1141_v6 = vpop.f32.mrb[2].mxu0 }
 0x12e   : > { %v1180_v7 = vadd.f32 %v1179_v5, %v1178_v2  ;;  %v1181_v8 = vpop.f32.mrb[2].mxu1  ;;  %v1142_v9 = vpop.f32.mrb[3].mxu0  ;;  %v279_v5 = vld [vmem:[#allocation2 + $0x38] sm:$0xff] }
 0x12f   : > { %v1143_v11 = vadd.f32 %v1142_v9, %v1141_v6  ;;  %v1182_v12 = vpop.f32.mrb[3].mxu1 }
 0x130   : > { %v732_v13 = vadd.f32 %v1180_v7, %v1140_v4  ;;  %v1183_v14 = vadd.f32 %v1182_v12, %v1181_v8 }
 0x132   : > { %v762_v16 = vadd.f32 %v732_v13, %v272_v10  ;;  %v735_v17 = vadd.f32 %v1183_v14, %v1143_v11 }
 0x133   : > { %v1144_v18 = vpop.f32.mrb[4].mxu0 }
 0x134   : > { %770 = vst [vmem:[#allocation2] sm:$0xff] %v762_v16  ;;  %v763_v19 = vadd.f32 %v735_v17, %v273_v15  ;;  %v1184_v20 = vpop.f32.mrb[4].mxu1  ;;  %v1145_v21 = vpop.f32.mrb[5].mxu0 }
 0x135   : > { %v1146_v22 = vadd.f32 %v1145_v21, %v1144_v18  ;;  %v1185_v23 = vpop.f32.mrb[5].mxu1  ;;  %v1147_v24 = vpop.f32.mrb[6].mxu0 }
 0x136   : > { %771 = vst [vmem:[#allocation2 + $0x8] sm:$0xff] %v763_v19  ;;  %v1186_v25 = vadd.f32 %v1185_v23, %v1184_v20  ;;  %v1187_v26 = vpop.f32.mrb[6].mxu1  ;;  %v1148_v27 = vpop.f32.mrb[7].mxu0 }
 0x137   : > { %v1149_v29 = vadd.f32 %v1148_v27, %v1147_v24  ;;  %v1188_v30 = vpop.f32.mrb[7].mxu1 }
 0x138   : > { %v740_v31 = vadd.f32 %v1186_v25, %v1146_v22  ;;  %v1189_v32 = vadd.f32 %v1188_v30, %v1187_v26 }
 0x13a   : > { %v764_v34 = vadd.f32 %v740_v31, %v274_v28  ;;  %v743_v35 = vadd.f32 %v1189_v32, %v1149_v29 }
 0x13b   : > { %v1150_v36 = vpop.f32.mrb[8].mxu0  ;;  %v782_v9 = vld [vmem:[#allocation2] sm:$0xff] (!%p1079_p13) }
 0x13c   : > { %772 = vst [vmem:[#allocation2 + $0x10] sm:$0xff] %v764_v34  ;;  %v765_v37 = vadd.f32 %v743_v35, %v275_v33  ;;  %v1190_v38 = vpop.f32.mrb[8].mxu1  ;;  %v1151_v39 = vpop.f32.mrb[9].mxu0 }
 0x13d   : > { %v1152_v40 = vadd.f32 %v1151_v39, %v1150_v36  ;;  %v1191_v41 = vpop.f32.mrb[9].mxu1  ;;  %v1153_v42 = vpop.f32.mrb[10].mxu0  ;;  %v783_v10 = vld [vmem:[#allocation2 + $0x8] sm:$0xff] (!%p1079_p13) }
 0x13e   : > { %773 = vst [vmem:[#allocation2 + $0x18] sm:$0xff] %v765_v37  ;;  %v1192_v43 = vadd.f32 %v1191_v41, %v1190_v38  ;;  %v1193_v44 = vpop.f32.mrb[10].mxu1  ;;  %v1154_v45 = vpop.f32.mrb[11].mxu0  ;;  %v790_v12 = vadd.f32 (!%p1079_p13), %v783_v10, %v782_v9 }
 0x13f   : > { %v1155_v47 = vadd.f32 %v1154_v45, %v1153_v42  ;;  %v1194_v48 = vpop.f32.mrb[11].mxu1 }
 0x140   : > { %v748_v49 = vadd.f32 %v1192_v43, %v1152_v40  ;;  %v1195_v50 = vadd.f32 %v1194_v48, %v1193_v44 }
 0x142   : > { %v766_v52 = vadd.f32 %v748_v49, %v276_v46  ;;  %v751_v53 = vadd.f32 %v1195_v50, %v1155_v47 }
 0x143   : > { %v1156_v54 = vpop.f32.mrb[12].mxu0  ;;  %v784_v11 = vld [vmem:[#allocation2 + $0x10] sm:$0xff] (!%p1079_p13) }
 0x144   : > { %774 = vst [vmem:[#allocation2 + $0x20] sm:$0xff] %v766_v52  ;;  %v767_v55 = vadd.f32 %v751_v53, %v277_v51  ;;  %v1196_v56 = vpop.f32.mrb[12].mxu1  ;;  %v1157_v57 = vpop.f32.mrb[13].mxu0  ;;  %v791_v14 = vadd.f32 (!%p1079_p13), %v790_v12, %v784_v11 }
 0x145   : > { %v1158_v58 = vadd.f32 %v1157_v57, %v1156_v54  ;;  %v1197_v59 = vpop.f32.mrb[13].mxu1  ;;  %v1159_v60 = vpop.f32.mrb[14].mxu0  ;;  %v785_v13 = vld [vmem:[#allocation2 + $0x18] sm:$0xff] (!%p1079_p13) }
 0x146   : > { %775 = vst [vmem:[#allocation2 + $0x28] sm:$0xff] %v767_v55  ;;  %v1198_v61 = vadd.f32 %v1197_v59, %v1196_v56  ;;  %v1199_v62 = vpop.f32.mrb[14].mxu1  ;;  %v1160_v63 = vpop.f32.mrb[15].mxu0  ;;  %v792_v16 = vadd.f32 (!%p1079_p13), %v791_v14, %v785_v13 }
 0x147   : > { %v1161_v1 = vadd.f32 %v1160_v63, %v1159_v60  ;;  %v1200_v2 = vpop.f32.mrb[15].mxu1 }
 0x148   : > { %v756_v3 = vadd.f32 %v1198_v61, %v1158_v58  ;;  %v1201_v4 = vadd.f32 %v1200_v2, %v1199_v62  ;;  %781 = sbr.rel (%p1079_p13) target bundleno = 416 (0x1a0), region = 59 }
 0x14a   : > { %v768_v6 = vadd.f32 %v756_v3, %v278_v0  ;;  %v759_v7 = vadd.f32 %v1201_v4, %v1161_v1 }
 0x14b   : > { %v786_v15 = vld [vmem:[#allocation2 + $0x20] sm:$0xff] (!%p1079_p13) }
 0x14c   : > { %776 = vst [vmem:[#allocation2 + $0x30] sm:$0xff] %v768_v6  ;;  %v769_v8 = vadd.f32 %v759_v7, %v279_v5  ;;  %v793_v18 = vadd.f32 (!%p1079_p13), %v792_v16, %v786_v15 }
 0x14d   : > { %v787_v17 = vld [vmem:[#allocation2 + $0x28] sm:$0xff] (!%p1079_p13) }
 0x14e   : > { %777 = vst [vmem:[#allocation2 + $0x38] sm:$0xff] %v769_v8  ;;  %v794_v20 = vadd.f32 (!%p1079_p13), %v793_v18, %v787_v17 }
 0x153   : > { %v788_v19 = vld [vmem:[#allocation2 + $0x30] sm:$0xff] }
 0x154   : > { %v795_v22 = vadd.f32 %v794_v20, %v788_v19 }
 0x155   : > { %v789_v21 = vld [vmem:[#allocation2 + $0x38] sm:$0xff] }
 0x156   : > { %v796_v23 = vadd.f32 %v795_v22, %v789_v21 }
 0x158   : > { %v797_v24 = vrot.slane %v796_v23, 4 }
 0x15a   : > { %v798_v25 = vadd.f32 %v797_v24, %v796_v23 }
 0x15c   : > { %v799_v26 = vrot.slane %v798_v25, 2 }
 0x15e   : > { %v800_v27 = vadd.f32 %v799_v26, %v798_v25 }
 0x160   : > { %v801_v28 = vrot.slane %v800_v27, 1 }
 0x162   : > { %v802_v29 = vadd.f32 %v801_v28, %v800_v27 }
 0x164   : > { %v804_v30 = vmul.f32 0.015625, %v802_v29 }
 0x166   : > { %v805_v31 = vsub.f32 %v782_v9, %v804_v30  ;;  %v806_v32 = vsub.f32 %v783_v10, %v804_v30  ;;  %v807_v33 = vsub.f32 %v784_v11, %v804_v30  ;;  %v808_v34 = vsub.f32 %v785_v13, %v804_v30 }
 0x167   : > { %v809_v35 = vsub.f32 %v786_v15, %v804_v30  ;;  %v810_v39 = vsub.f32 %v787_v17, %v804_v30  ;;  %v811_v42 = vsub.f32 %v788_v19, %v804_v30  ;;  %v812_v45 = vsub.f32 %v789_v21, %v804_v30 }
 0x168   : > { %v813_v36 = vmul.f32 %v805_v31, %v805_v31  ;;  %v814_v37 = vmul.f32 %v806_v32, %v806_v32  ;;  %v815_v38 = vmul.f32 %v807_v33, %v807_v33  ;;  %v816_v40 = vmul.f32 %v808_v34, %v808_v34 }
 0x169   : > { %v817_v43 = vmul.f32 %v809_v35, %v809_v35  ;;  %v818_v46 = vmul.f32 %v810_v39, %v810_v39  ;;  %v819_v48 = vmul.f32 %v811_v42, %v811_v42  ;;  %v820_v50 = vmul.f32 %v812_v45, %v812_v45 }
 0x16a   : > { %v821_v41 = vadd.f32 %v814_v37, %v813_v36 }
 0x16c   : > { %v822_v44 = vadd.f32 %v821_v41, %v815_v38 }
 0x16e   : > { %v823_v47 = vadd.f32 %v822_v44, %v816_v40 }
 0x170   : > { %v824_v49 = vadd.f32 %v823_v47, %v817_v43 }
 0x172   : > { %v825_v51 = vadd.f32 %v824_v49, %v818_v46 }
 0x174   : > { %v826_v52 = vadd.f32 %v825_v51, %v819_v48 }
 0x176   : > { %v827_v53 = vadd.f32 %v826_v52, %v820_v50 }
 0x178   : > { %v828_v54 = vrot.slane %v827_v53, 4 }
 0x17a   : > { %v829_v55 = vadd.f32 %v828_v54, %v827_v53 }
 0x17c   : > { %v830_v56 = vrot.slane %v829_v55, 2 }
 0x17e   : > { %v831_v57 = vadd.f32 %v830_v56, %v829_v55 }
 0x180   : > { %v832_v58 = vrot.slane %v831_v57, 1 }
 0x182   : > { %v833_v59 = vadd.f32 %v832_v58, %v831_v57 }
 0x184   : > { %v834_v60 = vmul.f32 0.015625, %v833_v59 }
 0x186   : > { %v835_v61 = vadd.f32 1e-05, %v834_v60 }
 0x188   : > { %1315 = vrsqrt.f32 %v835_v61 }
 0x192   : > { %v1316_v62 = vpop.eup %1315 }
 0x193   : > { %v837_v63 = vmul.f32 %v1316_v62, %v805_v31  ;;  %v838_v0 = vmul.f32 %v1316_v62, %v806_v32  ;;  %v839_v1 = vmul.f32 %v1316_v62, %v807_v33  ;;  %v840_v2 = vmul.f32 %v1316_v62, %v808_v34 }
 0x194   : > { %v841_v3 = vmul.f32 %v1316_v62, %v809_v35  ;;  %v842_v4 = vmul.f32 %v1316_v62, %v810_v39  ;;  %v843_v5 = vmul.f32 %v1316_v62, %v811_v42  ;;  %v844_v6 = vmul.f32 %v1316_v62, %v812_v45 }
 0x195   : > { %vm845_vm0 = vcmp.ge.f32.partialorder %v837_v63, 0.0  ;;  %vm846_vm1 = vcmp.ge.f32.partialorder %v838_v0, 0.0  ;;  %v853_v7 = vmul.f32 0.2, %v837_v63  ;;  %v854_v8 = vmul.f32 0.2, %v838_v0 }
 0x196   : > { %vm847_vm2 = vcmp.ge.f32.partialorder %v839_v1, 0.0  ;;  %vm848_vm3 = vcmp.ge.f32.partialorder %v840_v2, 0.0  ;;  %v855_v9 = vmul.f32 0.2, %v839_v1  ;;  %v856_v10 = vmul.f32 0.2, %v840_v2 }
 0x197   : > { %v861_v11 = vsel %vm845_vm0, %v837_v63, %v853_v7  ;;  %v862_v12 = vsel %vm846_vm1, %v838_v0, %v854_v8  ;;  %vm849_vm4 = vcmp.ge.f32.partialorder %v841_v3, 0.0  ;;  %vm850_vm5 = vcmp.ge.f32.partialorder %v842_v4, 0.0 }
 0x198   : > { %v1102_v13 = vpack.c.bf16 %v862_v12, %v861_v11  ;;  %v863_v14 = vsel %vm847_vm2, %v839_v1, %v855_v9  ;;  %v864_v15 = vsel %vm848_vm3, %v840_v2, %v856_v10  ;;  %v857_v16 = vmul.f32 0.2, %v841_v3 }
 0x199   : > { %v1107_v17 = vpack.c.bf16 %v864_v15, %v863_v14  ;;  %v858_v18 = vmul.f32 0.2, %v842_v4  ;;  %vm851_vm6 = vcmp.ge.f32.partialorder %v843_v5, 0.0  ;;  %vm852_vm7 = vcmp.ge.f32.partialorder %v844_v6, 0.0 }
 0x19a   : > { %1103 = vst [vmem:[%s1481_s25] sm:$0xff] %v1102_v13   ;;  %v865_v19 = vsel %vm849_vm4, %v841_v3, %v857_v16  ;;  %v859_v20 = vmul.f32 0.2, %v843_v5  ;;  %v860_v21 = vmul.f32 0.2, %v844_v6 }
 0x19b   : > { %1119 = vst [vmem:[%s1481_s25 + $0x8] sm:$0xff] %v1107_v17   ;;  %v866_v22 = vsel %vm850_vm5, %v842_v4, %v858_v18 }
 0x19c   : > { %v1112_v23 = vpack.c.bf16 %v866_v22, %v865_v19  ;;  %v867_v24 = vsel %vm851_vm6, %v843_v5, %v859_v20  ;;  %v868_v25 = vsel %vm852_vm7, %v844_v6, %v860_v21 }
 0x19d   : > { %v1117_v26 = vpack.c.bf16 %v868_v25, %v867_v24 }
 0x19e   : > { %1120 = vst [vmem:[%s1481_s25 + $0x10] sm:$0xff] %v1112_v23  }
 0x19f   : > { %1121 = vst [vmem:[%s1481_s25 + $0x18] sm:$0xff] %v1117_v26  }
 0x1a0 PF: > { %s12_s15 = sadd.s32 1, %s1371_s15   ;;  %s1563_s9 = smov %s1351_s10 }
 0x1a1   : > { %p9_p0 = scmp.ge.s32.totalorder %s12_s15, 6   ;;  %s1564_s10 = smov %s1440_s22 }
 0x1a2   : > { %s1565_s11 = smov %s1363_s13  ;;  %s1566_s12 = smov %s1367_s14 }
 0x1a3   : > { %s1567_s13 = smov %s1570_s16  ;;  %s1568_s14 = smov %s1574_s17 }
 0x1a4   :  { %11 = sbr.rel (!%p9_p0) target bundleno = 4 (0x4), region = 97 }

// kernel: discriminator_forward.7
= control target key start
LH: loop header
LB: loop body
LE: loop exit
PB: predicated region body
PF: predicated region fallthrough
CT: control target
= control target key end

     0   :  { %s1289_s9 = smov 0   ;;  %s1291_s10 = smov 0   ;;  %s1460_s0 = inlined_call_operand.vmem [shape: bf16[2,16,2048], index: 0, kind: input, shape index: {}]   ;;  %s1461_s1 = inlined_call_operand.vmem [shape: bf16[2048,256], index: 1, kind: input, shape index: {}]   ;;  %s1462_s2 = inlined_call_operand.vmem [shape: bf16[2,16,256], index: 2, kind: output, shape index: {}]  }
   0x1   :  { %s1293_s11 = smov 0   ;;  %s1295_s12 = smov 0  }
   0x2   :  { %s1297_s13 = smov 0   ;;  %s1299_s14 = smov 0  }
   0x3   :  { %s1301_s15 = smov 0  }
   0x4 LB: > { %s24_s16 = sadd.s32 1, %s1263_s13  ;;  %s31_s17 = sadd.s32 1, %s1267_s14  ;;  %s1271_s15 = sphi %s1301_s15, %s12_s15   ;;  %s1267_s14 = sphi %s1299_s14, %s1468_s14   ;;  %s1263_s13 = sphi %s1297_s13, %s1467_s13   ;;  %s1259_s12 = sphi %s1295_s12, %s1466_s12   ;;  %s1255_s11 = sphi %s1293_s11, %s1465_s11   ;;  %s1251_s10 = sphi %s1291_s10, %s1464_s10   ;;  %s1247_s9 = sphi %s1289_s9, %s1463_s9  }
   0x5   : > { %p25_p0 = scmp.ge.s32.totalorder %s24_s16, 4  ;;  %p47_p1 = scmp.ne.s32.totalorder %s1251_s10, %s1247_s9 }
   0x6   : > { %p48_p2 = scmp.eq.s32.totalorder %s1271_s15, 0  ;;  %s40_s21 = sadd.s32 1, %s1251_s10 }
   0x7   : > { %s1470_s16 = smov (%p25_p0, %s24_s16), 0  ;;  %s1472_s17 = smov (!%p25_p0, %s31_s17), %s1267_s14 }
   0x8   : > { %p49_p3 = por %p48_p2, %p47_p1  ;;  %p33_p4 = scmp.ge.s32.totalorder %s1472_s17, 2 }
   0x9   : > { %s36_s18 = ssub.s32 %s1263_s13, %s1470_s16  ;;  %p960_p6 = scmp.ge.s32.totalorder %s1271_s15, 8 }
   0xa   : > { %s1474_s17 = smov (%p33_p4, %s1472_s17), 0 }
   0xb   : > { %s35_s19 = ssub.s32 %s1267_s14, %s1474_s17  ;;  %129 = sbr.rel (%p960_p6) target bundleno = 27 (0x1b), region = 16 }
   0xc   : > { %s37_s20 = sor.u32 %s36_s18, %s35_s19 }
   0xd   : > { %p38_p5 = scmp.eq.s32.totalorder %s37_s20, 0 }
   0xf   : > { %s1340_s22 = scalar_select %p38_p5, %s1251_s10, %s40_s21  }
  0x12   : > { %132 = sbr.rel (!%p49_p3) target bundleno = 27 (0x1b), region = 20  ;;  %s134_s23 = sand.u32 (%p49_p3), 1, %s1251_s10  }
  0x13   : > { %s962_s24 = sshll.u32 (%p49_p3), %s1263_s13, 2  ;;  %s961_s25 = sshll.u32 (%p49_p3), %s134_s23, 5 }
  0x14   : > { %s963_s26 = sshll.u32 (%p49_p3), %s1267_s14, 5  ;;  %s136_s4 = scalar_lea.vmem (%p49_p3), [#allocation3], %s961_s25 }
  0x15   : > { %s139_s27 = sadd.s32 (%p49_p3), %s963_s26, %s962_s24 }
  0x16   : > { %s964_s28 = sshll.u32 (%p49_p3), %s139_s27, 2 }
  0x17   : > { %s141_s3 = scalar_lea.vmem (%p49_p3), %s1460_s0, %s964_s28 }
  0x18   : > { %v154_v0 = vld [vmem:[%s141_s3] sm:$0xff] (%p49_p3)  ;;  %v156_v1 = vld [vmem:[%s141_s3 + $0x8] sm:$0xff] (%p49_p3) }
  0x19   : > { %v158_v2 = vld [vmem:[%s141_s3 + $0x40] sm:$0xff]  ;;  %155 = vst [vmem:[%s136_s4] sm:$0xff] %v154_v0  ;;  %157 = vst [vmem:[%s136_s4 + $0x8] sm:$0xff] %v156_v1  ;;  %v160_v3 = vld [vmem:[%s141_s3 + $0x48] sm:$0xff] }
  0x1a   : > { %159 = vst [vmem:[%s136_s4 + $0x10] sm:$0xff] %v158_v2  ;;  %161 = vst [vmem:[%s136_s4 + $0x18] sm:$0xff] %v160_v3 }
  0x1b PF: > { %p965_p7 = scmp.ge.s32.totalorder %s1271_s15, 1  ;;  %p181_p8 = scmp.lt.s32.totalorder %s1271_s15, 9 }
  0x1d   : > { %p182_p9 = pnand %p965_p7, %p181_p8 }
  0x1e   : > { %s188_s5 = sand.u32 (!%p182_p9), 1, %s1247_s9   ;;  %s967_s6 = sshll.u32 (!%p182_p9), %s1255_s11, 6 }
  0x1f   : > { %185 = sbr.rel (%p182_p9) target bundleno = 398 (0x18e), region = 47  ;;  %s966_s7 = sshll.u32 (!%p182_p9), %s188_s5, 5 }
  0x20   : > { %p226_p10 = scmp.lt.s32.totalorder (!%p182_p9), %s967_s6, 255  ;;  %p237_p11 = scmp.lt.s32.totalorder (!%p182_p9), %s1259_s12, 1 }
  0x21   : > { %s1365_s26 = scalar_lea.vmem (!%p182_p9), [#allocation3], %s966_s7  ;;  %p972_p12 = scmp.ne.s32.totalorder (!%p182_p9), %s1255_s11, 0 }
  0x26   : > { %s1476_s6 = smov (!%p226_p10, %s967_s6), 255  ;;  %s1478_s12 = smov (!%p237_p11, %s1259_s12), 1 }
  0x27   : > { %s1046_s8 = sshll.u32 %s1476_s6, 3  ;;  %s1047_s21 = sshll.u32 %s1478_s12, 4  ;;  %v1273_v4 = vmov (!%p972_p12), 0.0  }
  0x28   : > { %s1358_s20 = scalar_lea.vmem %s1461_s1, %s1046_s8  ;;  %s1363_s25 = scalar_lea.vmem %s1462_s2, %s1047_s21  ;;  %250 = vst [vmem:[#allocation2] sm:$0xff] (!%p972_p12), %v1273_v4  ;;  %251 = vst [vmem:[#allocation2 + $0x8] sm:$0xff] (!%p972_p12), %v1273_v4 }
  0x29   : > { %249 = sbr.rel (%p972_p12) target bundleno = 48 (0x30), region = 55  ;;  %252 = vst [vmem:[#allocation2 + $0x10] sm:$0xff] (!%p972_p12), %v1273_v4  ;;  %253 = vst [vmem:[#allocation2 + $0x18] sm:$0xff] (!%p972_p12), %v1273_v4 }
  0x30 PF: > { %v1111_v5 = vld [vmem:[%s1358_s20 + $0x4] ss:$8 sps:$4 sm:$0xff]   ;;  %v1115_v7 = vld [vmem:[%s1358_s20] ss:$8 sps:$4 sm:$0xff]   ;;  %v1117_v9 = vld [vmem:[%s1358_s20 + $0x14] ss:$8 sps:$4 sm:$0xff]  }
  0x31   : > { %v1113_v6 = vld [vmem:[%s1358_s20 + $0x104] ss:$8 sps:$4 sm:$0xff]   ;;  %666 = vmatprep.subr.bf16.mxu1 %v1111_v5  ;;  %v1116_v8 = vld [vmem:[%s1358_s20 + $0x100] ss:$8 sps:$4 sm:$0xff]   ;;  %v1119_v10 = vld [vmem:[%s1358_s20 + $0x114] ss:$8 sps:$4 sm:$0xff]  }
  0x32   : > { %709 = vmatprep.subr.bf16.mxu0 %v1113_v6  ;;  %667 = vmatpush1.bf16.msra.mxu1 %v1115_v7  ;;  %v1121_v11 = vld [vmem:[%s1358_s20 + $0x10] ss:$8 sps:$4 sm:$0xff]   ;;  %v1123_v13 = vld [vmem:[%s1358_s20 + $0x24] ss:$8 sps:$4 sm:$0xff]   ;;  %v1127_v15 = vld [vmem:[%s1358_s20 + $0x20] ss:$8 sps:$4 sm:$0xff]  }
  0x33   : > { %710 = vmatpush1.bf16.msra.mxu0 %v1116_v8  ;;  %668 = vmatprep.subr.bf16.mxu1 %v1117_v9  ;;  %v1122_v12 = vld [vmem:[%s1358_s20 + $0x110] ss:$8 sps:$4 sm:$0xff]   ;;  %v1125_v14 = vld [vmem:[%s1358_s20 + $0x124] ss:$8 sps:$4 sm:$0xff]   ;;  %v1128_v16 = vld [vmem:[%s1358_s20 + $0x120] ss:$8 sps:$4 sm:$0xff]  }
  0x34   : > { %711 = vmatprep.subr.bf16.mxu0 %v1119_v10  ;;  %v1129_v17 = vld [vmem:[%s1358_s20 + $0x34] ss:$8 sps:$4 sm:$0xff]   ;;  %v1133_v19 = vld [vmem:[%s1358_s20 + $0x30] ss:$8 sps:$4 sm:$0xff]   ;;  %v1135_v21 = vld [vmem:[%s1358_s20 + $0x44] ss:$8 sps:$4 sm:$0xff]  }
  0x35   : > { %v1131_v18 = vld [vmem:[%s1358_s20 + $0x134] ss:$8 sps:$4 sm:$0xff]   ;;  %v1134_v20 = vld [vmem:[%s1358_s20 + $0x130] ss:$8 sps:$4 sm:$0xff]   ;;  %v1137_v22 = vld [vmem:[%s1358_s20 + $0x144] ss:$8 sps:$4 sm:$0xff]  }
  0x36   : > { %669 = vmatpush1.bf16.msra.mxu1 %v1121_v11  ;;  %v1139_v23 = vld [vmem:[%s1358_s20 + $0x40] ss:$8 sps:$4 sm:$0xff]   ;;  %v1141_v25 = vld [vmem:[%s1358_s20 + $0x54] ss:$8 sps:$4 sm:$0xff]   ;;  %v1145_v27 = vld [vmem:[%s1358_s20 + $0x50] ss:$8 sps:$4 sm:$0xff]  }
  0x37   : > { %712 = vmatpush1.bf16.msra.mxu0 %v1122_v12  ;;  %670 = vmatprep.subr.bf16.mxu1 %v1123_v13  ;;  %v1140_v24 = vld [vmem:[%s1358_s20 + $0x140] ss:$8 sps:$4 sm:$0xff]   ;;  %v1143_v26 = vld [vmem:[%s1358_s20 + $0x154] ss:$8 sps:$4 sm:$0xff]   ;;  %v1146_v28 = vld [vmem:[%s1358_s20 + $0x150] ss:$8 sps:$4 sm:$0xff]  }
  0x38   : > { %713 = vmatprep.subr.bf16.mxu0 %v1125_v14  ;;  %v1147_v29 = vld [vmem:[%s1358_s20 + $0x64] ss:$8 sps:$4 sm:$0xff]   ;;  %v1151_v31 = vld [vmem:[%s1358_s20 + $0x60] ss:$8 sps:$4 sm:$0xff]   ;;  %v1153_v33 = vld [vmem:[%s1358_s20 + $0x74] ss:$8 sps:$4 sm:$0xff]  }
  0x39   : > { %v1149_v30 = vld [vmem:[%s1358_s20 + $0x164] ss:$8 sps:$4 sm:$0xff]   ;;  %v1152_v32 = vld [vmem:[%s1358_s20 + $0x160] ss:$8 sps:$4 sm:$0xff]   ;;  %v1155_v34 = vld [vmem:[%s1358_s20 + $0x174] ss:$8 sps:$4 sm:$0xff]  }
  0x3a   : > { %671 = vmatpush1.bf16.msra.mxu1 %v1127_v15  ;;  %v1157_v35 = vld [vmem:[%s1358_s20 + $0x70] ss:$8 sps:$4 sm:$0xff]   ;;  %v1159_v37 = vld [vmem:[%s1358_s20 + $0x84] ss:$8 sps:$4 sm:$0xff]   ;;  %v1163_v39 = vld [vmem:[%s1358_s20 + $0x80] ss:$8 sps:$4 sm:$0xff]  }
  0x3b   : > { %714 = vmatpush1.bf16.msra.mxu0 %v1128_v16  ;;  %672 = vmatprep.subr.bf16.mxu1 %v1129_v17  ;;  %v1158_v36 = vld [vmem:[%s1358_s20 + $0x170] ss:$8 sps:$4 sm:$0xff]   ;;  %v1161_v38 = vld [vmem:[%s1358_s20 + $0x184] ss:$8 sps:$4 sm:$0xff]   ;;  %v1164_v40 = vld [vmem:[%s1358_s20 + $0x180] ss:$8 sps:$4 sm:$0xff]  }
  0x3c   : > { %715 = vmatprep.subr.bf16.mxu0 %v1131_v18  ;;  %v1165_v41 = vld [vmem:[%s1358_s20 + $0x94] ss:$8 sps:$4 sm:$0xff]   ;;  %v1169_v43 = vld [vmem:[%s1358_s20 + $0x90] ss:$8 sps:$4 sm:$0xff]   ;;  %v1171_v45 = vld [vmem:[%s1358_s20 + $0xa4] ss:$8 sps:$4 sm:$0xff]  }
  0x3d   : > { %v1167_v42 = vld [vmem:[%s1358_s20 + $0x194] ss:$8 sps:$4 sm:$0xff]   ;;  %v1170_v44 = vld [vmem:[%s1358_s20 + $0x190] ss:$8 sps:$4 sm:$0xff]   ;;  %v1173_v46 = vld [vmem:[%s1358_s20 + $0x1a4] ss:$8 sps:$4 sm:$0xff]  }
  0x3e   : > { %673 = vmatpush1.bf16.msra.mxu1 %v1133_v19  ;;  %v1175_v47 = vld [vmem:[%s1358_s20 + $0xa0] ss:$8 sps:$4 sm:$0xff]   ;;  %v1177_v49 = vld [vmem:[%s1358_s20 + $0xb4] ss:$8 sps:$4 sm:$0xff]   ;;  %v1181_v51 = vld [vmem:[%s1358_s20 + $0xb0] ss:$8 sps:$4 sm:$0xff]  }
  0x3f   : > { %716 = vmatpush1.bf16.msra.mxu0 %v1134_v20  ;;  %674 = vmatprep.subr.bf16.mxu1 %v1135_v21  ;;  %v1176_v48 = vld [vmem:[%s1358_s20 + $0x1a0] ss:$8 sps:$4 sm:$0xff]   ;;  %v1179_v50 = vld [vmem:[%s1358_s20 + $0x1b4] ss:$8 sps:$4 sm:$0xff]   ;;  %v1182_v53 = vld [vmem:[%s1358_s20 + $0x1b0] ss:$8 sps:$4 sm:$0xff]  }
  0x40   : > { %717 = vmatprep.subr.bf16.mxu0 %v1137_v22  ;;  %v1209_v52 = vld [vmem:[%s1365_s26 + $0x4] ss:$16 sps:$4 sm:$0xff]   ;;  %v1212_v56 = vld [vmem:[%s1365_s26 + $0xc] ss:$16 sps:$4 sm:$0xff]   ;;  %v1187_v57 = vld [vmem:[%s1358_s20 + $0xc0] ss:$8 sps:$4 sm:$0xff]  }
  0x41   : > { %v1183_v54 = vld [vmem:[%s1358_s20 + $0xc4] ss:$8 sps:$4 sm:$0xff]   ;;  %698 = vmatprep.mubr.bf16.mxu1 %v1209_v52  ;;  %741 = vmatprep.mubr.bf16.mxu0 %v1212_v56  ;;  %v1188_v58 = vld [vmem:[%s1358_s20 + $0x1c0] ss:$8 sps:$4 sm:$0xff]   ;;  %v1189_v59 = vld [vmem:[%s1358_s20 + $0xd4] ss:$8 sps:$4 sm:$0xff]  }
  0x42   : > { %675 = vmatpush1.bf16.msra.mxu1 %v1139_v23  ;;  %v1185_v55 = vld [vmem:[%s1358_s20 + $0x1c4] ss:$8 sps:$4 sm:$0xff]   ;;  %v1191_v60 = vld [vmem:[%s1358_s20 + $0x1d4] ss:$8 sps:$4 sm:$0xff]   ;;  %v1193_v61 = vld [vmem:[%s1358_s20 + $0xd0] ss:$8 sps:$4 sm:$0xff]  }
  0x43   : > { %718 = vmatpush1.bf16.msra.mxu0 %v1140_v24  ;;  %676 = vmatprep.subr.bf16.mxu1 %v1141_v25  ;;  %v1194_v62 = vld [vmem:[%s1358_s20 + $0x1d0] ss:$8 sps:$4 sm:$0xff]   ;;  %v1195_v63 = vld [vmem:[%s1358_s20 + $0xe4] ss:$8 sps:$4 sm:$0xff]   ;;  %v1199_v1 = vld [vmem:[%s1358_s20 + $0xe0] ss:$8 sps:$4 sm:$0xff]  }
  0x44   : > { %719 = vmatprep.subr.bf16.mxu0 %v1143_v26  ;;  %v1197_v0 = vld [vmem:[%s1358_s20 + $0x1e4] ss:$8 sps:$4 sm:$0xff]   ;;  %v1200_v2 = vld [vmem:[%s1358_s20 + $0x1e0] ss:$8 sps:$4 sm:$0xff]   ;;  %v1201_v3 = vld [vmem:[%s1358_s20 + $0xf4] ss:$8 sps:$4 sm:$0xff]  }
  0x45   : > { %v1203_v4 = vld [vmem:[%s1358_s20 + $0x1f4] ss:$8 sps:$4 sm:$0xff]   ;;  %v1205_v5 = vld [vmem:[%s1358_s20 + $0xf0] ss:$8 sps:$4 sm:$0xff]   ;;  %v254_v10 = vld [vmem:[#allocation2] sm:$0xff]  ;;  %p1041_p13 = scmp.ne.s32.totalorder %s1255_s11, 3 }
  0x46   : > { %677 = vmatpush1.bf16.msra.mxu1 %v1145_v27  ;;  %v1206_v6 = vld [vmem:[%s1358_s20 + $0x1f0] ss:$8 sps:$4 sm:$0xff]   ;;  %v255_v14 = vld [vmem:[#allocation2 + $0x8] sm:$0xff] }
  0x47   : > { %720 = vmatpush1.bf16.msra.mxu0 %v1146_v28  ;;  %678 = vmatprep.subr.bf16.mxu1 %v1147_v29  ;;  %v1207_v7 = vld [vmem:[%s1365_s26] ss:$16 sps:$4 sm:$0xff]   ;;  %v1210_v8 = vld [vmem:[%s1365_s26 + $0x8] ss:$16 sps:$4 sm:$0xff]  }
  0x48   : > { %721 = vmatprep.subr.bf16.mxu0 %v1149_v30  ;;  %v256_v18 = vld [vmem:[#allocation2 + $0x10] sm:$0xff]  ;;  %v257_v23 = vld [vmem:[#allocation2 + $0x18] sm:$0xff] }
  0x4a   : > { %679 = vmatpush1.bf16.msra.mxu1 %v1151_v31 }
  0x4b   : > { %722 = vmatpush1.bf16.msra.mxu0 %v1152_v32  ;;  %680 = vmatprep.subr.bf16.mxu1 %v1153_v33 }
  0x4c   : > { %723 = vmatprep.subr.bf16.mxu0 %v1155_v34 }
  0x4e   : > { %681 = vmatpush1.bf16.msra.mxu1 %v1157_v35 }
  0x4f   : > { %724 = vmatpush1.bf16.msra.mxu0 %v1158_v36  ;;  %682 = vmatprep.subr.bf16.mxu1 %v1159_v37 }
  0x50   : > { %725 = vmatprep.subr.bf16.mxu0 %v1161_v38 }
  0x52   : > { %683 = vmatpush1.bf16.msra.mxu1 %v1163_v39 }
  0x53   : > { %726 = vmatpush1.bf16.msra.mxu0 %v1164_v40  ;;  %684 = vmatprep.subr.bf16.mxu1 %v1165_v41 }
  0x54   : > { %727 = vmatprep.subr.bf16.mxu0 %v1167_v42 }
  0x56   : > { %685 = vmatpush1.bf16.msra.mxu1 %v1169_v43 }
  0x57   : > { %728 = vmatpush1.bf16.msra.mxu0 %v1170_v44  ;;  %686 = vmatprep.subr.bf16.mxu1 %v1171_v45 }
  0x58   : > { %729 = vmatprep.subr.bf16.mxu0 %v1173_v46 }
  0x5a   : > { %687 = vmatpush1.bf16.msra.mxu1 %v1175_v47 }
  0x5b   : > { %730 = vmatpush1.bf16.msra.mxu0 %v1176_v48  ;;  %688 = vmatprep.subr.bf16.mxu1 %v1177_v49 }
  0x5c   : > { %731 = vmatprep.subr.bf16.mxu0 %v1179_v50 }
  0x5e   : > { %689 = vmatpush1.bf16.msra.mxu1 %v1181_v51 }
  0x5f   : > { %732 = vmatpush1.bf16.msra.mxu0 %v1182_v53  ;;  %690 = vmatprep.subr.bf16.mxu1 %v1183_v54 }
  0x60   : > { %733 = vmatprep.subr.bf16.mxu0 %v1185_v55 }
  0x62   : > { %691 = vmatpush1.bf16.msra.mxu1 %v1187_v57 }
  0x63   : > { %734 = vmatpush1.bf16.msra.mxu0 %v1188_v58  ;;  %692 = vmatprep.subr.bf16.mxu1 %v1189_v59 }
  0x64   : > { %735 = vmatprep.subr.bf16.mxu0 %v1191_v60 }
  0x66   : > { %693 = vmatpush1.bf16.msra.mxu1 %v1193_v61 }
  0x67   : > { %736 = vmatpush1.bf16.msra.mxu0 %v1194_v62  ;;  %694 = vmatprep.subr.bf16.mxu1 %v1195_v63 }
  0x68   : > { %737 = vmatprep.subr.bf16.mxu0 %v1197_v0 }
  0x6a   : > { %695 = vmatpush1.bf16.msra.mxu1 %v1199_v1 }
  0x6b   : > { %738 = vmatpush1.bf16.msra.mxu0 %v1200_v2  ;;  %696 = vmatprep.subr.bf16.mxu1 %v1201_v3 }
  0x6c   : > { %739 = vmatprep.subr.bf16.mxu0 %v1203_v4 }
  0x6e   : > { %697 = vmatpush1.bf16.msra.mxu1 %v1205_v5 }
  0x6f   : > { %740 = vmatpush1.bf16.msra.mxu0 %v1206_v6 }
  0x71   : > { %699 = vmatmul.mubr.bf16.vlgmr.msra.gmra.mrb[0].mxu1 %v1207_v7 }
  0x72   : > { %742 = vmatmul.mubr.bf16.vlgmr.msra.gmra.mrb[0].mxu0 %v1210_v8 }
 0x144   : > { %v700_v9 = vpop.f32.mrb[0].mxu1 }
 0x145   : > { %v743_v11 = vpop.f32.mrb[0].mxu0  ;;  %v702_v13 = vpop.f32.mrb[1].mxu1 }
 0x146   : > { %v744_v12 = vadd.f32 %v743_v11, %v700_v9  ;;  %v745_v15 = vpop.f32.mrb[1].mxu0  ;;  %v704_v17 = vpop.f32.mrb[2].mxu1 }
 0x147   : > { %v746_v16 = vadd.f32 %v745_v15, %v702_v13  ;;  %v747_v19 = vpop.f32.mrb[2].mxu0  ;;  %v706_v22 = vpop.f32.mrb[3].mxu1  ;;  %763 = sbr.rel (%p1041_p13) target bundleno = 398 (0x18e), region = 59 }
 0x148   : > { %v752_v20 = vadd.f32 %v744_v12, %v254_v10  ;;  %v748_v21 = vadd.f32 %v747_v19, %v704_v17  ;;  %v749_v24 = vpop.f32.mrb[3].mxu0 }
 0x149   : > { %v753_v25 = vadd.f32 %v746_v16, %v255_v14  ;;  %v750_v26 = vadd.f32 %v749_v24, %v706_v22 }
 0x14a   : > { %756 = vst [vmem:[#allocation2] sm:$0xff] %v752_v20  ;;  %v754_v27 = vadd.f32 %v748_v21, %v256_v18 }
 0x14b   : > { %757 = vst [vmem:[#allocation2 + $0x8] sm:$0xff] %v753_v25  ;;  %v755_v28 = vadd.f32 %v750_v26, %v257_v23 }
 0x14c   : > { %758 = vst [vmem:[#allocation2 + $0x10] sm:$0xff] %v754_v27 }
 0x14d   : > { %759 = vst [vmem:[#allocation2 + $0x18] sm:$0xff] %v755_v28 }
 0x151   : > { %v764_v29 = vld [vmem:[#allocation2] sm:$0xff] }
 0x152   : > { %v765_v30 = vld [vmem:[#allocation2 + $0x8] sm:$0xff] }
 0x153   : > { %v766_v31 = vld [vmem:[#allocation2 + $0x10] sm:$0xff] }
 0x154   : > { %v767_v32 = vld [vmem:[#allocation2 + $0x18] sm:$0xff]  ;;  %v768_v33 = vadd.f32 %v766_v31, %v764_v29 }
 0x155   : > { %v775_v34 = vadd.f32 %v767_v32, %v765_v30 }
 0x156   : > { %v769_v35 = vrot.slane %v768_v33, 4 }
 0x157   : > { %v776_v36 = vrot.slane %v775_v34, 4 }
 0x158   : > { %v770_v37 = vadd.f32 %v769_v35, %v768_v33 }
 0x159   : > { %v777_v38 = vadd.f32 %v776_v36, %v775_v34 }
 0x15a   : > { %v771_v39 = vrot.slane %v770_v37, 2 }
 0x15b   : > { %v778_v40 = vrot.slane %v777_v38, 2 }
 0x15c   : > { %v772_v41 = vadd.f32 %v771_v39, %v770_v37 }
 0x15d   : > { %v779_v42 = vadd.f32 %v778_v40, %v777_v38 }
 0x15e   : > { %v773_v43 = vrot.slane %v772_v41, 1 }
 0x15f   : > { %v780_v44 = vrot.slane %v779_v42, 1 }
 0x160   : > { %v774_v45 = vadd.f32 %v773_v43, %v772_v41 }
 0x161   : > { %v781_v46 = vadd.f32 %v780_v44, %v779_v42 }
 0x162   : > { %v783_v47 = vmul.f32 0.0625, %v774_v45 }
 0x163   : > { %v784_v48 = vmul.f32 0.0625, %v781_v46 }
 0x164   : > { %v785_v49 = vsub.f32 %v764_v29, %v783_v47  ;;  %v787_v50 = vsub.f32 %v766_v31, %v783_v47 }
 0x165   : > { %v786_v51 = vsub.f32 %v765_v30, %v784_v48  ;;  %v788_v52 = vsub.f32 %v767_v32, %v784_v48 }
 0x166   : > { %v789_v53 = vmul.f32 %v785_v49, %v785_v49  ;;  %v791_v54 = vmul.f32 %v787_v50, %v787_v50 }
 0x167   : > { %v790_v55 = vmul.f32 %v786_v51, %v786_v51  ;;  %v792_v56 = vmul.f32 %v788_v52, %v788_v52 }
 0x168   : > { %v793_v57 = vadd.f32 %v791_v54, %v789_v53 }
 0x169   : > { %v800_v58 = vadd.f32 %v792_v56, %v790_v55 }
 0x16a   : > { %v794_v59 = vrot.slane %v793_v57, 4 }
 0x16b   : > { %v801_v60 = vrot.slane %v800_v58, 4 }
 0x16c   : > { %v795_v61 = vadd.f32 %v794_v59, %v793_v57 }
 0x16d   : > { %v802_v62 = vadd.f32 %v801_v60, %v800_v58 }
 0x16e   : > { %v796_v63 = vrot.slane %v795_v61, 2 }
 0x16f   : > { %v803_v0 = vrot.slane %v802_v62, 2 }
 0x170   : > { %v797_v1 = vadd.f32 %v796_v63, %v795_v61 }
 0x171   : > { %v804_v2 = vadd.f32 %v803_v0, %v802_v62 }
 0x172   : > { %v798_v3 = vrot.slane %v797_v1, 1 }
 0x173   : > { %v805_v4 = vrot.slane %v804_v2, 1 }
 0x174   : > { %v799_v5 = vadd.f32 %v798_v3, %v797_v1 }
 0x175   : > { %v806_v6 = vadd.f32 %v805_v4, %v804_v2 }
 0x176   : > { %v807_v7 = vmul.f32 0.0625, %v799_v5 }
 0x177   : > { %v808_v8 = vmul.f32 0.0625, %v806_v6 }
 0x178   : > { %v809_v9 = vadd.f32 1e-05, %v807_v7 }
 0x179   : > { %v810_v10 = vadd.f32 1e-05, %v808_v8 }
 0x17a   : > { %1213 = vrsqrt.f32 %v809_v9 }
 0x17b   : > { %1215 = vrsqrt.f32 %v810_v10 }
 0x184   : > { %v1214_v11 = vpop.eup %1213 }
 0x185   : > { %v1216_v12 = vpop.eup %1215  ;;  %v813_v13 = vmul.f32 %v1214_v11, %v785_v49  ;;  %v815_v14 = vmul.f32 %v1214_v11, %v787_v50 }
 0x186   : > { %v814_v15 = vmul.f32 %v1216_v12, %v786_v51  ;;  %v816_v16 = vmul.f32 %v1216_v12, %v788_v52 }
 0x187   : > { %vm817_vm0 = vcmp.ge.f32.partialorder %v813_v13, 0.0  ;;  %v821_v17 = vmul.f32 0.2, %v813_v13  ;;  %vm819_vm1 = vcmp.ge.f32.partialorder %v815_v14, 0.0  ;;  %v823_v18 = vmul.f32 0.2, %v815_v14 }
 0x188   : > { %vm818_vm2 = vcmp.ge.f32.partialorder %v814_v15, 0.0  ;;  %v822_v19 = vmul.f32 0.2, %v814_v15  ;;  %vm820_vm3 = vcmp.ge.f32.partialorder %v816_v16, 0.0  ;;  %v824_v20 = vmul.f32 0.2, %v816_v16 }
 0x189   : > { %v825_v21 = vsel %vm817_vm0, %v813_v13, %v821_v17  ;;  %v827_v22 = vsel %vm819_vm1, %v815_v14, %v823_v18 }
 0x18a   : > { %v826_v23 = vsel %vm818_vm2, %v814_v15, %v822_v19  ;;  %v828_v24 = vsel %vm820_vm3, %v816_v16, %v824_v20 }
 0x18b   : > { %v1048_v25 = vpack.c.bf16 %v826_v23, %v825_v21  ;;  %v1049_v26 = vpack.c.bf16 %v828_v24, %v827_v22 }
 0x18d   : > { %841 = vst [vmem:[%s1363_s25] sm:$0xff] %v1048_v25  ;;  %842 = vst [vmem:[%s1363_s25 + $0x8] sm:$0xff] %v1049_v26 }
 0x18e PF: > { %s12_s15 = sadd.s32 1, %s1271_s15   ;;  %s1463_s9 = smov %s1251_s10 }
 0x18f   : > { %p9_p0 = scmp.ge.s32.totalorder %s12_s15, 10   ;;  %s1464_s10 = smov %s1340_s22 }
 0x190   : > { %s1465_s11 = smov %s1263_s13  ;;  %s1466_s12 = smov %s1267_s14 }
 0x191   : > { %s1467_s13 = smov %s1470_s16  ;;  %s1468_s14 = smov %s1474_s17 }
 0x192   :  { %11 = sbr.rel (!%p9_p0) target bundleno = 4 (0x4), region = 97 }

// kernel: discriminator_forward.8
= control target key start
LH: loop header
LB: loop body
LE: loop exit
PB: predicated region body
PF: predicated region fallthrough
CT: control target
= control target key end

     0   :  { %s1557_s9 = smov 0   ;;  %s1559_s10 = smov 0   ;;  %s1881_s0 = inlined_call_operand.vmem [shape: bf16[2,4,4096], index: 0, kind: input, shape index: {}]   ;;  %s1882_s1 = inlined_call_operand.vmem [shape: bf16[4096,512], index: 1, kind: input, shape index: {}]   ;;  %s1883_s2 = inlined_call_operand.vmem [shape: bf16[2,4,512], index: 2, kind: output, shape index: {}]  }
   0x1   :  { %s1561_s11 = smov 0   ;;  %s1563_s12 = smov 0  }
   0x2   :  { %s1565_s13 = smov 0   ;;  %s1567_s14 = smov 0  }
   0x3   :  { %s1569_s15 = smov 0   ;;  %s1571_s16 = smov 0  }
   0x4   :  { %s1573_s17 = smov 0  }
   0x5 LB: > { %s24_s18 = sadd.s32 1, %s1526_s14  ;;  %s27_s19 = sadd.s32 1, %s1530_s15  ;;  %s1538_s17 = sphi %s1573_s17, %s12_s17   ;;  %s1534_s16 = sphi %s1571_s16, %s1891_s16   ;;  %s1530_s15 = sphi %s1569_s15, %s1890_s15   ;;  %s1526_s14 = sphi %s1567_s14, %s1889_s14   ;;  %s1522_s13 = sphi %s1565_s13, %s1888_s13   ;;  %s1518_s12 = sphi %s1563_s12, %s1887_s12   ;;  %s1514_s11 = sphi %s1561_s11, %s1886_s11   ;;  %s1510_s10 = sphi %s1559_s10, %s1885_s10   ;;  %s1506_s9 = sphi %s1557_s9, %s1884_s9  }
   0x6   : > { %p25_p0 = scmp.ge.s32.totalorder %s24_s18, 8  ;;  %p75_p1 = scmp.ne.s32.totalorder %s1510_s10, %s1506_s9 }
   0x7   : > { %p76_p2 = scmp.eq.s32.totalorder %s1538_s17, 0  ;;  %s31_s20 = sadd.s32 1, %s1534_s16 }
   0x8   : > { %s1893_s18 = smov (%p25_p0, %s24_s18), 0  ;;  %s1895_s19 = smov (!%p25_p0, %s27_s19), %s1530_s15 }
   0x9   : > { %p29_p3 = scmp.ge.s32.totalorder %s1895_s19, 2  ;;  %s63_s21 = ssub.s32 %s1526_s14, %s1893_s18 }
   0xa   : > { %p77_p4 = por %p76_p2, %p75_p1  ;;  %s68_s23 = sadd.s32 1, %s1510_s10 }
   0xb   : > { %s1897_s19 = smov (%p29_p3, %s1895_s19), 0  ;;  %s1899_s20 = smov (!%p29_p3, %s31_s20), %s1534_s16 }
   0xc   : > { %s64_s22 = ssub.s32 %s1530_s15, %s1897_s19  ;;  %p33_p5 = scmp.ge.s32.totalorder %s1899_s20, 2 }
   0xd   : > { %s65_s24 = sor.u32 %s64_s22, %s63_s21  ;;  %p1205_p7 = scmp.ge.s32.totalorder %s1538_s17, 32 }
   0xe   : > { %p66_p6 = scmp.eq.s32.totalorder %s65_s24, 0  ;;  %s1901_s20 = smov (%p33_p5, %s1899_s20), 0 }
   0xf   : > { %129 = sbr.rel (%p1205_p7) target bundleno = 61 (0x3d), region = 16 }
  0x10   : > { %s1622_s25 = scalar_select %p66_p6, %s1510_s10, %s68_s23  }
  0x16   : > { %145 = sbr.rel (!%p77_p4) target bundleno = 61 (0x3d), region = 24  ;;  %s147_s26 = sand.u32 (%p77_p4), 1, %s1510_s10  }
  0x17   : > { %s1208_s27 = sshll.u32 (%p77_p4), %s1530_s15, 1  ;;  %s1206_s28 = sshll.u32 (%p77_p4), %s147_s26, 9 }
  0x18   : > { %s1289_s29 = sshll.u32 (%p77_p4), %s1526_s14, 8  ;;  %s1636_s7 = scalar_lea.vmem (%p77_p4), [#allocation3], %s1206_s28 }
  0x19   : > { %s153_s30 = sadd.s32 (%p77_p4), %s1289_s29, %s1208_s27 }
  0x1a   : > { %s1210_s3 = sshll.u32 (%p77_p4), %s153_s30, 2 }
  0x1b   : > { %s1631_s6 = scalar_lea.vmem (%p77_p4), %s1882_s1, %s1210_s3 }
  0x1c   : > { %v309_v0 = vld [vmem:[%s1631_s6] sm:$0xff] (%p77_p4)  ;;  %v311_v1 = vld [vmem:[%s1631_s6 + $0x10] sm:$0xff] (%p77_p4) }
  0x1d   : > { %v313_v2 = vld [vmem:[%s1631_s6 + $0x20] sm:$0xff]  ;;  %310 = vst [vmem:[%s1636_s7] sm:$0xff] %v309_v0  ;;  %312 = vst [vmem:[%s1636_s7 + $0x8] sm:$0xff] %v311_v1  ;;  %v315_v3 = vld [vmem:[%s1631_s6 + $0x30] sm:$0xff] }
  0x1e   : > { %314 = vst [vmem:[%s1636_s7 + $0x10] sm:$0xff] %v313_v2  ;;  %v317_v4 = vld [vmem:[%s1631_s6 + $0x40] sm:$0xff]  ;;  %v319_v5 = vld [vmem:[%s1631_s6 + $0x50] sm:$0xff]  ;;  %316 = vst [vmem:[%s1636_s7 + $0x18] sm:$0xff] %v315_v3 }
  0x1f   : > { %318 = vst [vmem:[%s1636_s7 + $0x20] sm:$0xff] %v317_v4  ;;  %320 = vst [vmem:[%s1636_s7 + $0x28] sm:$0xff] %v319_v5  ;;  %v321_v6 = vld [vmem:[%s1631_s6 + $0x60] sm:$0xff]  ;;  %v323_v7 = vld [vmem:[%s1631_s6 + $0x70] sm:$0xff] }
  0x20   : > { %v325_v8 = vld [vmem:[%s1631_s6 + $0x80] sm:$0xff]  ;;  %322 = vst [vmem:[%s1636_s7 + $0x30] sm:$0xff] %v321_v6  ;;  %324 = vst [vmem:[%s1636_s7 + $0x38] sm:$0xff] %v323_v7  ;;  %v327_v9 = vld [vmem:[%s1631_s6 + $0x90] sm:$0xff] }
  0x21   : > { %326 = vst [vmem:[%s1636_s7 + $0x40] sm:$0xff] %v325_v8  ;;  %v329_v10 = vld [vmem:[%s1631_s6 + $0xa0] sm:$0xff]  ;;  %v331_v11 = vld [vmem:[%s1631_s6 + $0xb0] sm:$0xff]  ;;  %328 = vst [vmem:[%s1636_s7 + $0x48] sm:$0xff] %v327_v9 }
  0x22   : > { %330 = vst [vmem:[%s1636_s7 + $0x50] sm:$0xff] %v329_v10  ;;  %332 = vst [vmem:[%s1636_s7 + $0x58] sm:$0xff] %v331_v11  ;;  %v333_v12 = vld [vmem:[%s1631_s6 + $0xc0] sm:$0xff]  ;;  %v335_v13 = vld [vmem:[%s1631_s6 + $0xd0] sm:$0xff] }
  0x23   : > { %v337_v14 = vld [vmem:[%s1631_s6 + $0xe0] sm:$0xff]  ;;  %334 = vst [vmem:[%s1636_s7 + $0x60] sm:$0xff] %v333_v12  ;;  %336 = vst [vmem:[%s1636_s7 + $0x68] sm:$0xff] %v335_v13  ;;  %v339_v15 = vld [vmem:[%s1631_s6 + $0xf0] sm:$0xff] }
  0x24   : > { %338 = vst [vmem:[%s1636_s7 + $0x70] sm:$0xff] %v337_v14  ;;  %v341_v16 = vld [vmem:[%s1631_s6 + $0x100] sm:$0xff]  ;;  %v343_v17 = vld [vmem:[%s1631_s6 + $0x110] sm:$0xff]  ;;  %340 = vst [vmem:[%s1636_s7 + $0x78] sm:$0xff] %v339_v15 }
  0x25   : > { %342 = vst [vmem:[%s1636_s7 + $0x80] sm:$0xff] %v341_v16  ;;  %344 = vst [vmem:[%s1636_s7 + $0x88] sm:$0xff] %v343_v17  ;;  %v345_v18 = vld [vmem:[%s1631_s6 + $0x120] sm:$0xff]  ;;  %v347_v19 = vld [vmem:[%s1631_s6 + $0x130] sm:$0xff] }
  0x26   : > { %v349_v20 = vld [vmem:[%s1631_s6 + $0x140] sm:$0xff]  ;;  %346 = vst [vmem:[%s1636_s7 + $0x90] sm:$0xff] %v345_v18  ;;  %348 = vst [vmem:[%s1636_s7 + $0x98] sm:$0xff] %v347_v19  ;;  %v351_v21 = vld [vmem:[%s1631_s6 + $0x150] sm:$0xff] }
  0x27   : > { %350 = vst [vmem:[%s1636_s7 + $0xa0] sm:$0xff] %v349_v20  ;;  %v353_v22 = vld [vmem:[%s1631_s6 + $0x160] sm:$0xff]  ;;  %v355_v23 = vld [vmem:[%s1631_s6 + $0x170] sm:$0xff]  ;;  %352 = vst [vmem:[%s1636_s7 + $0xa8] sm:$0xff] %v351_v21 }
  0x28   : > { %354 = vst [vmem:[%s1636_s7 + $0xb0] sm:$0xff] %v353_v22  ;;  %356 = vst [vmem:[%s1636_s7 + $0xb8] sm:$0xff] %v355_v23  ;;  %v357_v24 = vld [vmem:[%s1631_s6 + $0x180] sm:$0xff]  ;;  %v359_v25 = vld [vmem:[%s1631_s6 + $0x190] sm:$0xff] }
  0x29   : > { %v361_v26 = vld [vmem:[%s1631_s6 + $0x1a0] sm:$0xff]  ;;  %358 = vst [vmem:[%s1636_s7 + $0xc0] sm:$0xff] %v357_v24  ;;  %360 = vst [vmem:[%s1636_s7 + $0xc8] sm:$0xff] %v359_v25  ;;  %v363_v27 = vld [vmem:[%s1631_s6 + $0x1b0] sm:$0xff] }
  0x2a   : > { %362 = vst [vmem:[%s1636_s7 + $0xd0] sm:$0xff] %v361_v26  ;;  %v365_v28 = vld [vmem:[%s1631_s6 + $0x1c0] sm:$0xff]  ;;  %v367_v29 = vld [vmem:[%s1631_s6 + $0x1d0] sm:$0xff]  ;;  %364 = vst [vmem:[%s1636_s7 + $0xd8] sm:$0xff] %v363_v27 }
  0x2b   : > { %366 = vst [vmem:[%s1636_s7 + $0xe0] sm:$0xff] %v365_v28  ;;  %368 = vst [vmem:[%s1636_s7 + $0xe8] sm:$0xff] %v367_v29  ;;  %v369_v30 = vld [vmem:[%s1631_s6 + $0x1e0] sm:$0xff]  ;;  %v371_v31 = vld [vmem:[%s1631_s6 + $0x1f0] sm:$0xff] }
  0x2c   : > { %v373_v32 = vld [vmem:[%s1631_s6 + $0x200] sm:$0xff]  ;;  %370 = vst [vmem:[%s1636_s7 + $0xf0] sm:$0xff] %v369_v30  ;;  %372 = vst [vmem:[%s1636_s7 + $0xf8] sm:$0xff] %v371_v31  ;;  %v375_v33 = vld [vmem:[%s1631_s6 + $0x210] sm:$0xff] }
  0x2d   : > { %374 = vst [vmem:[%s1636_s7 + $0x100] sm:$0xff] %v373_v32  ;;  %v377_v34 = vld [vmem:[%s1631_s6 + $0x220] sm:$0xff]  ;;  %v379_v35 = vld [vmem:[%s1631_s6 + $0x230] sm:$0xff]  ;;  %376 = vst [vmem:[%s1636_s7 + $0x108] sm:$0xff] %v375_v33 }
  0x2e   : > { %378 = vst [vmem:[%s1636_s7 + $0x110] sm:$0xff] %v377_v34  ;;  %380 = vst [vmem:[%s1636_s7 + $0x118] sm:$0xff] %v379_v35  ;;  %v381_v36 = vld [vmem:[%s1631_s6 + $0x240] sm:$0xff]  ;;  %v383_v37 = vld [vmem:[%s1631_s6 + $0x250] sm:$0xff] }
  0x2f   : > { %v385_v38 = vld [vmem:[%s1631_s6 + $0x260] sm:$0xff]  ;;  %382 = vst [vmem:[%s1636_s7 + $0x120] sm:$0xff] %v381_v36  ;;  %384 = vst [vmem:[%s1636_s7 + $0x128] sm:$0xff] %v383_v37  ;;  %v387_v39 = vld [vmem:[%s1631_s6 + $0x270] sm:$0xff] }
  0x30   : > { %386 = vst [vmem:[%s1636_s7 + $0x130] sm:$0xff] %v385_v38  ;;  %v389_v40 = vld [vmem:[%s1631_s6 + $0x280] sm:$0xff]  ;;  %v391_v41 = vld [vmem:[%s1631_s6 + $0x290] sm:$0xff]  ;;  %388 = vst [vmem:[%s1636_s7 + $0x138] sm:$0xff] %v387_v39 }
  0x31   : > { %390 = vst [vmem:[%s1636_s7 + $0x140] sm:$0xff] %v389_v40  ;;  %392 = vst [vmem:[%s1636_s7 + $0x148] sm:$0xff] %v391_v41  ;;  %v393_v42 = vld [vmem:[%s1631_s6 + $0x2a0] sm:$0xff]  ;;  %v395_v43 = vld [vmem:[%s1631_s6 + $0x2b0] sm:$0xff] }
  0x32   : > { %v397_v44 = vld [vmem:[%s1631_s6 + $0x2c0] sm:$0xff]  ;;  %394 = vst [vmem:[%s1636_s7 + $0x150] sm:$0xff] %v393_v42  ;;  %396 = vst [vmem:[%s1636_s7 + $0x158] sm:$0xff] %v395_v43  ;;  %v399_v45 = vld [vmem:[%s1631_s6 + $0x2d0] sm:$0xff] }
  0x33   : > { %398 = vst [vmem:[%s1636_s7 + $0x160] sm:$0xff] %v397_v44  ;;  %v401_v46 = vld [vmem:[%s1631_s6 + $0x2e0] sm:$0xff]  ;;  %v403_v47 = vld [vmem:[%s1631_s6 + $0x2f0] sm:$0xff]  ;;  %400 = vst [vmem:[%s1636_s7 + $0x168] sm:$0xff] %v399_v45 }
  0x34   : > { %402 = vst [vmem:[%s1636_s7 + $0x170] sm:$0xff] %v401_v46  ;;  %404 = vst [vmem:[%s1636_s7 + $0x178] sm:$0xff] %v403_v47  ;;  %v405_v48 = vld [vmem:[%s1631_s6 + $0x300] sm:$0xff]  ;;  %v407_v49 = vld [vmem:[%s1631_s6 + $0x310] sm:$0xff] }
  0x35   : > { %v409_v50 = vld [vmem:[%s1631_s6 + $0x320] sm:$0xff]  ;;  %406 = vst [vmem:[%s1636_s7 + $0x180] sm:$0xff] %v405_v48  ;;  %408 = vst [vmem:[%s1636_s7 + $0x188] sm:$0xff] %v407_v49  ;;  %v411_v51 = vld [vmem:[%s1631_s6 + $0x330] sm:$0xff] }
  0x36   : > { %410 = vst [vmem:[%s1636_s7 + $0x190] sm:$0xff] %v409_v50  ;;  %v413_v52 = vld [vmem:[%s1631_s6 + $0x340] sm:$0xff]  ;;  %v415_v53 = vld [vmem:[%s1631_s6 + $0x350] sm:$0xff]  ;;  %412 = vst [vmem:[%s1636_s7 + $0x198] sm:$0xff] %v411_v51 }
  0x37   : > { %414 = vst [vmem:[%s1636_s7 + $0x1a0] sm:$0xff] %v413_v52  ;;  %416 = vst [vmem:[%s1636_s7 + $0x1a8] sm:$0xff] %v415_v53  ;;  %v417_v54 = vld [vmem:[%s1631_s6 + $0x360] sm:$0xff]  ;;  %v419_v55 = vld [vmem:[%s1631_s6 + $0x370] sm:$0xff] }
  0x38   : > { %v421_v56 = vld [vmem:[%s1631_s6 + $0x380] sm:$0xff]  ;;  %418 = vst [vmem:[%s1636_s7 + $0x1b0] sm:$0xff] %v417_v54  ;;  %420 = vst [vmem:[%s1636_s7 + $0x1b8] sm:$0xff] %v419_v55  ;;  %v423_v57 = vld [vmem:[%s1631_s6 + $0x390] sm:$0xff] }
  0x39   : > { %422 = vst [vmem:[%s1636_s7 + $0x1c0] sm:$0xff] %v421_v56  ;;  %v425_v58 = vld [vmem:[%s1631_s6 + $0x3a0] sm:$0xff]  ;;  %v427_v59 = vld [vmem:[%s1631_s6 + $0x3b0] sm:$0xff]  ;;  %424 = vst [vmem:[%s1636_s7 + $0x1c8] sm:$0xff] %v423_v57 }
  0x3a   : > { %426 = vst [vmem:[%s1636_s7 + $0x1d0] sm:$0xff] %v425_v58  ;;  %428 = vst [vmem:[%s1636_s7 + $0x1d8] sm:$0xff] %v427_v59  ;;  %v429_v60 = vld [vmem:[%s1631_s6 + $0x3c0] sm:$0xff]  ;;  %v431_v61 = vld [vmem:[%s1631_s6 + $0x3d0] sm:$0xff] }
  0x3b   : > { %v433_v62 = vld [vmem:[%s1631_s6 + $0x3e0] sm:$0xff]  ;;  %430 = vst [vmem:[%s1636_s7 + $0x1e0] sm:$0xff] %v429_v60  ;;  %432 = vst [vmem:[%s1636_s7 + $0x1e8] sm:$0xff] %v431_v61  ;;  %v435_v63 = vld [vmem:[%s1631_s6 + $0x3f0] sm:$0xff] }
  0x3c   : > { %434 = vst [vmem:[%s1636_s7 + $0x1f0] sm:$0xff] %v433_v62  ;;  %436 = vst [vmem:[%s1636_s7 + $0x1f8] sm:$0xff] %v435_v63 }
  0x3d PF: > { %p1211_p8 = scmp.ge.s32.totalorder %s1538_s17, 1  ;;  %p441_p9 = scmp.lt.s32.totalorder %s1538_s17, 33 }
  0x3f   : > { %p442_p10 = pnand %p1211_p8, %p441_p9 }
  0x40   : > { %s448_s8 = sand.u32 (!%p442_p10), 1, %s1506_s9   ;;  %s1213_s21 = sshll.u32 (!%p442_p10), %s1514_s11, 2 }
  0x41   : > { %445 = sbr.rel (%p442_p10) target bundleno = 442 (0x1ba), region = 62  ;;  %s1212_s22 = sshll.u32 (!%p442_p10), %s448_s8, 9 }
  0x42   : > { %p483_p11 = scmp.lt.s32.totalorder (!%p442_p10), %s1522_s13, 1  ;;  %p485_p12 = scmp.lt.s32.totalorder (!%p442_p10), %s1213_s21, 31 }
  0x43   : > { %s1216_s24 = sshll.u32 (!%p442_p10), %s1518_s12, 1  ;;  %s1780_s8 = scalar_lea.vmem (!%p442_p10), [#allocation3], %s1212_s22 }
  0x44   : > { %p497_p13 = scmp.lt.s32.totalorder (!%p442_p10), %s1216_s24, 3  ;;  %p1219_p0 = scmp.ne.s32.totalorder (!%p442_p10), %s1514_s11, 0 }
  0x48   : > { %s1903_s13 = smov (!%p483_p11, %s1522_s13), 1  ;;  %s1905_s21 = smov (!%p485_p12, %s1213_s21), 31 }
  0x49   : > { %s1214_s23 = sshll.u32 %s1903_s13, 5  ;;  %s1217_s3 = sshll.u32 %s1903_s13, 2  ;;  %v1540_v0 = vmov (!%p1219_p0), 0.0  }
  0x4a   : > { %s488_s26 = sadd.s32 %s1214_s23, %s1905_s21  ;;  %s1907_s24 = smov (!%p497_p13, %s1216_s24), 3  ;;  %508 = vst [vmem:[#allocation2] sm:$0xff] (!%p1219_p0), %v1540_v0 }
  0x4b   : > { %s1215_s27 = sshll.u32 %s488_s26, 1  ;;  %s500_s4 = sadd.s32 %s1217_s3, %s1907_s24 }
  0x4c   : > { %s1773_s30 = scalar_lea.vmem %s1881_s0, %s1215_s27  ;;  %s1218_s9 = sshll.u32 %s500_s4, 1 }
  0x4d   : > { %s1778_s7 = scalar_lea.vmem %s1883_s2, %s1218_s9  ;;  %507 = sbr.rel (%p1219_p0) target bundleno = 84 (0x54), region = 70 }
  0x54 PF: > { %v1366_v1 = vld [vmem:[%s1780_s8 + $0x4] ss:$8 sps:$4 sm:$0xff]   ;;  %v1370_v3 = vld [vmem:[%s1780_s8] ss:$8 sps:$4 sm:$0xff]   ;;  %v1372_v5 = vld [vmem:[%s1780_s8 + $0x14] ss:$8 sps:$4 sm:$0xff]   ;;  %v580_v39 = vlaneseq }
  0x55   : > { %v1368_v2 = vld [vmem:[%s1780_s8 + $0x104] ss:$8 sps:$4 sm:$0xff]   ;;  %917 = vmatprep.subr.bf16.mxu1 %v1366_v1  ;;  %v1371_v4 = vld [vmem:[%s1780_s8 + $0x100] ss:$8 sps:$4 sm:$0xff]   ;;  %v1374_v6 = vld [vmem:[%s1780_s8 + $0x114] ss:$8 sps:$4 sm:$0xff]  }
  0x56   : > { %958 = vmatprep.subr.bf16.mxu0 %v1368_v2  ;;  %918 = vmatpush1.bf16.msra.mxu1 %v1370_v3  ;;  %v1376_v7 = vld [vmem:[%s1780_s8 + $0x10] ss:$8 sps:$4 sm:$0xff]   ;;  %v1378_v9 = vld [vmem:[%s1780_s8 + $0x24] ss:$8 sps:$4 sm:$0xff]   ;;  %v1382_v11 = vld [vmem:[%s1780_s8 + $0x20] ss:$8 sps:$4 sm:$0xff]  }
  0x57   : > { %959 = vmatpush1.bf16.msra.mxu0 %v1371_v4  ;;  %919 = vmatprep.subr.bf16.mxu1 %v1372_v5  ;;  %v1377_v8 = vld [vmem:[%s1780_s8 + $0x110] ss:$8 sps:$4 sm:$0xff]   ;;  %v1380_v10 = vld [vmem:[%s1780_s8 + $0x124] ss:$8 sps:$4 sm:$0xff]   ;;  %v1383_v12 = vld [vmem:[%s1780_s8 + $0x120] ss:$8 sps:$4 sm:$0xff]  }
  0x58   : > { %960 = vmatprep.subr.bf16.mxu0 %v1374_v6  ;;  %v1384_v13 = vld [vmem:[%s1780_s8 + $0x34] ss:$8 sps:$4 sm:$0xff]   ;;  %v1388_v15 = vld [vmem:[%s1780_s8 + $0x30] ss:$8 sps:$4 sm:$0xff]   ;;  %v1390_v17 = vld [vmem:[%s1780_s8 + $0x44] ss:$8 sps:$4 sm:$0xff]  }
  0x59   : > { %v1386_v14 = vld [vmem:[%s1780_s8 + $0x134] ss:$8 sps:$4 sm:$0xff]   ;;  %v1389_v16 = vld [vmem:[%s1780_s8 + $0x130] ss:$8 sps:$4 sm:$0xff]   ;;  %v1392_v18 = vld [vmem:[%s1780_s8 + $0x144] ss:$8 sps:$4 sm:$0xff]  }
  0x5a   : > { %920 = vmatpush1.bf16.msra.mxu1 %v1376_v7  ;;  %v1394_v19 = vld [vmem:[%s1780_s8 + $0x40] ss:$8 sps:$4 sm:$0xff]   ;;  %v1396_v21 = vld [vmem:[%s1780_s8 + $0x54] ss:$8 sps:$4 sm:$0xff]   ;;  %v1400_v23 = vld [vmem:[%s1780_s8 + $0x50] ss:$8 sps:$4 sm:$0xff]  }
  0x5b   : > { %961 = vmatpush1.bf16.msra.mxu0 %v1377_v8  ;;  %921 = vmatprep.subr.bf16.mxu1 %v1378_v9  ;;  %v1395_v20 = vld [vmem:[%s1780_s8 + $0x140] ss:$8 sps:$4 sm:$0xff]   ;;  %v1398_v22 = vld [vmem:[%s1780_s8 + $0x154] ss:$8 sps:$4 sm:$0xff]   ;;  %v1401_v24 = vld [vmem:[%s1780_s8 + $0x150] ss:$8 sps:$4 sm:$0xff]  }
  0x5c   : > { %962 = vmatprep.subr.bf16.mxu0 %v1380_v10  ;;  %v1402_v25 = vld [vmem:[%s1780_s8 + $0x64] ss:$8 sps:$4 sm:$0xff]   ;;  %v1406_v27 = vld [vmem:[%s1780_s8 + $0x60] ss:$8 sps:$4 sm:$0xff]   ;;  %v1408_v29 = vld [vmem:[%s1780_s8 + $0x74] ss:$8 sps:$4 sm:$0xff]  }
  0x5d   : > { %v1404_v26 = vld [vmem:[%s1780_s8 + $0x164] ss:$8 sps:$4 sm:$0xff]   ;;  %v1407_v28 = vld [vmem:[%s1780_s8 + $0x160] ss:$8 sps:$4 sm:$0xff]   ;;  %v1410_v30 = vld [vmem:[%s1780_s8 + $0x174] ss:$8 sps:$4 sm:$0xff]  }
  0x5e   : > { %922 = vmatpush1.bf16.msra.mxu1 %v1382_v11  ;;  %v1412_v31 = vld [vmem:[%s1780_s8 + $0x70] ss:$8 sps:$4 sm:$0xff]   ;;  %v1414_v33 = vld [vmem:[%s1780_s8 + $0x84] ss:$8 sps:$4 sm:$0xff]   ;;  %v1418_v35 = vld [vmem:[%s1780_s8 + $0x80] ss:$8 sps:$4 sm:$0xff]  }
  0x5f   : > { %963 = vmatpush1.bf16.msra.mxu0 %v1383_v12  ;;  %923 = vmatprep.subr.bf16.mxu1 %v1384_v13  ;;  %v1413_v32 = vld [vmem:[%s1780_s8 + $0x170] ss:$8 sps:$4 sm:$0xff]   ;;  %v1416_v34 = vld [vmem:[%s1780_s8 + $0x184] ss:$8 sps:$4 sm:$0xff]   ;;  %v1419_v36 = vld [vmem:[%s1780_s8 + $0x180] ss:$8 sps:$4 sm:$0xff]  }
  0x60   : > { %964 = vmatprep.subr.bf16.mxu0 %v1386_v14  ;;  %v1541_v37 = vmov 1983009808   ;;  %v1420_v40 = vld [vmem:[%s1780_s8 + $0x94] ss:$8 sps:$4 sm:$0xff]   ;;  %v1424_v42 = vld [vmem:[%s1780_s8 + $0x90] ss:$8 sps:$4 sm:$0xff]  }
  0x61   : > { %v578_v38 = vunpack.c.l.s4 %v1541_v37  ;;  %v1422_v41 = vld [vmem:[%s1780_s8 + $0x194] ss:$8 sps:$4 sm:$0xff]   ;;  %v581_v44 = vshrl.u32 %v580_v39, 7  ;;  %v1425_v45 = vld [vmem:[%s1780_s8 + $0x190] ss:$8 sps:$4 sm:$0xff]   ;;  %p1284_p1 = scmp.ne.s32.totalorder %s1514_s11, 7 }
  0x62   : > { %924 = vmatpush1.bf16.msra.mxu1 %v1388_v15  ;;  %v1426_v46 = vld [vmem:[%s1780_s8 + $0xa4] ss:$8 sps:$4 sm:$0xff]   ;;  %v1430_v48 = vld [vmem:[%s1780_s8 + $0xa0] ss:$8 sps:$4 sm:$0xff]   ;;  %v1432_v51 = vld [vmem:[%s1780_s8 + $0xb4] ss:$8 sps:$4 sm:$0xff]  }
  0x63   : > { %965 = vmatpush1.bf16.msra.mxu0 %v1389_v16  ;;  %925 = vmatprep.subr.bf16.mxu1 %v1390_v17  ;;  %v579_v43 = vunpack.c.0.s8 %v578_v38  ;;  %v1428_v47 = vld [vmem:[%s1780_s8 + $0x1a4] ss:$8 sps:$4 sm:$0xff]   ;;  %v1431_v49 = vld [vmem:[%s1780_s8 + $0x1a0] ss:$8 sps:$4 sm:$0xff]   ;;  %v1434_v52 = vld [vmem:[%s1780_s8 + $0x1b4] ss:$8 sps:$4 sm:$0xff]  }
  0x64   : > { %966 = vmatprep.subr.bf16.mxu0 %v1392_v18  ;;  %v510_v53 = vld [vmem:[%s1773_s30] sm:$0xff]  ;;  %v1438_v58 = vld [vmem:[%s1780_s8 + $0xc4] ss:$8 sps:$4 sm:$0xff]   ;;  %v1442_v63 = vld [vmem:[%s1780_s8 + $0xc0] ss:$8 sps:$4 sm:$0xff]   ;;  %vm1013_vm0 = vcmask (!%p1284_p1), 1043456  }
  0x65   : > { %v582_v50 = vsub.s32 %v579_v43, %v581_v44  ;;  %v576_v55 = vcombine.high %v510_v53, %v510_v53  ;;  %v1436_v56 = vld [vmem:[%s1780_s8 + $0xb0] ss:$8 sps:$4 sm:$0xff]   ;;  %v1440_v59 = vld [vmem:[%s1780_s8 + $0x1c4] ss:$8 sps:$4 sm:$0xff]   ;;  %v1443_v0 = vld [vmem:[%s1780_s8 + $0x1c0] ss:$8 sps:$4 sm:$0xff]  }
  0x66   : > { %926 = vmatpush1.bf16.msra.mxu1 %v1394_v19  ;;  %v1437_v57 = vld [vmem:[%s1780_s8 + $0x1b0] ss:$8 sps:$4 sm:$0xff]   ;;  %v1444_v1 = vld [vmem:[%s1780_s8 + $0xd4] ss:$8 sps:$4 sm:$0xff]   ;;  %v1450_v5 = vld [vmem:[%s1780_s8 + $0xe4] ss:$8 sps:$4 sm:$0xff]  }
  0x67   : > { %967 = vmatpush1.bf16.msra.mxu0 %v1395_v20  ;;  %927 = vmatprep.subr.bf16.mxu1 %v1396_v21  ;;  %v583_v54 = vrot.slane %v510_v53, %v582_v50  ;;  %v590_v61 = vrot.slane %v576_v55, %v582_v50  ;;  %v1446_v2 = vld [vmem:[%s1780_s8 + $0x1d4] ss:$8 sps:$4 sm:$0xff]   ;;  %v1448_v3 = vld [vmem:[%s1780_s8 + $0xd0] ss:$8 sps:$4 sm:$0xff]   ;;  %v1452_v6 = vld [vmem:[%s1780_s8 + $0x1e4] ss:$8 sps:$4 sm:$0xff]  }
  0x68   : > { %968 = vmatprep.subr.bf16.mxu0 %v1398_v22  ;;  %v1449_v4 = vld [vmem:[%s1780_s8 + $0x1d0] ss:$8 sps:$4 sm:$0xff]   ;;  %v1454_v7 = vld [vmem:[%s1780_s8 + $0xe0] ss:$8 sps:$4 sm:$0xff]   ;;  %v1456_v9 = vld [vmem:[%s1780_s8 + $0xf4] ss:$8 sps:$4 sm:$0xff]  }
  0x69   : > { %v591_v60 = vcombine.high %v583_v54, %v583_v54  ;;  %v592_v62 = vcombine.high %v590_v61, %v590_v61  ;;  %v1455_v8 = vld [vmem:[%s1780_s8 + $0x1e0] ss:$8 sps:$4 sm:$0xff]   ;;  %v1458_v10 = vld [vmem:[%s1780_s8 + $0x1f4] ss:$8 sps:$4 sm:$0xff]   ;;  %v1460_v11 = vld [vmem:[%s1780_s8 + $0xf0] ss:$8 sps:$4 sm:$0xff]  }
  0x6a   : > { %928 = vmatpush1.bf16.msra.mxu1 %v1400_v23  ;;  %v1461_v12 = vld [vmem:[%s1780_s8 + $0x1f0] ss:$8 sps:$4 sm:$0xff]  }
  0x6b   : > { %969 = vmatpush1.bf16.msra.mxu0 %v1401_v24  ;;  %929 = vmatprep.subr.bf16.mxu1 %v1402_v25  ;;  %v509_v21 = vld [vmem:[#allocation2] sm:$0xff] }
  0x6c   : > { %970 = vmatprep.subr.bf16.mxu0 %v1404_v26  ;;  %949 = vmatprep.mubr.bf16.mxu1 %v591_v60 }
  0x6d   : > { %990 = vmatprep.mubr.bf16.mxu0 %v592_v62 }
  0x6e   : > { %930 = vmatpush1.bf16.msra.mxu1 %v1406_v27 }
  0x6f   : > { %971 = vmatpush1.bf16.msra.mxu0 %v1407_v28  ;;  %931 = vmatprep.subr.bf16.mxu1 %v1408_v29 }
  0x70   : > { %972 = vmatprep.subr.bf16.mxu0 %v1410_v30 }
  0x72   : > { %932 = vmatpush1.bf16.msra.mxu1 %v1412_v31 }
  0x73   : > { %973 = vmatpush1.bf16.msra.mxu0 %v1413_v32  ;;  %933 = vmatprep.subr.bf16.mxu1 %v1414_v33 }
  0x74   : > { %974 = vmatprep.subr.bf16.mxu0 %v1416_v34 }
  0x76   : > { %934 = vmatpush1.bf16.msra.mxu1 %v1418_v35 }
  0x77   : > { %975 = vmatpush1.bf16.msra.mxu0 %v1419_v36  ;;  %935 = vmatprep.subr.bf16.mxu1 %v1420_v40 }
  0x78   : > { %976 = vmatprep.subr.bf16.mxu0 %v1422_v41 }
  0x7a   : > { %936 = vmatpush1.bf16.msra.mxu1 %v1424_v42 }
  0x7b   : > { %977 = vmatpush1.bf16.msra.mxu0 %v1425_v45  ;;  %937 = vmatprep.subr.bf16.mxu1 %v1426_v46 }
  0x7c   : > { %978 = vmatprep.subr.bf16.mxu0 %v1428_v47 }
  0x7e   : > { %938 = vmatpush1.bf16.msra.mxu1 %v1430_v48 }
  0x7f   : > { %979 = vmatpush1.bf16.msra.mxu0 %v1431_v49  ;;  %939 = vmatprep.subr.bf16.mxu1 %v1432_v51 }
  0x80   : > { %980 = vmatprep.subr.bf16.mxu0 %v1434_v52 }
  0x82   : > { %940 = vmatpush1.bf16.msra.mxu1 %v1436_v56 }
  0x83   : > { %981 = vmatpush1.bf16.msra.mxu0 %v1437_v57  ;;  %941 = vmatprep.subr.bf16.mxu1 %v1438_v58 }
  0x84   : > { %982 = vmatprep.subr.bf16.mxu0 %v1440_v59 }
  0x86   : > { %942 = vmatpush1.bf16.msra.mxu1 %v1442_v63 }
  0x87   : > { %983 = vmatpush1.bf16.msra.mxu0 %v1443_v0  ;;  %943 = vmatprep.subr.bf16.mxu1 %v1444_v1 }
  0x88   : > { %984 = vmatprep.subr.bf16.mxu0 %v1446_v2 }
  0x8a   : > { %944 = vmatpush1.bf16.msra.mxu1 %v1448_v3 }
  0x8b   : > { %985 = vmatpush1.bf16.msra.mxu0 %v1449_v4  ;;  %945 = vmatprep.subr.bf16.mxu1 %v1450_v5 }
  0x8c   : > { %986 = vmatprep.subr.bf16.mxu0 %v1452_v6 }
  0x8e   : > { %946 = vmatpush1.bf16.msra.mxu1 %v1454_v7 }
  0x8f   : > { %987 = vmatpush1.bf16.msra.mxu0 %v1455_v8  ;;  %947 = vmatprep.subr.bf16.mxu1 %v1456_v9 }
  0x90   : > { %988 = vmatprep.subr.bf16.mxu0 %v1458_v10 }
  0x92   : > { %948 = vmatpush1.bf16.msra.mxu1 %v1460_v11 }
  0x93   : > { %989 = vmatpush1.bf16.msra.mxu0 %v1461_v12 }
  0x95   : > { %950 = vmatmul.mubr.bf16.vlgmr.msra.gmra.mrb[0].mxu1 %v583_v54 }
  0x96   : > { %991 = vmatmul.mubr.bf16.vlgmr.msra.gmra.mrb[0].mxu0 %v590_v61 }
 0x168   : > { %v951_v13 = vpop.f32.mrb[0].mxu1 }
 0x169   : > { %v992_v14 = vpop.f32.mrb[0].mxu0  ;;  %v953_v16 = vpop.f32.mrb[1].mxu1 }
 0x16a   : > { %v993_v15 = vadd.f32 %v992_v14, %v951_v13  ;;  %v994_v17 = vpop.f32.mrb[1].mxu0  ;;  %v955_v19 = vpop.f32.mrb[2].mxu1 }
 0x16b   : > { %v995_v18 = vadd.f32 %v994_v17, %v953_v16  ;;  %v996_v20 = vpop.f32.mrb[2].mxu0  ;;  %v956_v22 = vpop.f32.mrb[3].mxu1  ;;  %1008 = sbr.rel (%p1284_p1) target bundleno = 442 (0x1ba), region = 74 }
 0x16c   : > { %v997_v23 = vpop.f32.mrb[3].mxu0 }
 0x16d   : > { %v1001_v24 = vcombine.low %v993_v15, %v995_v18 }
 0x16f   : > { %v1003_v25 = vadd.f32 %v1001_v24, %v509_v21 }
 0x171   : > { %1004 = vst [vmem:[#allocation2] sm:$0xff] %v1003_v25 }
 0x178   : > { %v1009_v26 = vld [vmem:[#allocation2] sm:$0xff] }
 0x179   : > { %v1011_v27 = vcombine.high %v1009_v26, %v1009_v26  ;;  %v1014_v28 = vsel %vm1013_vm0, %v1009_v26, 0.0 }
 0x17a   : > { %v1015_v29 = vrot.slane %v1014_v28, 4 }
 0x17b   : > { %v1021_v30 = vsel %vm1013_vm0, %v1011_v27, 0.0 }
 0x17c   : > { %v1016_v31 = vadd.f32 %v1015_v29, %v1014_v28  ;;  %v1022_v32 = vrot.slane %v1021_v30, 4 }
 0x17e   : > { %v1017_v33 = vrot.slane %v1016_v31, 2  ;;  %v1023_v34 = vadd.f32 %v1022_v32, %v1021_v30 }
 0x180   : > { %v1018_v35 = vadd.f32 %v1017_v33, %v1016_v31  ;;  %v1024_v36 = vrot.slane %v1023_v34, 2 }
 0x182   : > { %v1019_v37 = vrot.slane %v1018_v35, 1  ;;  %v1025_v38 = vadd.f32 %v1024_v36, %v1023_v34 }
 0x184   : > { %v1020_v39 = vadd.f32 %v1019_v37, %v1018_v35  ;;  %v1026_v40 = vrot.slane %v1025_v38, 1 }
 0x186   : > { %v1027_v41 = vadd.f32 %v1026_v40, %v1025_v38  ;;  %v1029_v42 = vmul.f32 0.25, %v1020_v39 }
 0x188   : > { %v1030_v43 = vmul.f32 0.25, %v1027_v41 }
 0x18a   : > { %v1033_v44 = vcombine.low %v1029_v42, %v1030_v43 }
 0x18c   : > { %v1035_v45 = vsub.f32 %v1009_v26, %v1033_v44 }
 0x18e   : > { %v1036_v46 = vmul.f32 %v1035_v45, %v1035_v45 }
 0x190   : > { %v1038_v47 = vcombine.high %v1036_v46, %v1036_v46  ;;  %v1040_v48 = vsel %vm1013_vm0, %v1036_v46, 0.0 }
 0x191   : > { %v1041_v49 = vrot.slane %v1040_v48, 4 }
 0x192   : > { %v1047_v50 = vsel %vm1013_vm0, %v1038_v47, 0.0 }
 0x193   : > { %v1042_v51 = vadd.f32 %v1041_v49, %v1040_v48  ;;  %v1048_v52 = vrot.slane %v1047_v50, 4 }
 0x195   : > { %v1043_v53 = vrot.slane %v1042_v51, 2  ;;  %v1049_v54 = vadd.f32 %v1048_v52, %v1047_v50 }
 0x197   : > { %v1044_v55 = vadd.f32 %v1043_v53, %v1042_v51  ;;  %v1050_v56 = vrot.slane %v1049_v54, 2 }
 0x199   : > { %v1045_v57 = vrot.slane %v1044_v55, 1  ;;  %v1051_v58 = vadd.f32 %v1050_v56, %v1049_v54 }
 0x19b   : > { %v1046_v59 = vadd.f32 %v1045_v57, %v1044_v55  ;;  %v1052_v60 = vrot.slane %v1051_v58, 1 }
 0x19d   : > { %v1053_v61 = vadd.f32 %v1052_v60, %v1051_v58  ;;  %v1054_v62 = vmul.f32 0.25, %v1046_v59 }
 0x19f   : > { %v1055_v63 = vmul.f32 0.25, %v1053_v61  ;;  %v1056_v0 = vadd.f32 1e-05, %v1054_v62 }
 0x1a1   : > { %v1057_v1 = vadd.f32 1e-05, %v1055_v63  ;;  %1464 = vrsqrt.f32 %v1056_v0 }
 0x1a3   : > { %1466 = vrsqrt.f32 %v1057_v1 }
 0x1ab   : > { %v1465_v2 = vpop.eup %1464 }
 0x1ad   : > { %v1467_v3 = vpop.eup %1466 }
 0x1ae   : > { %v1062_v4 = vcombine.low %v1465_v2, %v1467_v3 }
 0x1b0   : > { %v1064_v5 = vmul.f32 %v1062_v4, %v1035_v45 }
 0x1b2   : > { %vm1065_vm1 = vcmp.ge.f32.partialorder %v1064_v5, 0.0  ;;  %v1066_v6 = vmul.f32 0.2, %v1064_v5 }
 0x1b4   : > { %v1067_v7 = vsel %vm1065_vm1, %v1064_v5, %v1066_v6 }
 0x1b5   : > { %v1069_v8 = vcombine.high %v1067_v7, %v1067_v7 }
 0x1b7   : > { %v1285_v9 = vpack.c.bf16 %v1069_v8, %v1067_v7 }
 0x1b9   : > { %1286 = vst.sshfl [vmem:[%s1778_s7] sm:$0x33 pattern:$0x76325410] %v1285_v9 }
 0x1ba PF: > { %s12_s17 = sadd.s32 1, %s1538_s17   ;;  %s1884_s9 = smov %s1510_s10 }
 0x1bb   : > { %p9_p2 = scmp.ge.s32.totalorder %s12_s17, 34   ;;  %s1885_s10 = smov %s1622_s25 }
 0x1bc   : > { %s1886_s11 = smov %s1526_s14  ;;  %s1887_s12 = smov %s1530_s15 }
 0x1bd   : > { %s1888_s13 = smov %s1534_s16  ;;  %s1889_s14 = smov %s1893_s18 }
 0x1be   : > { %s1890_s15 = smov %s1897_s19  ;;  %s1891_s16 = smov %s1901_s20 }
 0x1bf   :  { %11 = sbr.rel (!%p9_p2) target bundleno = 5 (0x5), region = 112 }

// kernel: discriminator_forward.9
= control target key start
LH: loop header
LB: loop body
LE: loop exit
PB: predicated region body
PF: predicated region fallthrough
CT: control target
= control target key end

     0   :  { %s913_s9 = smov 0   ;;  %s915_s10 = smov 0   ;;  %s1013_s0 = inlined_call_operand.vmem [shape: bf16[2,4,8192], index: 0, kind: input, shape index: {}]   ;;  %s1014_s1 = inlined_call_operand.vmem [shape: bf16[8192,128], index: 1, kind: input, shape index: {}]   ;;  %s1015_s2 = inlined_call_operand.vmem [shape: f32[2,4,128], index: 2, kind: output, shape index: {}]  }
   0x1   :  { %s917_s11 = smov 0   ;;  %s919_s12 = smov 0  }
   0x2   :  { %s921_s13 = smov 0  }
   0x3 LB: > { %s24_s14 = sadd.s32 1, %s886_s11  ;;  %s31_s15 = sadd.s32 1, %s890_s12  ;;  %s894_s13 = sphi %s921_s13, %s12_s13   ;;  %s890_s12 = sphi %s919_s12, %s1019_s12   ;;  %s886_s11 = sphi %s917_s11, %s1018_s11   ;;  %s882_s10 = sphi %s915_s10, %s1017_s10   ;;  %s878_s9 = sphi %s913_s9, %s1016_s9  }
   0x4   : > { %p25_p0 = scmp.ge.s32.totalorder %s24_s14, 16  ;;  %p694_p1 = scmp.ge.s32.totalorder %s894_s13, 1 }
   0x5   : > { %p156_p2 = scmp.lt.s32.totalorder %s894_s13, 33 }
   0x6   : > { %s1021_s14 = smov (%p25_p0, %s24_s14), 0  ;;  %s1023_s15 = smov (!%p25_p0, %s31_s15), %s890_s12 }
   0x7   : > { %p157_p3 = pnand %p694_p1, %p156_p2  ;;  %p33_p4 = scmp.ge.s32.totalorder %s1023_s15, 2 }
   0x8   : > { %s695_s16 = sshll.u32 (!%p157_p3), %s878_s9, 2  ;;  %p193_p5 = scmp.lt.s32.totalorder (!%p157_p3), %s882_s10, 1 }
   0x9   : > { %s1025_s15 = smov (%p33_p4, %s1023_s15), 0  ;;  %160 = sbr.rel (%p157_p3) target bundleno = 291 (0x123), region = 28 }
   0xa   : > { %p195_p6 = scmp.lt.s32.totalorder (!%p157_p3), %s695_s16, 63  ;;  %s698_s17 = sshll.u32 (!%p157_p3), %s878_s9, 6 }
   0xb   : > { %p203_p7 = scmp.lt.s32.totalorder (!%p157_p3), %s698_s17, 1023  ;;  %p701_p8 = scmp.ne.s32.totalorder (!%p157_p3), %s878_s9, 0 }
  0x10   : > { %s1027_s10 = smov (!%p193_p5, %s882_s10), 1  ;;  %s1029_s16 = smov (!%p195_p6, %s695_s16), 63 }
  0x11   : > { %s696_s18 = sshll.u32 %s1027_s10, 6  ;;  %s700_s20 = sshll.u32 %s1027_s10, 2  ;;  %v896_v0 = vmov (!%p701_p8), 0.0  }
  0x12   : > { %s198_s19 = sadd.s32 %s696_s18, %s1029_s16  ;;  %s950_s24 = scalar_lea.vmem %s1015_s2, %s700_s20  ;;  %223 = vst [vmem:[#allocation2] sm:$0xf] (!%p701_p8), %v896_v0 }
  0x13   : > { %s697_s21 = sshll.u32 %s198_s19, 1  ;;  %s1031_s17 = smov (!%p203_p7, %s698_s17), 1023 }
  0x14   : > { %s955_s27 = scalar_lea.vmem %s1013_s0, %s697_s21  ;;  %s699_s28 = sshll.u32 %s1031_s17, 2 }
  0x15   : > { %s960_s3 = scalar_lea.vmem %s1014_s1, %s699_s28  ;;  %222 = sbr.rel (%p701_p8) target bundleno = 28 (0x1c), region = 32 }
  0x1c PF: > { %v823_v1 = vld [vmem:[%s960_s3 + $0x40] sm:$0xff]   ;;  %v827_v5 = vld [vmem:[%s960_s3 + $0x48] sm:$0xff]   ;;  %v831_v9 = vld [vmem:[%s960_s3 + $0x50] sm:$0xff]   ;;  %v295_v31 = vlaneseq  ;;  %v897_v35 = vmov 1983009808   ;;  %p734_p9 = scmp.ne.s32.totalorder %s878_s9, 15 }
  0x1d   : > { %v824_v2 = vld [vmem:[%s960_s3 + $0xc0] sm:$0xff]   ;;  %737 = vmatprep.subr.bf16.mxu0 %v823_v1  ;;  %v828_v6 = vld [vmem:[%s960_s3 + $0xc8] sm:$0xff]   ;;  %v832_v10 = vld [vmem:[%s960_s3 + $0xd0] sm:$0xff]   ;;  %v293_v36 = vunpack.c.l.s4 %v897_v35 }
  0x1e   : > { %v825_v3 = vld [vmem:[%s960_s3] sm:$0xff]   ;;  %759 = vmatprep.subr.bf16.mxu1 %v824_v2  ;;  %v829_v7 = vld [vmem:[%s960_s3 + $0x8] sm:$0xff]   ;;  %v833_v11 = vld [vmem:[%s960_s3 + $0x10] sm:$0xff]   ;;  %v296_v37 = vshrl.u32 %v295_v31, 7 }
  0x1f   : > { %v826_v4 = vld [vmem:[%s960_s3 + $0x80] sm:$0xff]   ;;  %738 = vmatpush3.bf16.msra.mxu0 %v825_v3  ;;  %v830_v8 = vld [vmem:[%s960_s3 + $0x88] sm:$0xff]   ;;  %v834_v12 = vld [vmem:[%s960_s3 + $0x90] sm:$0xff]   ;;  %v294_v38 = vunpack.c.0.s8 %v293_v36 }
  0x20   : > { %760 = vmatpush3.bf16.msra.mxu1 %v826_v4  ;;  %739 = vmatprep.subr.bf16.mxu0 %v827_v5  ;;  %v835_v13 = vld [vmem:[%s960_s3 + $0x58] sm:$0xff]   ;;  %v839_v17 = vld [vmem:[%s960_s3 + $0x60] sm:$0xff]   ;;  %v843_v21 = vld [vmem:[%s960_s3 + $0x68] sm:$0xff]  }
  0x21   : > { %761 = vmatprep.subr.bf16.mxu1 %v828_v6  ;;  %v836_v14 = vld [vmem:[%s960_s3 + $0xd8] sm:$0xff]   ;;  %v840_v18 = vld [vmem:[%s960_s3 + $0xe0] sm:$0xff]   ;;  %v844_v22 = vld [vmem:[%s960_s3 + $0xe8] sm:$0xff]   ;;  %v297_v40 = vsub.s32 %v294_v38, %v296_v37 }
  0x22   : > { %v837_v15 = vld [vmem:[%s960_s3 + $0x18] sm:$0xff]   ;;  %v841_v19 = vld [vmem:[%s960_s3 + $0x20] sm:$0xff]   ;;  %v845_v23 = vld [vmem:[%s960_s3 + $0x28] sm:$0xff]  }
  0x23   : > { %740 = vmatpush3.bf16.msra.mxu0 %v829_v7  ;;  %v838_v16 = vld [vmem:[%s960_s3 + $0x98] sm:$0xff]   ;;  %v842_v20 = vld [vmem:[%s960_s3 + $0xa0] sm:$0xff]   ;;  %v846_v24 = vld [vmem:[%s960_s3 + $0xa8] sm:$0xff]  }
  0x24   : > { %762 = vmatpush3.bf16.msra.mxu1 %v830_v8  ;;  %741 = vmatprep.subr.bf16.mxu0 %v831_v9  ;;  %v847_v25 = vld [vmem:[%s960_s3 + $0x70] sm:$0xff]   ;;  %v851_v29 = vld [vmem:[%s960_s3 + $0x78] sm:$0xff]   ;;  %v225_v34 = vld [vmem:[%s955_s27] sm:$0xff] }
  0x25   : > { %763 = vmatprep.subr.bf16.mxu1 %v832_v10  ;;  %v848_v26 = vld [vmem:[%s960_s3 + $0xf0] sm:$0xff]   ;;  %v852_v30 = vld [vmem:[%s960_s3 + $0xf8] sm:$0xff]   ;;  %v291_v39 = vcombine.high %v225_v34, %v225_v34  ;;  %v298_v41 = vrot.slane %v225_v34, %v297_v40  ;;  %v224_v53 = vld [vmem:[#allocation2] sm:$0xf] }
  0x26   : > { %v849_v27 = vld [vmem:[%s960_s3 + $0x30] sm:$0xff]   ;;  %v853_v32 = vld [vmem:[%s960_s3 + $0x38] sm:$0xff]  }
  0x27   : > { %742 = vmatpush3.bf16.msra.mxu0 %v833_v11  ;;  %v850_v28 = vld [vmem:[%s960_s3 + $0xb0] sm:$0xff]   ;;  %v854_v33 = vld [vmem:[%s960_s3 + $0xb8] sm:$0xff]   ;;  %v305_v42 = vrot.slane %v291_v39, %v297_v40  ;;  %v306_v43 = vcombine.high %v298_v41, %v298_v41 }
  0x28   : > { %764 = vmatpush3.bf16.msra.mxu1 %v834_v12  ;;  %743 = vmatprep.subr.bf16.mxu0 %v835_v13 }
  0x29   : > { %765 = vmatprep.subr.bf16.mxu1 %v836_v14  ;;  %v307_v44 = vcombine.high %v305_v42, %v305_v42  ;;  %536 = vmatprep.mubr.bf16.mxu0 %v306_v43 }
  0x2b   : > { %744 = vmatpush3.bf16.msra.mxu0 %v837_v15  ;;  %576 = vmatprep.mubr.bf16.mxu1 %v307_v44 }
  0x2c   : > { %766 = vmatpush3.bf16.msra.mxu1 %v838_v16  ;;  %745 = vmatprep.subr.bf16.mxu0 %v839_v17 }
  0x2d   : > { %767 = vmatprep.subr.bf16.mxu1 %v840_v18 }
  0x2f   : > { %746 = vmatpush3.bf16.msra.mxu0 %v841_v19 }
  0x30   : > { %768 = vmatpush3.bf16.msra.mxu1 %v842_v20  ;;  %747 = vmatprep.subr.bf16.mxu0 %v843_v21 }
  0x31   : > { %769 = vmatprep.subr.bf16.mxu1 %v844_v22 }
  0x33   : > { %748 = vmatpush3.bf16.msra.mxu0 %v845_v23 }
  0x34   : > { %770 = vmatpush3.bf16.msra.mxu1 %v846_v24  ;;  %749 = vmatprep.subr.bf16.mxu0 %v847_v25 }
  0x35   : > { %771 = vmatprep.subr.bf16.mxu1 %v848_v26 }
  0x37   : > { %750 = vmatpush3.bf16.msra.mxu0 %v849_v27 }
  0x38   : > { %772 = vmatpush3.bf16.msra.mxu1 %v850_v28  ;;  %751 = vmatprep.subr.bf16.mxu0 %v851_v29 }
  0x39   : > { %773 = vmatprep.subr.bf16.mxu1 %v852_v30 }
  0x3b   : > { %752 = vmatpush3.bf16.msra.mxu0 %v853_v32 }
  0x3c   : > { %774 = vmatpush3.bf16.msra.mxu1 %v854_v33 }
  0x3e   : > { %537 = vmatmul.mubr.bf16.vlgmr.msra.gmra.mrb[0].mxu0 %v298_v41 }
  0x3f   : > { %577 = vmatmul.mubr.bf16.vlgmr.msra.gmra.mrb[0].mxu1 %v305_v42 }
 0x111   : > { %v753_v45 = vpop.f32.mrb[0].mxu0 }
 0x112   : > { %v775_v46 = vpop.f32.mrb[0].mxu1  ;;  %v754_v47 = vpop.f32.mrb[1].mxu0 }
 0x113   : > { %v776_v48 = vpop.f32.mrb[1].mxu1  ;;  %v755_v49 = vadd.f32 %v754_v47, %v753_v45  ;;  %v756_v51 = vpop.f32.mrb[2].mxu0 }
 0x114   : > { %v777_v50 = vadd.f32 %v776_v48, %v775_v46  ;;  %v778_v52 = vpop.f32.mrb[2].mxu1  ;;  %v757_v54 = vpop.f32.mrb[3].mxu0  ;;  %589 = sbr.rel (%p734_p9) target bundleno = 291 (0x123), region = 36 }
 0x115   : > { %v779_v55 = vpop.f32.mrb[3].mxu1 }
 0x116   : > { %v579_v56 = vadd.f32 %v777_v50, %v755_v49 }
 0x118   : > { %v584_v57 = vadd.f32 %v579_v56, %v224_v53 }
 0x11a   : > { %585 = vst [vmem:[#allocation2] sm:$0xf] %v584_v57 }
 0x121   : > { %v590_v58 = vld [vmem:[#allocation2] sm:$0xf] }
 0x122   : > { %591 = vst [vmem:[%s950_s24] sm:$0xf] %v590_v58 }
 0x123 PF: > { %s12_s13 = sadd.s32 1, %s894_s13   ;;  %s1016_s9 = smov %s886_s11 }
 0x124   : > { %p9_p10 = scmp.ge.s32.totalorder %s12_s13, 34   ;;  %s1017_s10 = smov %s890_s12 }
 0x125   : > { %s1018_s11 = smov %s1021_s14  ;;  %s1019_s12 = smov %s1025_s15 }
 0x126   :  { %11 = sbr.rel (!%p9_p10) target bundleno = 3 (0x3), region = 69 }

</bundles_post_ra>
